<compile_context>
chip_gen: v5e
topology: v5e:2x2
jax: 0.10.0
libtpu: 0.0.40
codegen_flags: <defaults>
</compile_context>

<pallas_src>
import jax
import jax.numpy as jnp
from jax.experimental import pallas as pl
from jax.experimental.pallas import tpu as pltpu


# ----------------------------------------------------------------------------
# Generic fused matmul + bias kernel (single block, whole operands in VMEM).
#   out = bf16(x) @ w_bf16 + b        (f32 accumulation)
# Used for (a) the hoisted per-layer input projections (both directions at
# once) and (b) the final fully-connected layer (lane-dense padded output).
# ----------------------------------------------------------------------------
def _matmul_bias_kernel(x_ref, w_ref, b_ref, o_ref):
    acc = jnp.dot(
        x_ref[...].astype(jnp.bfloat16),
        w_ref[...],
        preferred_element_type=jnp.float32,
    )
    o_ref[...] = (acc + b_ref[...]).astype(o_ref.dtype)


def matmul_bias(x, w_t, b):
    """x: (N, D) f32, w_t: (D, C) bf16, b: (1, C) f32 -> (N, C) f32."""
    N, D = x.shape
    C = w_t.shape[1]
    return pl.pallas_call(
        _matmul_bias_kernel,
        out_shape=jax.ShapeDtypeStruct((N, C), jnp.float32),
        grid=(1,),
        in_specs=[
            pl.BlockSpec((N, D), lambda i: (0, 0)),
            pl.BlockSpec((D, C), lambda i: (0, 0)),
            pl.BlockSpec((1, C), lambda i: (0, 0)),
        ],
        out_specs=pl.BlockSpec((N, C), lambda i: (0, 0)),
    )(x, w_t, b)


# ----------------------------------------------------------------------------
# Fused bidirectional LSTM recurrence for one layer.
#   gates: (T, B, 8H) f32 = precomputed  X @ [W_ih_f | W_ih_b] + (b_ih + b_hh)
#          columns [0:4H] are the forward-direction input gates,
#          columns [4H:8H] the backward-direction ones (PyTorch order i,f,g,o).
#   Output: (T, B, 2H) with fwd hidden in lanes [0:H], bwd in [H:2H].
# Single kernel invocation; time loop unrolled inside, h/c carried in vregs.
# ----------------------------------------------------------------------------
def _bilstm_kernel(g_ref, whh_f_ref, whh_b_ref, o_ref):
    T, B, _ = g_ref.shape
    H = whh_f_ref.shape[0]
    whh_f = whh_f_ref[...]          # (H, 4H) bf16, resident for the whole loop
    whh_b = whh_b_ref[...]          # (H, 4H) bf16

    def gates_to_hc(gates, c_prev):
        # Gate nonlinearities and state updates kept in f32 (VPU/EUP friendly
        # on v5e, fine on v6e/v7x).
        i = jax.nn.sigmoid(gates[:, 0 * H:1 * H])
        f = jax.nn.sigmoid(gates[:, 1 * H:2 * H])
        g = jnp.tanh(gates[:, 2 * H:3 * H])
        o = jax.nn.sigmoid(gates[:, 3 * H:4 * H])
        c = f * c_prev + i * g
        h = o * jnp.tanh(c)
        return h, c

    def step(t, carry):
        h_f, c_f, h_b, c_b = carry

        # ---- forward direction, sequence position t ----
        g_row_f = g_ref[t]                               # (B, 8H) f32
        gates_f = g_row_f[:, 0:4 * H] + jnp.dot(
            h_f.astype(jnp.bfloat16), whh_f,
            preferred_element_type=jnp.float32)
        h_f, c_f = gates_to_hc(gates_f, c_f)
        o_ref[t, :, 0:H] = h_f.astype(o_ref.dtype)

        # ---- backward direction, sequence position T-1-t ----
        tb = T - 1 - t
        g_row_b = g_ref[tb]                              # (B, 8H) f32
        gates_b = g_row_b[:, 4 * H:8 * H] + jnp.dot(
            h_b.astype(jnp.bfloat16), whh_b,
            preferred_element_type=jnp.float32)
        h_b, c_b = gates_to_hc(gates_b, c_b)
        o_ref[tb, :, H:2 * H] = h_b.astype(o_ref.dtype)

        return h_f, c_f, h_b, c_b

    zeros = jnp.zeros((B, H), jnp.float32)
    jax.lax.fori_loop(0, T, step, (zeros, zeros, zeros, zeros), unroll=True)


def bilstm_recurrence(gates_tbg, whh_f_t, whh_b_t):
    """gates_tbg: (T, B, 8H) f32 -> (T, B, 2H) f32."""
    T, B, G = gates_tbg.shape
    H = whh_f_t.shape[0]
    return pl.pallas_call(
        _bilstm_kernel,
        out_shape=jax.ShapeDtypeStruct((T, B, 2 * H), jnp.float32),
        grid=(1,),
        in_specs=[
            pl.BlockSpec((T, B, G), lambda i: (0, 0, 0)),
            pl.BlockSpec((H, 4 * H), lambda i: (0, 0)),
            pl.BlockSpec((H, 4 * H), lambda i: (0, 0)),
        ],
        out_specs=pl.BlockSpec((T, B, 2 * H), lambda i: (0, 0, 0)),
        compiler_params=pltpu.CompilerParams(
            dimension_semantics=("arbitrary",)),
    )(gates_tbg, whh_f_t, whh_b_t)


# ----------------------------------------------------------------------------
# Parameter init (deterministic; same shapes / scale as PyTorch defaults).
# Weights are pre-transposed / concatenated / bf16-cast for the kernels:
#   per layer: w_in  (D_in, 8H) bf16  = [W_ih_fwd^T | W_ih_bwd^T]
#              b_in  (1, 8H)    f32   = [b_ih_f + b_hh_f | b_ih_b + b_hh_b]
#              whh_f, whh_b (H, 4H) bf16
#   fc: weight/bias zero-padded to a multiple of 128 output columns.
# ----------------------------------------------------------------------------
def init_params(key, input_size, hidden_size, num_layers, num_classes):
    H = hidden_size
    k = 1.0 / float(H) ** 0.5
    layers = []
    for layer in range(num_layers):
        d_in = input_size if layer == 0 else 2 * H
        w_in_cols, b_cols, whh_list = [], [], []
        for _direction in range(2):
            key, k1, k2, k3, k4 = jax.random.split(key, 5)
            w_ih = jax.random.uniform(k1, (4 * H, d_in), jnp.float32, -k, k)
            w_hh = jax.random.uniform(k2, (4 * H, H), jnp.float32, -k, k)
            b_ih = jax.random.uniform(k3, (4 * H,), jnp.float32, -k, k)
            b_hh = jax.random.uniform(k4, (4 * H,), jnp.float32, -k, k)
            w_in_cols.append(w_ih.T)                 # (d_in, 4H)
            b_cols.append(b_ih + b_hh)               # (4H,)
            whh_list.append(w_hh.T)                  # (H, 4H)
        w_in = jnp.concatenate(w_in_cols, axis=1).astype(jnp.bfloat16)
        b_in = jnp.concatenate(b_cols)[None, :].astype(jnp.float32)
        whh_f = whh_list[0].astype(jnp.bfloat16)
        whh_b = whh_list[1].astype(jnp.bfloat16)
        layers.append((w_in, b_in, whh_f, whh_b))

    kf = 1.0 / float(2 * H) ** 0.5
    key, k1, k2 = jax.random.split(key, 3)
    w_fc = jax.random.uniform(k1, (num_classes, 2 * H), jnp.float32, -kf, kf)
    b_fc = jax.random.uniform(k2, (num_classes,), jnp.float32, -kf, kf)
    c_pad = 128 * pl.cdiv(num_classes, 128)          # lane-dense output width
    w_fc_pad = jnp.zeros((2 * H, c_pad), jnp.float32).at[:, :num_classes].set(
        w_fc.T).astype(jnp.bfloat16)
    b_fc_pad = jnp.zeros((1, c_pad), jnp.float32).at[0, :num_classes].set(b_fc)
    return layers, (w_fc_pad, b_fc_pad)


# ----------------------------------------------------------------------------
# Full forward pass matching the PyTorch module.
# ----------------------------------------------------------------------------
def lstm_model_forward(x_btd, lstm_params, fc_params, *, num_classes):
    # x_btd: (B, T, input_size)   (batch_first, like the PyTorch module)
    B, T, _ = x_btd.shape
    x = jnp.transpose(x_btd, (1, 0, 2))                  # (T, B, D) time-major

    for (w_in, b_in, whh_f, whh_b) in lstm_params:
        d_in = x.shape[-1]
        # Hoisted input projection: one big MXU matmul for all T steps and
        # both directions (M = T*B instead of M = B per step).
        gates = matmul_bias(x.reshape(T * B, d_in), w_in, b_in)   # (T*B, 8H)
        gates = gates.reshape(T, B, -1)                           # free reshape
        x = bilstm_recurrence(gates, whh_f, whh_b)                # (T, B, 2H)

    # Matches `out.view(s*b, h)` on the batch_first output (B, T, 2H).
    out = jnp.transpose(x, (1, 0, 2)).reshape(B * T, x.shape[-1])
    w_fc_pad, b_fc_pad = fc_params
    logits_pad = matmul_bias(out, w_fc_pad, b_fc_pad)             # (B*T, 128)
    return logits_pad[:, :num_classes]


if __name__ == "__main__":
    # hidden_size must be 128 so that 2*hidden == 256 == fc's input width.
    input_size, hidden_size, num_layers, num_classes = 64, 128, 2, 10
    B, T = 2, 8

    key = jax.random.PRNGKey(0)
    key, kx = jax.random.split(key)
    x = jax.random.normal(kx, (B, T, input_size), jnp.float32)
    lstm_params, fc_params = init_params(
        key, input_size, hidden_size, num_layers, num_classes)

    forward = jax.jit(lstm_model_forward, static_argnames=("num_classes",))
    out = forward(x, lstm_params, fc_params, num_classes=num_classes)
    out = jax.block_until_ready(out)
    assert out.shape == (B * T, num_classes), out.shape
    assert bool(jnp.all(jnp.isfinite(out)))
    print("KERNEL_OK")
</pallas_src>

<mosaic_0001>
module attributes {stable_mosaic.version = 11 : i64} {
  func.func @_matmul_bias_kernel(%arg0: i32, %arg1: memref<16x64xf32, #tpu.memory_space<vmem>>, %arg2: memref<64x1024xbf16, #tpu.memory_space<vmem>>, %arg3: memref<1x1024xf32, #tpu.memory_space<vmem>>, %arg4: memref<16x1024xf32, #tpu.memory_space<vmem>>) attributes {dimension_semantics = [#tpu.dimension_semantics<arbitrary>], iteration_bounds = array<i64: 1>, scalar_prefetch = 0 : i64, scratch_operands = 0 : i64, tpu.core_type = #tpu.core_type<tc>, window_params = [{pipeline_mode = #tpu.pipeline_mode<synchronous>, transform_indices = @transform_0, window_bounds = array<i64: 16, 64>}, {pipeline_mode = #tpu.pipeline_mode<synchronous>, transform_indices = @transform_1, window_bounds = array<i64: 64, 1024>}, {pipeline_mode = #tpu.pipeline_mode<synchronous>, transform_indices = @transform_2, window_bounds = array<i64: 1, 1024>}, {pipeline_mode = #tpu.pipeline_mode<synchronous>, transform_indices = @transform_3, window_bounds = array<i64: 16, 1024>}]} {
    %c0 = arith.constant 0 : index
    %c0_0 = arith.constant 0 : index
    %0 = vector.load %arg1[%c0, %c0_0] : memref<16x64xf32, #tpu.memory_space<vmem>>, vector<16x64xf32>
    %1 = arith.truncf %0 : vector<16x64xf32> to vector<16x64xbf16>
    %c0_1 = arith.constant 0 : index
    %c0_2 = arith.constant 0 : index
    %2 = vector.load %arg2[%c0_1, %c0_2] : memref<64x1024xbf16, #tpu.memory_space<vmem>>, vector<64x1024xbf16>
    %cst = arith.constant dense<0.000000e+00> : vector<16x1024xf32>
    %3 = tpu.matmul %1, %2, %cst {dimension_numbers = #tpu.dot_dimension_numbers<[1], [0], [0], [1], [0, 0, 1, 1], [], []>} : vector<16x64xbf16>, vector<64x1024xbf16>, vector<16x1024xf32> -> vector<16x1024xf32>
    %c0_3 = arith.constant 0 : index
    %c0_4 = arith.constant 0 : index
    %4 = vector.load %arg3[%c0_3, %c0_4] : memref<1x1024xf32, #tpu.memory_space<vmem>>, vector<1x1024xf32>
    %5 = vector.broadcast %4 : vector<1x1024xf32> to vector<16x1024xf32>
    %6 = arith.addf %3, %5 : vector<16x1024xf32>
    %c0_5 = arith.constant 0 : index
    %c0_6 = arith.constant 0 : index
    %7 = vector.load %arg4[%c0_5, %c0_6] : memref<16x1024xf32, #tpu.memory_space<vmem>>, vector<16x1024xf32>
    tpu.vector_store %arg4[%c0_5, %c0_6], %6 {strides = array<i32>} : memref<16x1024xf32, #tpu.memory_space<vmem>>, vector<16x1024xf32>,
    return
  }
  func.func @transform_0(%arg0: i32) -> (i32, i32) {
    %c0_i32 = arith.constant 0 : i32
    %c0_i32_0 = arith.constant 0 : i32
    %c0_i32_1 = arith.constant 0 : i32
    return %c0_i32, %c0_i32_0 : i32, i32
  }
  func.func @transform_1(%arg0: i32) -> (i32, i32) {
    %c0_i32 = arith.constant 0 : i32
    %c0_i32_0 = arith.constant 0 : i32
    %c0_i32_1 = arith.constant 0 : i32
    return %c0_i32, %c0_i32_0 : i32, i32
  }
  func.func @transform_2(%arg0: i32) -> (i32, i32) {
    %c0_i32 = arith.constant 0 : i32
    %c0_i32_0 = arith.constant 0 : i32
    %c0_i32_1 = arith.constant 0 : i32
    return %c0_i32, %c0_i32_0 : i32, i32
  }
  func.func @transform_3(%arg0: i32) -> (i32, i32) {
    %c0_i32 = arith.constant 0 : i32
    %c0_i32_0 = arith.constant 0 : i32
    %c0_i32_1 = arith.constant 0 : i32
    return %c0_i32, %c0_i32_0 : i32, i32
  }
}

module attributes {stable_mosaic.version = 11 : i64} {
  func.func @_matmul_bias_kernel(%arg0: i32, %arg1: memref<16x256xf32, #tpu.memory_space<vmem>>, %arg2: memref<256x1024xbf16, #tpu.memory_space<vmem>>, %arg3: memref<1x1024xf32, #tpu.memory_space<vmem>>, %arg4: memref<16x1024xf32, #tpu.memory_space<vmem>>) attributes {dimension_semantics = [#tpu.dimension_semantics<arbitrary>], iteration_bounds = array<i64: 1>, scalar_prefetch = 0 : i64, scratch_operands = 0 : i64, tpu.core_type = #tpu.core_type<tc>, window_params = [{pipeline_mode = #tpu.pipeline_mode<synchronous>, transform_indices = @transform_0, window_bounds = array<i64: 16, 256>}, {pipeline_mode = #tpu.pipeline_mode<synchronous>, transform_indices = @transform_1, window_bounds = array<i64: 256, 1024>}, {pipeline_mode = #tpu.pipeline_mode<synchronous>, transform_indices = @transform_2, window_bounds = array<i64: 1, 1024>}, {pipeline_mode = #tpu.pipeline_mode<synchronous>, transform_indices = @transform_3, window_bounds = array<i64: 16, 1024>}]} {
    %c0 = arith.constant 0 : index
    %c0_0 = arith.constant 0 : index
    %0 = vector.load %arg1[%c0, %c0_0] : memref<16x256xf32, #tpu.memory_space<vmem>>, vector<16x256xf32>
    %1 = arith.truncf %0 : vector<16x256xf32> to vector<16x256xbf16>
    %c0_1 = arith.constant 0 : index
    %c0_2 = arith.constant 0 : index
    %2 = vector.load %arg2[%c0_1, %c0_2] : memref<256x1024xbf16, #tpu.memory_space<vmem>>, vector<256x1024xbf16>
    %cst = arith.constant dense<0.000000e+00> : vector<16x1024xf32>
    %3 = tpu.matmul %1, %2, %cst {dimension_numbers = #tpu.dot_dimension_numbers<[1], [0], [0], [1], [0, 0, 1, 1], [], []>} : vector<16x256xbf16>, vector<256x1024xbf16>, vector<16x1024xf32> -> vector<16x1024xf32>
    %c0_3 = arith.constant 0 : index
    %c0_4 = arith.constant 0 : index
    %4 = vector.load %arg3[%c0_3, %c0_4] : memref<1x1024xf32, #tpu.memory_space<vmem>>, vector<1x1024xf32>
    %5 = vector.broadcast %4 : vector<1x1024xf32> to vector<16x1024xf32>
    %6 = arith.addf %3, %5 : vector<16x1024xf32>
    %c0_5 = arith.constant 0 : index
    %c0_6 = arith.constant 0 : index
    %7 = vector.load %arg4[%c0_5, %c0_6] : memref<16x1024xf32, #tpu.memory_space<vmem>>, vector<16x1024xf32>
    tpu.vector_store %arg4[%c0_5, %c0_6], %6 {strides = array<i32>} : memref<16x1024xf32, #tpu.memory_space<vmem>>, vector<16x1024xf32>,
    return
  }
  func.func @transform_0(%arg0: i32) -> (i32, i32) {
    %c0_i32 = arith.constant 0 : i32
    %c0_i32_0 = arith.constant 0 : i32
    %c0_i32_1 = arith.constant 0 : i32
    return %c0_i32, %c0_i32_0 : i32, i32
  }
  func.func @transform_1(%arg0: i32) -> (i32, i32) {
    %c0_i32 = arith.constant 0 : i32
    %c0_i32_0 = arith.constant 0 : i32
    %c0_i32_1 = arith.constant 0 : i32
    return %c0_i32, %c0_i32_0 : i32, i32
  }
  func.func @transform_2(%arg0: i32) -> (i32, i32) {
    %c0_i32 = arith.constant 0 : i32
    %c0_i32_0 = arith.constant 0 : i32
    %c0_i32_1 = arith.constant 0 : i32
    return %c0_i32, %c0_i32_0 : i32, i32
  }
  func.func @transform_3(%arg0: i32) -> (i32, i32) {
    %c0_i32 = arith.constant 0 : i32
    %c0_i32_0 = arith.constant 0 : i32
    %c0_i32_1 = arith.constant 0 : i32
    return %c0_i32, %c0_i32_0 : i32, i32
  }
}

module attributes {stable_mosaic.version = 11 : i64} {
  func.func @_bilstm_kernel(%arg0: i32, %arg1: memref<8x2x1024xf32, #tpu.memory_space<vmem>>, %arg2: memref<128x512xbf16, #tpu.memory_space<vmem>>, %arg3: memref<128x512xbf16, #tpu.memory_space<vmem>>, %arg4: memref<8x2x256xf32, #tpu.memory_space<vmem>>) attributes {dimension_semantics = [#tpu.dimension_semantics<arbitrary>], iteration_bounds = array<i64: 1>, scalar_prefetch = 0 : i64, scratch_operands = 0 : i64, tpu.core_type = #tpu.core_type<tc>, window_params = [{pipeline_mode = #tpu.pipeline_mode<synchronous>, transform_indices = @transform_0, window_bounds = array<i64: 8, 2, 1024>}, {pipeline_mode = #tpu.pipeline_mode<synchronous>, transform_indices = @transform_1, window_bounds = array<i64: 128, 512>}, {pipeline_mode = #tpu.pipeline_mode<synchronous>, transform_indices = @transform_2, window_bounds = array<i64: 128, 512>}, {pipeline_mode = #tpu.pipeline_mode<synchronous>, transform_indices = @transform_3, window_bounds = array<i64: 8, 2, 256>}]} {
    %c0 = arith.constant 0 : index
    %c0_0 = arith.constant 0 : index
    %0 = vector.load %arg2[%c0, %c0_0] : memref<128x512xbf16, #tpu.memory_space<vmem>>, vector<128x512xbf16>
    %c0_1 = arith.constant 0 : index
    %c0_2 = arith.constant 0 : index
    %1 = vector.load %arg3[%c0_1, %c0_2] : memref<128x512xbf16, #tpu.memory_space<vmem>>, vector<128x512xbf16>
    %cst = arith.constant 0.000000e+00 : f32
    %2 = vector.broadcast %cst : f32 to vector<2x128xf32>
    %c0_i32 = arith.constant 0 : i32
    %3 = arith.index_cast %c0_i32 : i32 to index
    %c0_3 = arith.constant 0 : index
    %c0_4 = arith.constant 0 : index
    %4 = vector.load %arg1[%3, %c0_3, %c0_4] : memref<8x2x1024xf32, #tpu.memory_space<vmem>>, vector<1x2x1024xf32>
    %5 = vector.shape_cast %4 : vector<1x2x1024xf32> to vector<2x1024xf32>
    %6 = vector.extract_strided_slice %5 {offsets = [0, 0], sizes = [2, 512], strides = [1, 1]} : vector<2x1024xf32> to vector<2x512xf32>
    %7 = arith.truncf %2 : vector<2x128xf32> to vector<2x128xbf16>
    %cst_5 = arith.constant dense<0.000000e+00> : vector<2x512xf32>
    %8 = tpu.matmul %7, %0, %cst_5 {dimension_numbers = #tpu.dot_dimension_numbers<[1], [0], [0], [1], [0, 0, 1, 1], [], []>} : vector<2x128xbf16>, vector<128x512xbf16>, vector<2x512xf32> -> vector<2x512xf32>
    %9 = arith.addf %6, %8 : vector<2x512xf32>
    %10 = vector.extract_strided_slice %9 {offsets = [0, 0], sizes = [2, 128], strides = [1, 1]} : vector<2x512xf32> to vector<2x128xf32>
    %11 = arith.negf %10 : vector<2x128xf32>
    %12 = math.exp %11 : vector<2x128xf32>
    %cst_6 = arith.constant 1.000000e+00 : f32
    %13 = vector.broadcast %cst_6 : f32 to vector<2x128xf32>
    %14 = arith.addf %13, %12 : vector<2x128xf32>
    %15 = arith.divf %13, %14 : vector<2x128xf32>
    %16 = vector.extract_strided_slice %9 {offsets = [0, 128], sizes = [2, 128], strides = [1, 1]} : vector<2x512xf32> to vector<2x128xf32>
    %17 = arith.negf %16 : vector<2x128xf32>
    %18 = math.exp %17 : vector<2x128xf32>
    %cst_7 = arith.constant 1.000000e+00 : f32
    %19 = vector.broadcast %cst_7 : f32 to vector<2x128xf32>
    %20 = arith.addf %19, %18 : vector<2x128xf32>
    %21 = arith.divf %19, %20 : vector<2x128xf32>
    %22 = vector.extract_strided_slice %9 {offsets = [0, 256], sizes = [2, 128], strides = [1, 1]} : vector<2x512xf32> to vector<2x128xf32>
    %23 = math.tanh %22 : vector<2x128xf32>
    %24 = vector.extract_strided_slice %9 {offsets = [0, 384], sizes = [2, 128], strides = [1, 1]} : vector<2x512xf32> to vector<2x128xf32>
    %25 = arith.negf %24 : vector<2x128xf32>
    %26 = math.exp %25 : vector<2x128xf32>
    %cst_8 = arith.constant 1.000000e+00 : f32
    %27 = vector.broadcast %cst_8 : f32 to vector<2x128xf32>
    %28 = arith.addf %27, %26 : vector<2x128xf32>
    %29 = arith.divf %27, %28 : vector<2x128xf32>
    %30 = arith.mulf %21, %2 : vector<2x128xf32>
    %31 = arith.mulf %15, %23 : vector<2x128xf32>
    %32 = arith.addf %30, %31 : vector<2x128xf32>
    %33 = math.tanh %32 : vector<2x128xf32>
    %34 = arith.mulf %29, %33 : vector<2x128xf32>
    %35 = arith.index_cast %c0_i32 : i32 to index
    %c0_9 = arith.constant 0 : index
    %c0_10 = arith.constant 0 : index
    %36 = vector.load %arg4[%35, %c0_9, %c0_10] : memref<8x2x256xf32, #tpu.memory_space<vmem>>, vector<1x2x128xf32>
    %37 = vector.shape_cast %36 : vector<1x2x128xf32> to vector<2x128xf32>
    %38 = vector.shape_cast %34 : vector<2x128xf32> to vector<1x2x128xf32>
    tpu.vector_store %arg4[%35, %c0_9, %c0_10], %38 {strides = array<i32>} : memref<8x2x256xf32, #tpu.memory_space<vmem>>, vector<1x2x128xf32>,
    %c7_i32 = arith.constant 7 : i32
    %39 = arith.subi %c7_i32, %c0_i32 : i32
    %40 = arith.index_cast %39 : i32 to index
    %c0_11 = arith.constant 0 : index
    %c0_12 = arith.constant 0 : index
    %41 = vector.load %arg1[%40, %c0_11, %c0_12] : memref<8x2x1024xf32, #tpu.memory_space<vmem>>, vector<1x2x1024xf32>
    %42 = vector.shape_cast %41 : vector<1x2x1024xf32> to vector<2x1024xf32>
    %43 = vector.extract_strided_slice %42 {offsets = [0, 512], sizes = [2, 512], strides = [1, 1]} : vector<2x1024xf32> to vector<2x512xf32>
    %44 = arith.truncf %2 : vector<2x128xf32> to vector<2x128xbf16>
    %cst_13 = arith.constant dense<0.000000e+00> : vector<2x512xf32>
    %45 = tpu.matmul %44, %1, %cst_13 {dimension_numbers = #tpu.dot_dimension_numbers<[1], [0], [0], [1], [0, 0, 1, 1], [], []>} : vector<2x128xbf16>, vector<128x512xbf16>, vector<2x512xf32> -> vector<2x512xf32>
    %46 = arith.addf %43, %45 : vector<2x512xf32>
    %47 = vector.extract_strided_slice %46 {offsets = [0, 0], sizes = [2, 128], strides = [1, 1]} : vector<2x512xf32> to vector<2x128xf32>
    %48 = arith.negf %47 : vector<2x128xf32>
    %49 = math.exp %48 : vector<2x128xf32>
    %cst_14 = arith.constant 1.000000e+00 : f32
    %50 = vector.broadcast %cst_14 : f32 to vector<2x128xf32>
    %51 = arith.addf %50, %49 : vector<2x128xf32>
    %52 = arith.divf %50, %51 : vector<2x128xf32>
    %53 = vector.extract_strided_slice %46 {offsets = [0, 128], sizes = [2, 128], strides = [1, 1]} : vector<2x512xf32> to vector<2x128xf32>
    %54 = arith.negf %53 : vector<2x128xf32>
    %55 = math.exp %54 : vector<2x128xf32>
    %cst_15 = arith.constant 1.000000e+00 : f32
    %56 = vector.broadcast %cst_15 : f32 to vector<2x128xf32>
    %57 = arith.addf %56, %55 : vector<2x128xf32>
    %58 = arith.divf %56, %57 : vector<2x128xf32>
    %59 = vector.extract_strided_slice %46 {offsets = [0, 256], sizes = [2, 128], strides = [1, 1]} : vector<2x512xf32> to vector<2x128xf32>
    %60 = math.tanh %59 : vector<2x128xf32>
    %61 = vector.extract_strided_slice %46 {offsets = [0, 384], sizes = [2, 128], strides = [1, 1]} : vector<2x512xf32> to vector<2x128xf32>
    %62 = arith.negf %61 : vector<2x128xf32>
    %63 = math.exp %62 : vector<2x128xf32>
    %cst_16 = arith.constant 1.000000e+00 : f32
    %64 = vector.broadcast %cst_16 : f32 to vector<2x128xf32>
    %65 = arith.addf %64, %63 : vector<2x128xf32>
    %66 = arith.divf %64, %65 : vector<2x128xf32>
    %67 = arith.mulf %58, %2 : vector<2x128xf32>
    %68 = arith.mulf %52, %60 : vector<2x128xf32>
    %69 = arith.addf %67, %68 : vector<2x128xf32>
    %70 = math.tanh %69 : vector<2x128xf32>
    %71 = arith.mulf %66, %70 : vector<2x128xf32>
    %72 = arith.index_cast %39 : i32 to index
    %c0_17 = arith.constant 0 : index
    %c128 = arith.constant 128 : index
    %73 = vector.load %arg4[%72, %c0_17, %c128] : memref<8x2x256xf32, #tpu.memory_space<vmem>>, vector<1x2x128xf32>
    %74 = vector.shape_cast %73 : vector<1x2x128xf32> to vector<2x128xf32>
    %75 = vector.shape_cast %71 : vector<2x128xf32> to vector<1x2x128xf32>
    tpu.vector_store %arg4[%72, %c0_17, %c128], %75 {strides = array<i32>} : memref<8x2x256xf32, #tpu.memory_space<vmem>>, vector<1x2x128xf32>,
    %c1_i32 = arith.constant 1 : i32
    %76 = arith.index_cast %c1_i32 : i32 to index
    %c0_18 = arith.constant 0 : index
    %c0_19 = arith.constant 0 : index
    %77 = vector.load %arg1[%76, %c0_18, %c0_19] : memref<8x2x1024xf32, #tpu.memory_space<vmem>>, vector<1x2x1024xf32>
    %78 = vector.shape_cast %77 : vector<1x2x1024xf32> to vector<2x1024xf32>
    %79 = vector.extract_strided_slice %78 {offsets = [0, 0], sizes = [2, 512], strides = [1, 1]} : vector<2x1024xf32> to vector<2x512xf32>
    %80 = arith.truncf %34 : vector<2x128xf32> to vector<2x128xbf16>
    %cst_20 = arith.constant dense<0.000000e+00> : vector<2x512xf32>
    %81 = tpu.matmul %80, %0, %cst_20 {dimension_numbers = #tpu.dot_dimension_numbers<[1], [0], [0], [1], [0, 0, 1, 1], [], []>} : vector<2x128xbf16>, vector<128x512xbf16>, vector<2x512xf32> -> vector<2x512xf32>
    %82 = arith.addf %79, %81 : vector<2x512xf32>
    %83 = vector.extract_strided_slice %82 {offsets = [0, 0], sizes = [2, 128], strides = [1, 1]} : vector<2x512xf32> to vector<2x128xf32>
    %84 = arith.negf %83 : vector<2x128xf32>
    %85 = math.exp %84 : vector<2x128xf32>
    %cst_21 = arith.constant 1.000000e+00 : f32
    %86 = vector.broadcast %cst_21 : f32 to vector<2x128xf32>
    %87 = arith.addf %86, %85 : vector<2x128xf32>
    %88 = arith.divf %86, %87 : vector<2x128xf32>
    %89 = vector.extract_strided_slice %82 {offsets = [0, 128], sizes = [2, 128], strides = [1, 1]} : vector<2x512xf32> to vector<2x128xf32>
    %90 = arith.negf %89 : vector<2x128xf32>
    %91 = math.exp %90 : vector<2x128xf32>
    %cst_22 = arith.constant 1.000000e+00 : f32
    %92 = vector.broadcast %cst_22 : f32 to vector<2x128xf32>
    %93 = arith.addf %92, %91 : vector<2x128xf32>
    %94 = arith.divf %92, %93 : vector<2x128xf32>
    %95 = vector.extract_strided_slice %82 {offsets = [0, 256], sizes = [2, 128], strides = [1, 1]} : vector<2x512xf32> to vector<2x128xf32>
    %96 = math.tanh %95 : vector<2x128xf32>
    %97 = vector.extract_strided_slice %82 {offsets = [0, 384], sizes = [2, 128], strides = [1, 1]} : vector<2x512xf32> to vector<2x128xf32>
    %98 = arith.negf %97 : vector<2x128xf32>
    %99 = math.exp %98 : vector<2x128xf32>
    %cst_23 = arith.constant 1.000000e+00 : f32
    %100 = vector.broadcast %cst_23 : f32 to vector<2x128xf32>
    %101 = arith.addf %100, %99 : vector<2x128xf32>
    %102 = arith.divf %100, %101 : vector<2x128xf32>
    %103 = arith.mulf %94, %32 : vector<2x128xf32>
    %104 = arith.mulf %88, %96 : vector<2x128xf32>
    %105 = arith.addf %103, %104 : vector<2x128xf32>
    %106 = math.tanh %105 : vector<2x128xf32>
    %107 = arith.mulf %102, %106 : vector<2x128xf32>
    %108 = arith.index_cast %c1_i32 : i32 to index
    %c0_24 = arith.constant 0 : index
    %c0_25 = arith.constant 0 : index
    %109 = vector.load %arg4[%108, %c0_24, %c0_25] : memref<8x2x256xf32, #tpu.memory_space<vmem>>, vector<1x2x128xf32>
    %110 = vector.shape_cast %109 : vector<1x2x128xf32> to vector<2x128xf32>
    %111 = vector.shape_cast %107 : vector<2x128xf32> to vector<1x2x128xf32>
    tpu.vector_store %arg4[%108, %c0_24, %c0_25], %111 {strides = array<i32>} : memref<8x2x256xf32, #tpu.memory_space<vmem>>, vector<1x2x128xf32>,
    %c7_i32_26 = arith.constant 7 : i32
    %112 = arith.subi %c7_i32_26, %c1_i32 : i32
    %113 = arith.index_cast %112 : i32 to index
    %c0_27 = arith.constant 0 : index
    %c0_28 = arith.constant 0 : index
    %114 = vector.load %arg1[%113, %c0_27, %c0_28] : memref<8x2x1024xf32, #tpu.memory_space<vmem>>, vector<1x2x1024xf32>
    %115 = vector.shape_cast %114 : vector<1x2x1024xf32> to vector<2x1024xf32>
    %116 = vector.extract_strided_slice %115 {offsets = [0, 512], sizes = [2, 512], strides = [1, 1]} : vector<2x1024xf32> to vector<2x512xf32>
    %117 = arith.truncf %71 : vector<2x128xf32> to vector<2x128xbf16>
    %cst_29 = arith.constant dense<0.000000e+00> : vector<2x512xf32>
    %118 = tpu.matmul %117, %1, %cst_29 {dimension_numbers = #tpu.dot_dimension_numbers<[1], [0], [0], [1], [0, 0, 1, 1], [], []>} : vector<2x128xbf16>, vector<128x512xbf16>, vector<2x512xf32> -> vector<2x512xf32>
    %119 = arith.addf %116, %118 : vector<2x512xf32>
    %120 = vector.extract_strided_slice %119 {offsets = [0, 0], sizes = [2, 128], strides = [1, 1]} : vector<2x512xf32> to vector<2x128xf32>
    %121 = arith.negf %120 : vector<2x128xf32>
    %122 = math.exp %121 : vector<2x128xf32>
    %cst_30 = arith.constant 1.000000e+00 : f32
    %123 = vector.broadcast %cst_30 : f32 to vector<2x128xf32>
    %124 = arith.addf %123, %122 : vector<2x128xf32>
    %125 = arith.divf %123, %124 : vector<2x128xf32>
    %126 = vector.extract_strided_slice %119 {offsets = [0, 128], sizes = [2, 128], strides = [1, 1]} : vector<2x512xf32> to vector<2x128xf32>
    %127 = arith.negf %126 : vector<2x128xf32>
    %128 = math.exp %127 : vector<2x128xf32>
    %cst_31 = arith.constant 1.000000e+00 : f32
    %129 = vector.broadcast %cst_31 : f32 to vector<2x128xf32>
    %130 = arith.addf %129, %128 : vector<2x128xf32>
    %131 = arith.divf %129, %130 : vector<2x128xf32>
    %132 = vector.extract_strided_slice %119 {offsets = [0, 256], sizes = [2, 128], strides = [1, 1]} : vector<2x512xf32> to vector<2x128xf32>
    %133 = math.tanh %132 : vector<2x128xf32>
    %134 = vector.extract_strided_slice %119 {offsets = [0, 384], sizes = [2, 128], strides = [1, 1]} : vector<2x512xf32> to vector<2x128xf32>
    %135 = arith.negf %134 : vector<2x128xf32>
    %136 = math.exp %135 : vector<2x128xf32>
    %cst_32 = arith.constant 1.000000e+00 : f32
    %137 = vector.broadcast %cst_32 : f32 to vector<2x128xf32>
    %138 = arith.addf %137, %136 : vector<2x128xf32>
    %139 = arith.divf %137, %138 : vector<2x128xf32>
    %140 = arith.mulf %131, %69 : vector<2x128xf32>
    %141 = arith.mulf %125, %133 : vector<2x128xf32>
    %142 = arith.addf %140, %141 : vector<2x128xf32>
    %143 = math.tanh %142 : vector<2x128xf32>
    %144 = arith.mulf %139, %143 : vector<2x128xf32>
    %145 = arith.index_cast %112 : i32 to index
    %c0_33 = arith.constant 0 : index
    %c128_34 = arith.constant 128 : index
    %146 = vector.load %arg4[%145, %c0_33, %c128_34] : memref<8x2x256xf32, #tpu.memory_space<vmem>>, vector<1x2x128xf32>
    %147 = vector.shape_cast %146 : vector<1x2x128xf32> to vector<2x128xf32>
    %148 = vector.shape_cast %144 : vector<2x128xf32> to vector<1x2x128xf32>
    tpu.vector_store %arg4[%145, %c0_33, %c128_34], %148 {strides = array<i32>} : memref<8x2x256xf32, #tpu.memory_space<vmem>>, vector<1x2x128xf32>,
    %c2_i32 = arith.constant 2 : i32
    %149 = arith.index_cast %c2_i32 : i32 to index
    %c0_35 = arith.constant 0 : index
    %c0_36 = arith.constant 0 : index
    %150 = vector.load %arg1[%149, %c0_35, %c0_36] : memref<8x2x1024xf32, #tpu.memory_space<vmem>>, vector<1x2x1024xf32>
    %151 = vector.shape_cast %150 : vector<1x2x1024xf32> to vector<2x1024xf32>
    %152 = vector.extract_strided_slice %151 {offsets = [0, 0], sizes = [2, 512], strides = [1, 1]} : vector<2x1024xf32> to vector<2x512xf32>
    %153 = arith.truncf %107 : vector<2x128xf32> to vector<2x128xbf16>
    %cst_37 = arith.constant dense<0.000000e+00> : vector<2x512xf32>
    %154 = tpu.matmul %153, %0, %cst_37 {dimension_numbers = #tpu.dot_dimension_numbers<[1], [0], [0], [1], [0, 0, 1, 1], [], []>} : vector<2x128xbf16>, vector<128x512xbf16>, vector<2x512xf32> -> vector<2x512xf32>
    %155 = arith.addf %152, %154 : vector<2x512xf32>
    %156 = vector.extract_strided_slice %155 {offsets = [0, 0], sizes = [2, 128], strides = [1, 1]} : vector<2x512xf32> to vector<2x128xf32>
    %157 = arith.negf %156 : vector<2x128xf32>
    %158 = math.exp %157 : vector<2x128xf32>
    %cst_38 = arith.constant 1.000000e+00 : f32
    %159 = vector.broadcast %cst_38 : f32 to vector<2x128xf32>
    %160 = arith.addf %159, %158 : vector<2x128xf32>
    %161 = arith.divf %159, %160 : vector<2x128xf32>
    %162 = vector.extract_strided_slice %155 {offsets = [0, 128], sizes = [2, 128], strides = [1, 1]} : vector<2x512xf32> to vector<2x128xf32>
    %163 = arith.negf %162 : vector<2x128xf32>
    %164 = math.exp %163 : vector<2x128xf32>
    %cst_39 = arith.constant 1.000000e+00 : f32
    %165 = vector.broadcast %cst_39 : f32 to vector<2x128xf32>
    %166 = arith.addf %165, %164 : vector<2x128xf32>
    %167 = arith.divf %165, %166 : vector<2x128xf32>
    %168 = vector.extract_strided_slice %155 {offsets = [0, 256], sizes = [2, 128], strides = [1, 1]} : vector<2x512xf32> to vector<2x128xf32>
    %169 = math.tanh %168 : vector<2x128xf32>
    %170 = vector.extract_strided_slice %155 {offsets = [0, 384], sizes = [2, 128], strides = [1, 1]} : vector<2x512xf32> to vector<2x128xf32>
    %171 = arith.negf %170 : vector<2x128xf32>
    %172 = math.exp %171 : vector<2x128xf32>
    %cst_40 = arith.constant 1.000000e+00 : f32
    %173 = vector.broadcast %cst_40 : f32 to vector<2x128xf32>
    %174 = arith.addf %173, %172 : vector<2x128xf32>
    %175 = arith.divf %173, %174 : vector<2x128xf32>
    %176 = arith.mulf %167, %105 : vector<2x128xf32>
    %177 = arith.mulf %161, %169 : vector<2x128xf32>
    %178 = arith.addf %176, %177 : vector<2x128xf32>
    %179 = math.tanh %178 : vector<2x128xf32>
    %180 = arith.mulf %175, %179 : vector<2x128xf32>
    %181 = arith.index_cast %c2_i32 : i32 to index
    %c0_41 = arith.constant 0 : index
    %c0_42 = arith.constant 0 : index
    %182 = vector.load %arg4[%181, %c0_41, %c0_42] : memref<8x2x256xf32, #tpu.memory_space<vmem>>, vector<1x2x128xf32>
    %183 = vector.shape_cast %182 : vector<1x2x128xf32> to vector<2x128xf32>
    %184 = vector.shape_cast %180 : vector<2x128xf32> to vector<1x2x128xf32>
    tpu.vector_store %arg4[%181, %c0_41, %c0_42], %184 {strides = array<i32>} : memref<8x2x256xf32, #tpu.memory_space<vmem>>, vector<1x2x128xf32>,
    %c7_i32_43 = arith.constant 7 : i32
    %185 = arith.subi %c7_i32_43, %c2_i32 : i32
    %186 = arith.index_cast %185 : i32 to index
    %c0_44 = arith.constant 0 : index
    %c0_45 = arith.constant 0 : index
    %187 = vector.load %arg1[%186, %c0_44, %c0_45] : memref<8x2x1024xf32, #tpu.memory_space<vmem>>, vector<1x2x1024xf32>
    %188 = vector.shape_cast %187 : vector<1x2x1024xf32> to vector<2x1024xf32>
    %189 = vector.extract_strided_slice %188 {offsets = [0, 512], sizes = [2, 512], strides = [1, 1]} : vector<2x1024xf32> to vector<2x512xf32>
    %190 = arith.truncf %144 : vector<2x128xf32> to vector<2x128xbf16>
    %cst_46 = arith.constant dense<0.000000e+00> : vector<2x512xf32>
    %191 = tpu.matmul %190, %1, %cst_46 {dimension_numbers = #tpu.dot_dimension_numbers<[1], [0], [0], [1], [0, 0, 1, 1], [], []>} : vector<2x128xbf16>, vector<128x512xbf16>, vector<2x512xf32> -> vector<2x512xf32>
    %192 = arith.addf %189, %191 : vector<2x512xf32>
    %193 = vector.extract_strided_slice %192 {offsets = [0, 0], sizes = [2, 128], strides = [1, 1]} : vector<2x512xf32> to vector<2x128xf32>
    %194 = arith.negf %193 : vector<2x128xf32>
    %195 = math.exp %194 : vector<2x128xf32>
    %cst_47 = arith.constant 1.000000e+00 : f32
    %196 = vector.broadcast %cst_47 : f32 to vector<2x128xf32>
    %197 = arith.addf %196, %195 : vector<2x128xf32>
    %198 = arith.divf %196, %197 : vector<2x128xf32>
    %199 = vector.extract_strided_slice %192 {offsets = [0, 128], sizes = [2, 128], strides = [1, 1]} : vector<2x512xf32> to vector<2x128xf32>
    %200 = arith.negf %199 : vector<2x128xf32>
    %201 = math.exp %200 : vector<2x128xf32>
    %cst_48 = arith.constant 1.000000e+00 : f32
    %202 = vector.broadcast %cst_48 : f32 to vector<2x128xf32>
    %203 = arith.addf %202, %201 : vector<2x128xf32>
    %204 = arith.divf %202, %203 : vector<2x128xf32>
    %205 = vector.extract_strided_slice %192 {offsets = [0, 256], sizes = [2, 128], strides = [1, 1]} : vector<2x512xf32> to vector<2x128xf32>
    %206 = math.tanh %205 : vector<2x128xf32>
    %207 = vector.extract_strided_slice %192 {offsets = [0, 384], sizes = [2, 128], strides = [1, 1]} : vector<2x512xf32> to vector<2x128xf32>
    %208 = arith.negf %207 : vector<2x128xf32>
    %209 = math.exp %208 : vector<2x128xf32>
    %cst_49 = arith.constant 1.000000e+00 : f32
    %210 = vector.broadcast %cst_49 : f32 to vector<2x128xf32>
    %211 = arith.addf %210, %209 : vector<2x128xf32>
    %212 = arith.divf %210, %211 : vector<2x128xf32>
    %213 = arith.mulf %204, %142 : vector<2x128xf32>
    %214 = arith.mulf %198, %206 : vector<2x128xf32>
    %215 = arith.addf %213, %214 : vector<2x128xf32>
    %216 = math.tanh %215 : vector<2x128xf32>
    %217 = arith.mulf %212, %216 : vector<2x128xf32>
    %218 = arith.index_cast %185 : i32 to index
    %c0_50 = arith.constant 0 : index
    %c128_51 = arith.constant 128 : index
    %219 = vector.load %arg4[%218, %c0_50, %c128_51] : memref<8x2x256xf32, #tpu.memory_space<vmem>>, vector<1x2x128xf32>
    %220 = vector.shape_cast %219 : vector<1x2x128xf32> to vector<2x128xf32>
    %221 = vector.shape_cast %217 : vector<2x128xf32> to vector<1x2x128xf32>
    tpu.vector_store %arg4[%218, %c0_50, %c128_51], %221 {strides = array<i32>} : memref<8x2x256xf32, #tpu.memory_space<vmem>>, vector<1x2x128xf32>,
    %c3_i32 = arith.constant 3 : i32
    %222 = arith.index_cast %c3_i32 : i32 to index
    %c0_52 = arith.constant 0 : index
    %c0_53 = arith.constant 0 : index
    %223 = vector.load %arg1[%222, %c0_52, %c0_53] : memref<8x2x1024xf32, #tpu.memory_space<vmem>>, vector<1x2x1024xf32>
    %224 = vector.shape_cast %223 : vector<1x2x1024xf32> to vector<2x1024xf32>
    %225 = vector.extract_strided_slice %224 {offsets = [0, 0], sizes = [2, 512], strides = [1, 1]} : vector<2x1024xf32> to vector<2x512xf32>
    %226 = arith.truncf %180 : vector<2x128xf32> to vector<2x128xbf16>
    %cst_54 = arith.constant dense<0.000000e+00> : vector<2x512xf32>
    %227 = tpu.matmul %226, %0, %cst_54 {dimension_numbers = #tpu.dot_dimension_numbers<[1], [0], [0], [1], [0, 0, 1, 1], [], []>} : vector<2x128xbf16>, vector<128x512xbf16>, vector<2x512xf32> -> vector<2x512xf32>
    %228 = arith.addf %225, %227 : vector<2x512xf32>
    %229 = vector.extract_strided_slice %228 {offsets = [0, 0], sizes = [2, 128], strides = [1, 1]} : vector<2x512xf32> to vector<2x128xf32>
    %230 = arith.negf %229 : vector<2x128xf32>
    %231 = math.exp %230 : vector<2x128xf32>
    %cst_55 = arith.constant 1.000000e+00 : f32
    %232 = vector.broadcast %cst_55 : f32 to vector<2x128xf32>
    %233 = arith.addf %232, %231 : vector<2x128xf32>
    %234 = arith.divf %232, %233 : vector<2x128xf32>
    %235 = vector.extract_strided_slice %228 {offsets = [0, 128], sizes = [2, 128], strides = [1, 1]} : vector<2x512xf32> to vector<2x128xf32>
    %236 = arith.negf %235 : vector<2x128xf32>
    %237 = math.exp %236 : vector<2x128xf32>
    %cst_56 = arith.constant 1.000000e+00 : f32
    %238 = vector.broadcast %cst_56 : f32 to vector<2x128xf32>
    %239 = arith.addf %238, %237 : vector<2x128xf32>
    %240 = arith.divf %238, %239 : vector<2x128xf32>
    %241 = vector.extract_strided_slice %228 {offsets = [0, 256], sizes = [2, 128], strides = [1, 1]} : vector<2x512xf32> to vector<2x128xf32>
    %242 = math.tanh %241 : vector<2x128xf32>
    %243 = vector.extract_strided_slice %228 {offsets = [0, 384], sizes = [2, 128], strides = [1, 1]} : vector<2x512xf32> to vector<2x128xf32>
    %244 = arith.negf %243 : vector<2x128xf32>
    %245 = math.exp %244 : vector<2x128xf32>
    %cst_57 = arith.constant 1.000000e+00 : f32
    %246 = vector.broadcast %cst_57 : f32 to vector<2x128xf32>
    %247 = arith.addf %246, %245 : vector<2x128xf32>
    %248 = arith.divf %246, %247 : vector<2x128xf32>
    %249 = arith.mulf %240, %178 : vector<2x128xf32>
    %250 = arith.mulf %234, %242 : vector<2x128xf32>
    %251 = arith.addf %249, %250 : vector<2x128xf32>
    %252 = math.tanh %251 : vector<2x128xf32>
    %253 = arith.mulf %248, %252 : vector<2x128xf32>
    %254 = arith.index_cast %c3_i32 : i32 to index
    %c0_58 = arith.constant 0 : index
    %c0_59 = arith.constant 0 : index
    %255 = vector.load %arg4[%254, %c0_58, %c0_59] : memref<8x2x256xf32, #tpu.memory_space<vmem>>, vector<1x2x128xf32>
    %256 = vector.shape_cast %255 : vector<1x2x128xf32> to vector<2x128xf32>
    %257 = vector.shape_cast %253 : vector<2x128xf32> to vector<1x2x128xf32>
    tpu.vector_store %arg4[%254, %c0_58, %c0_59], %257 {strides = array<i32>} : memref<8x2x256xf32, #tpu.memory_space<vmem>>, vector<1x2x128xf32>,
    %c7_i32_60 = arith.constant 7 : i32
    %258 = arith.subi %c7_i32_60, %c3_i32 : i32
    %259 = arith.index_cast %258 : i32 to index
    %c0_61 = arith.constant 0 : index
    %c0_62 = arith.constant 0 : index
    %260 = vector.load %arg1[%259, %c0_61, %c0_62] : memref<8x2x1024xf32, #tpu.memory_space<vmem>>, vector<1x2x1024xf32>
    %261 = vector.shape_cast %260 : vector<1x2x1024xf32> to vector<2x1024xf32>
    %262 = vector.extract_strided_slice %261 {offsets = [0, 512], sizes = [2, 512], strides = [1, 1]} : vector<2x1024xf32> to vector<2x512xf32>
    %263 = arith.truncf %217 : vector<2x128xf32> to vector<2x128xbf16>
    %cst_63 = arith.constant dense<0.000000e+00> : vector<2x512xf32>
    %264 = tpu.matmul %263, %1, %cst_63 {dimension_numbers = #tpu.dot_dimension_numbers<[1], [0], [0], [1], [0, 0, 1, 1], [], []>} : vector<2x128xbf16>, vector<128x512xbf16>, vector<2x512xf32> -> vector<2x512xf32>
    %265 = arith.addf %262, %264 : vector<2x512xf32>
    %266 = vector.extract_strided_slice %265 {offsets = [0, 0], sizes = [2, 128], strides = [1, 1]} : vector<2x512xf32> to vector<2x128xf32>
    %267 = arith.negf %266 : vector<2x128xf32>
    %268 = math.exp %267 : vector<2x128xf32>
    %cst_64 = arith.constant 1.000000e+00 : f32
    %269 = vector.broadcast %cst_64 : f32 to vector<2x128xf32>
    %270 = arith.addf %269, %268 : vector<2x128xf32>
    %271 = arith.divf %269, %270 : vector<2x128xf32>
    %272 = vector.extract_strided_slice %265 {offsets = [0, 128], sizes = [2, 128], strides = [1, 1]} : vector<2x512xf32> to vector<2x128xf32>
    %273 = arith.negf %272 : vector<2x128xf32>
    %274 = math.exp %273 : vector<2x128xf32>
    %cst_65 = arith.constant 1.000000e+00 : f32
    %275 = vector.broadcast %cst_65 : f32 to vector<2x128xf32>
    %276 = arith.addf %275, %274 : vector<2x128xf32>
    %277 = arith.divf %275, %276 : vector<2x128xf32>
    %278 = vector.extract_strided_slice %265 {offsets = [0, 256], sizes = [2, 128], strides = [1, 1]} : vector<2x512xf32> to vector<2x128xf32>
    %279 = math.tanh %278 : vector<2x128xf32>
    %280 = vector.extract_strided_slice %265 {offsets = [0, 384], sizes = [2, 128], strides = [1, 1]} : vector<2x512xf32> to vector<2x128xf32>
    %281 = arith.negf %280 : vector<2x128xf32>
    %282 = math.exp %281 : vector<2x128xf32>
    %cst_66 = arith.constant 1.000000e+00 : f32
    %283 = vector.broadcast %cst_66 : f32 to vector<2x128xf32>
    %284 = arith.addf %283, %282 : vector<2x128xf32>
    %285 = arith.divf %283, %284 : vector<2x128xf32>
    %286 = arith.mulf %277, %215 : vector<2x128xf32>
    %287 = arith.mulf %271, %279 : vector<2x128xf32>
    %288 = arith.addf %286, %287 : vector<2x128xf32>
    %289 = math.tanh %288 : vector<2x128xf32>
    %290 = arith.mulf %285, %289 : vector<2x128xf32>
    %291 = arith.index_cast %258 : i32 to index
    %c0_67 = arith.constant 0 : index
    %c128_68 = arith.constant 128 : index
    %292 = vector.load %arg4[%291, %c0_67, %c128_68] : memref<8x2x256xf32, #tpu.memory_space<vmem>>, vector<1x2x128xf32>
    %293 = vector.shape_cast %292 : vector<1x2x128xf32> to vector<2x128xf32>
    %294 = vector.shape_cast %290 : vector<2x128xf32> to vector<1x2x128xf32>
    tpu.vector_store %arg4[%291, %c0_67, %c128_68], %294 {strides = array<i32>} : memref<8x2x256xf32, #tpu.memory_space<vmem>>, vector<1x2x128xf32>,
    %c4_i32 = arith.constant 4 : i32
    %295 = arith.index_cast %c4_i32 : i32 to index
    %c0_69 = arith.constant 0 : index
    %c0_70 = arith.constant 0 : index
    %296 = vector.load %arg1[%295, %c0_69, %c0_70] : memref<8x2x1024xf32, #tpu.memory_space<vmem>>, vector<1x2x1024xf32>
    %297 = vector.shape_cast %296 : vector<1x2x1024xf32> to vector<2x1024xf32>
    %298 = vector.extract_strided_slice %297 {offsets = [0, 0], sizes = [2, 512], strides = [1, 1]} : vector<2x1024xf32> to vector<2x512xf32>
    %299 = arith.truncf %253 : vector<2x128xf32> to vector<2x128xbf16>
    %cst_71 = arith.constant dense<0.000000e+00> : vector<2x512xf32>
    %300 = tpu.matmul %299, %0, %cst_71 {dimension_numbers = #tpu.dot_dimension_numbers<[1], [0], [0], [1], [0, 0, 1, 1], [], []>} : vector<2x128xbf16>, vector<128x512xbf16>, vector<2x512xf32> -> vector<2x512xf32>
    %301 = arith.addf %298, %300 : vector<2x512xf32>
    %302 = vector.extract_strided_slice %301 {offsets = [0, 0], sizes = [2, 128], strides = [1, 1]} : vector<2x512xf32> to vector<2x128xf32>
    %303 = arith.negf %302 : vector<2x128xf32>
    %304 = math.exp %303 : vector<2x128xf32>
    %cst_72 = arith.constant 1.000000e+00 : f32
    %305 = vector.broadcast %cst_72 : f32 to vector<2x128xf32>
    %306 = arith.addf %305, %304 : vector<2x128xf32>
    %307 = arith.divf %305, %306 : vector<2x128xf32>
    %308 = vector.extract_strided_slice %301 {offsets = [0, 128], sizes = [2, 128], strides = [1, 1]} : vector<2x512xf32> to vector<2x128xf32>
    %309 = arith.negf %308 : vector<2x128xf32>
    %310 = math.exp %309 : vector<2x128xf32>
    %cst_73 = arith.constant 1.000000e+00 : f32
    %311 = vector.broadcast %cst_73 : f32 to vector<2x128xf32>
    %312 = arith.addf %311, %310 : vector<2x128xf32>
    %313 = arith.divf %311, %312 : vector<2x128xf32>
    %314 = vector.extract_strided_slice %301 {offsets = [0, 256], sizes = [2, 128], strides = [1, 1]} : vector<2x512xf32> to vector<2x128xf32>
    %315 = math.tanh %314 : vector<2x128xf32>
    %316 = vector.extract_strided_slice %301 {offsets = [0, 384], sizes = [2, 128], strides = [1, 1]} : vector<2x512xf32> to vector<2x128xf32>
    %317 = arith.negf %316 : vector<2x128xf32>
    %318 = math.exp %317 : vector<2x128xf32>
    %cst_74 = arith.constant 1.000000e+00 : f32
    %319 = vector.broadcast %cst_74 : f32 to vector<2x128xf32>
    %320 = arith.addf %319, %318 : vector<2x128xf32>
    %321 = arith.divf %319, %320 : vector<2x128xf32>
    %322 = arith.mulf %313, %251 : vector<2x128xf32>
    %323 = arith.mulf %307, %315 : vector<2x128xf32>
    %324 = arith.addf %322, %323 : vector<2x128xf32>
    %325 = math.tanh %324 : vector<2x128xf32>
    %326 = arith.mulf %321, %325 : vector<2x128xf32>
    %327 = arith.index_cast %c4_i32 : i32 to index
    %c0_75 = arith.constant 0 : index
    %c0_76 = arith.constant 0 : index
    %328 = vector.load %arg4[%327, %c0_75, %c0_76] : memref<8x2x256xf32, #tpu.memory_space<vmem>>, vector<1x2x128xf32>
    %329 = vector.shape_cast %328 : vector<1x2x128xf32> to vector<2x128xf32>
    %330 = vector.shape_cast %326 : vector<2x128xf32> to vector<1x2x128xf32>
    tpu.vector_store %arg4[%327, %c0_75, %c0_76], %330 {strides = array<i32>} : memref<8x2x256xf32, #tpu.memory_space<vmem>>, vector<1x2x128xf32>,
    %c7_i32_77 = arith.constant 7 : i32
    %331 = arith.subi %c7_i32_77, %c4_i32 : i32
    %332 = arith.index_cast %331 : i32 to index
    %c0_78 = arith.constant 0 : index
    %c0_79 = arith.constant 0 : index
    %333 = vector.load %arg1[%332, %c0_78, %c0_79] : memref<8x2x1024xf32, #tpu.memory_space<vmem>>, vector<1x2x1024xf32>
    %334 = vector.shape_cast %333 : vector<1x2x1024xf32> to vector<2x1024xf32>
    %335 = vector.extract_strided_slice %334 {offsets = [0, 512], sizes = [2, 512], strides = [1, 1]} : vector<2x1024xf32> to vector<2x512xf32>
    %336 = arith.truncf %290 : vector<2x128xf32> to vector<2x128xbf16>
    %cst_80 = arith.constant dense<0.000000e+00> : vector<2x512xf32>
    %337 = tpu.matmul %336, %1, %cst_80 {dimension_numbers = #tpu.dot_dimension_numbers<[1], [0], [0], [1], [0, 0, 1, 1], [], []>} : vector<2x128xbf16>, vector<128x512xbf16>, vector<2x512xf32> -> vector<2x512xf32>
    %338 = arith.addf %335, %337 : vector<2x512xf32>
    %339 = vector.extract_strided_slice %338 {offsets = [0, 0], sizes = [2, 128], strides = [1, 1]} : vector<2x512xf32> to vector<2x128xf32>
    %340 = arith.negf %339 : vector<2x128xf32>
    %341 = math.exp %340 : vector<2x128xf32>
    %cst_81 = arith.constant 1.000000e+00 : f32
    %342 = vector.broadcast %cst_81 : f32 to vector<2x128xf32>
    %343 = arith.addf %342, %341 : vector<2x128xf32>
    %344 = arith.divf %342, %343 : vector<2x128xf32>
    %345 = vector.extract_strided_slice %338 {offsets = [0, 128], sizes = [2, 128], strides = [1, 1]} : vector<2x512xf32> to vector<2x128xf32>
    %346 = arith.negf %345 : vector<2x128xf32>
    %347 = math.exp %346 : vector<2x128xf32>
    %cst_82 = arith.constant 1.000000e+00 : f32
    %348 = vector.broadcast %cst_82 : f32 to vector<2x128xf32>
    %349 = arith.addf %348, %347 : vector<2x128xf32>
    %350 = arith.divf %348, %349 : vector<2x128xf32>
    %351 = vector.extract_strided_slice %338 {offsets = [0, 256], sizes = [2, 128], strides = [1, 1]} : vector<2x512xf32> to vector<2x128xf32>
    %352 = math.tanh %351 : vector<2x128xf32>
    %353 = vector.extract_strided_slice %338 {offsets = [0, 384], sizes = [2, 128], strides = [1, 1]} : vector<2x512xf32> to vector<2x128xf32>
    %354 = arith.negf %353 : vector<2x128xf32>
    %355 = math.exp %354 : vector<2x128xf32>
    %cst_83 = arith.constant 1.000000e+00 : f32
    %356 = vector.broadcast %cst_83 : f32 to vector<2x128xf32>
    %357 = arith.addf %356, %355 : vector<2x128xf32>
    %358 = arith.divf %356, %357 : vector<2x128xf32>
    %359 = arith.mulf %350, %288 : vector<2x128xf32>
    %360 = arith.mulf %344, %352 : vector<2x128xf32>
    %361 = arith.addf %359, %360 : vector<2x128xf32>
    %362 = math.tanh %361 : vector<2x128xf32>
    %363 = arith.mulf %358, %362 : vector<2x128xf32>
    %364 = arith.index_cast %331 : i32 to index
    %c0_84 = arith.constant 0 : index
    %c128_85 = arith.constant 128 : index
    %365 = vector.load %arg4[%364, %c0_84, %c128_85] : memref<8x2x256xf32, #tpu.memory_space<vmem>>, vector<1x2x128xf32>
    %366 = vector.shape_cast %365 : vector<1x2x128xf32> to vector<2x128xf32>
    %367 = vector.shape_cast %363 : vector<2x128xf32> to vector<1x2x128xf32>
    tpu.vector_store %arg4[%364, %c0_84, %c128_85], %367 {strides = array<i32>} : memref<8x2x256xf32, #tpu.memory_space<vmem>>, vector<1x2x128xf32>,
    %c5_i32 = arith.constant 5 : i32
    %368 = arith.index_cast %c5_i32 : i32 to index
    %c0_86 = arith.constant 0 : index
    %c0_87 = arith.constant 0 : index
    %369 = vector.load %arg1[%368, %c0_86, %c0_87] : memref<8x2x1024xf32, #tpu.memory_space<vmem>>, vector<1x2x1024xf32>
    %370 = vector.shape_cast %369 : vector<1x2x1024xf32> to vector<2x1024xf32>
    %371 = vector.extract_strided_slice %370 {offsets = [0, 0], sizes = [2, 512], strides = [1, 1]} : vector<2x1024xf32> to vector<2x512xf32>
    %372 = arith.truncf %326 : vector<2x128xf32> to vector<2x128xbf16>
    %cst_88 = arith.constant dense<0.000000e+00> : vector<2x512xf32>
    %373 = tpu.matmul %372, %0, %cst_88 {dimension_numbers = #tpu.dot_dimension_numbers<[1], [0], [0], [1], [0, 0, 1, 1], [], []>} : vector<2x128xbf16>, vector<128x512xbf16>, vector<2x512xf32> -> vector<2x512xf32>
    %374 = arith.addf %371, %373 : vector<2x512xf32>
    %375 = vector.extract_strided_slice %374 {offsets = [0, 0], sizes = [2, 128], strides = [1, 1]} : vector<2x512xf32> to vector<2x128xf32>
    %376 = arith.negf %375 : vector<2x128xf32>
    %377 = math.exp %376 : vector<2x128xf32>
    %cst_89 = arith.constant 1.000000e+00 : f32
    %378 = vector.broadcast %cst_89 : f32 to vector<2x128xf32>
    %379 = arith.addf %378, %377 : vector<2x128xf32>
    %380 = arith.divf %378, %379 : vector<2x128xf32>
    %381 = vector.extract_strided_slice %374 {offsets = [0, 128], sizes = [2, 128], strides = [1, 1]} : vector<2x512xf32> to vector<2x128xf32>
    %382 = arith.negf %381 : vector<2x128xf32>
    %383 = math.exp %382 : vector<2x128xf32>
    %cst_90 = arith.constant 1.000000e+00 : f32
    %384 = vector.broadcast %cst_90 : f32 to vector<2x128xf32>
    %385 = arith.addf %384, %383 : vector<2x128xf32>
    %386 = arith.divf %384, %385 : vector<2x128xf32>
    %387 = vector.extract_strided_slice %374 {offsets = [0, 256], sizes = [2, 128], strides = [1, 1]} : vector<2x512xf32> to vector<2x128xf32>
    %388 = math.tanh %387 : vector<2x128xf32>
    %389 = vector.extract_strided_slice %374 {offsets = [0, 384], sizes = [2, 128], strides = [1, 1]} : vector<2x512xf32> to vector<2x128xf32>
    %390 = arith.negf %389 : vector<2x128xf32>
    %391 = math.exp %390 : vector<2x128xf32>
    %cst_91 = arith.constant 1.000000e+00 : f32
    %392 = vector.broadcast %cst_91 : f32 to vector<2x128xf32>
    %393 = arith.addf %392, %391 : vector<2x128xf32>
    %394 = arith.divf %392, %393 : vector<2x128xf32>
    %395 = arith.mulf %386, %324 : vector<2x128xf32>
    %396 = arith.mulf %380, %388 : vector<2x128xf32>
    %397 = arith.addf %395, %396 : vector<2x128xf32>
    %398 = math.tanh %397 : vector<2x128xf32>
    %399 = arith.mulf %394, %398 : vector<2x128xf32>
    %400 = arith.index_cast %c5_i32 : i32 to index
    %c0_92 = arith.constant 0 : index
    %c0_93 = arith.constant 0 : index
    %401 = vector.load %arg4[%400, %c0_92, %c0_93] : memref<8x2x256xf32, #tpu.memory_space<vmem>>, vector<1x2x128xf32>
    %402 = vector.shape_cast %401 : vector<1x2x128xf32> to vector<2x128xf32>
    %403 = vector.shape_cast %399 : vector<2x128xf32> to vector<1x2x128xf32>
    tpu.vector_store %arg4[%400, %c0_92, %c0_93], %403 {strides = array<i32>} : memref<8x2x256xf32, #tpu.memory_space<vmem>>, vector<1x2x128xf32>,
    %c7_i32_94 = arith.constant 7 : i32
    %404 = arith.subi %c7_i32_94, %c5_i32 : i32
    %405 = arith.index_cast %404 : i32 to index
    %c0_95 = arith.constant 0 : index
    %c0_96 = arith.constant 0 : index
    %406 = vector.load %arg1[%405, %c0_95, %c0_96] : memref<8x2x1024xf32, #tpu.memory_space<vmem>>, vector<1x2x1024xf32>
    %407 = vector.shape_cast %406 : vector<1x2x1024xf32> to vector<2x1024xf32>
    %408 = vector.extract_strided_slice %407 {offsets = [0, 512], sizes = [2, 512], strides = [1, 1]} : vector<2x1024xf32> to vector<2x512xf32>
    %409 = arith.truncf %363 : vector<2x128xf32> to vector<2x128xbf16>
    %cst_97 = arith.constant dense<0.000000e+00> : vector<2x512xf32>
    %410 = tpu.matmul %409, %1, %cst_97 {dimension_numbers = #tpu.dot_dimension_numbers<[1], [0], [0], [1], [0, 0, 1, 1], [], []>} : vector<2x128xbf16>, vector<128x512xbf16>, vector<2x512xf32> -> vector<2x512xf32>
    %411 = arith.addf %408, %410 : vector<2x512xf32>
    %412 = vector.extract_strided_slice %411 {offsets = [0, 0], sizes = [2, 128], strides = [1, 1]} : vector<2x512xf32> to vector<2x128xf32>
    %413 = arith.negf %412 : vector<2x128xf32>
    %414 = math.exp %413 : vector<2x128xf32>
    %cst_98 = arith.constant 1.000000e+00 : f32
    %415 = vector.broadcast %cst_98 : f32 to vector<2x128xf32>
    %416 = arith.addf %415, %414 : vector<2x128xf32>
    %417 = arith.divf %415, %416 : vector<2x128xf32>
    %418 = vector.extract_strided_slice %411 {offsets = [0, 128], sizes = [2, 128], strides = [1, 1]} : vector<2x512xf32> to vector<2x128xf32>
    %419 = arith.negf %418 : vector<2x128xf32>
    %420 = math.exp %419 : vector<2x128xf32>
    %cst_99 = arith.constant 1.000000e+00 : f32
    %421 = vector.broadcast %cst_99 : f32 to vector<2x128xf32>
    %422 = arith.addf %421, %420 : vector<2x128xf32>
    %423 = arith.divf %421, %422 : vector<2x128xf32>
    %424 = vector.extract_strided_slice %411 {offsets = [0, 256], sizes = [2, 128], strides = [1, 1]} : vector<2x512xf32> to vector<2x128xf32>
    %425 = math.tanh %424 : vector<2x128xf32>
    %426 = vector.extract_strided_slice %411 {offsets = [0, 384], sizes = [2, 128], strides = [1, 1]} : vector<2x512xf32> to vector<2x128xf32>
    %427 = arith.negf %426 : vector<2x128xf32>
    %428 = math.exp %427 : vector<2x128xf32>
    %cst_100 = arith.constant 1.000000e+00 : f32
    %429 = vector.broadcast %cst_100 : f32 to vector<2x128xf32>
    %430 = arith.addf %429, %428 : vector<2x128xf32>
    %431 = arith.divf %429, %430 : vector<2x128xf32>
    %432 = arith.mulf %423, %361 : vector<2x128xf32>
    %433 = arith.mulf %417, %425 : vector<2x128xf32>
    %434 = arith.addf %432, %433 : vector<2x128xf32>
    %435 = math.tanh %434 : vector<2x128xf32>
    %436 = arith.mulf %431, %435 : vector<2x128xf32>
    %437 = arith.index_cast %404 : i32 to index
    %c0_101 = arith.constant 0 : index
    %c128_102 = arith.constant 128 : index
    %438 = vector.load %arg4[%437, %c0_101, %c128_102] : memref<8x2x256xf32, #tpu.memory_space<vmem>>, vector<1x2x128xf32>
    %439 = vector.shape_cast %438 : vector<1x2x128xf32> to vector<2x128xf32>
    %440 = vector.shape_cast %436 : vector<2x128xf32> to vector<1x2x128xf32>
    tpu.vector_store %arg4[%437, %c0_101, %c128_102], %440 {strides = array<i32>} : memref<8x2x256xf32, #tpu.memory_space<vmem>>, vector<1x2x128xf32>,
    %c6_i32 = arith.constant 6 : i32
    %441 = arith.index_cast %c6_i32 : i32 to index
    %c0_103 = arith.constant 0 : index
    %c0_104 = arith.constant 0 : index
    %442 = vector.load %arg1[%441, %c0_103, %c0_104] : memref<8x2x1024xf32, #tpu.memory_space<vmem>>, vector<1x2x1024xf32>
    %443 = vector.shape_cast %442 : vector<1x2x1024xf32> to vector<2x1024xf32>
    %444 = vector.extract_strided_slice %443 {offsets = [0, 0], sizes = [2, 512], strides = [1, 1]} : vector<2x1024xf32> to vector<2x512xf32>
    %445 = arith.truncf %399 : vector<2x128xf32> to vector<2x128xbf16>
    %cst_105 = arith.constant dense<0.000000e+00> : vector<2x512xf32>
    %446 = tpu.matmul %445, %0, %cst_105 {dimension_numbers = #tpu.dot_dimension_numbers<[1], [0], [0], [1], [0, 0, 1, 1], [], []>} : vector<2x128xbf16>, vector<128x512xbf16>, vector<2x512xf32> -> vector<2x512xf32>
    %447 = arith.addf %444, %446 : vector<2x512xf32>
    %448 = vector.extract_strided_slice %447 {offsets = [0, 0], sizes = [2, 128], strides = [1, 1]} : vector<2x512xf32> to vector<2x128xf32>
    %449 = arith.negf %448 : vector<2x128xf32>
    %450 = math.exp %449 : vector<2x128xf32>
    %cst_106 = arith.constant 1.000000e+00 : f32
    %451 = vector.broadcast %cst_106 : f32 to vector<2x128xf32>
    %452 = arith.addf %451, %450 : vector<2x128xf32>
    %453 = arith.divf %451, %452 : vector<2x128xf32>
    %454 = vector.extract_strided_slice %447 {offsets = [0, 128], sizes = [2, 128], strides = [1, 1]} : vector<2x512xf32> to vector<2x128xf32>
    %455 = arith.negf %454 : vector<2x128xf32>
    %456 = math.exp %455 : vector<2x128xf32>
    %cst_107 = arith.constant 1.000000e+00 : f32
    %457 = vector.broadcast %cst_107 : f32 to vector<2x128xf32>
    %458 = arith.addf %457, %456 : vector<2x128xf32>
    %459 = arith.divf %457, %458 : vector<2x128xf32>
    %460 = vector.extract_strided_slice %447 {offsets = [0, 256], sizes = [2, 128], strides = [1, 1]} : vector<2x512xf32> to vector<2x128xf32>
    %461 = math.tanh %460 : vector<2x128xf32>
    %462 = vector.extract_strided_slice %447 {offsets = [0, 384], sizes = [2, 128], strides = [1, 1]} : vector<2x512xf32> to vector<2x128xf32>
    %463 = arith.negf %462 : vector<2x128xf32>
    %464 = math.exp %463 : vector<2x128xf32>
    %cst_108 = arith.constant 1.000000e+00 : f32
    %465 = vector.broadcast %cst_108 : f32 to vector<2x128xf32>
    %466 = arith.addf %465, %464 : vector<2x128xf32>
    %467 = arith.divf %465, %466 : vector<2x128xf32>
    %468 = arith.mulf %459, %397 : vector<2x128xf32>
    %469 = arith.mulf %453, %461 : vector<2x128xf32>
    %470 = arith.addf %468, %469 : vector<2x128xf32>
    %471 = math.tanh %470 : vector<2x128xf32>
    %472 = arith.mulf %467, %471 : vector<2x128xf32>
    %473 = arith.index_cast %c6_i32 : i32 to index
    %c0_109 = arith.constant 0 : index
    %c0_110 = arith.constant 0 : index
    %474 = vector.load %arg4[%473, %c0_109, %c0_110] : memref<8x2x256xf32, #tpu.memory_space<vmem>>, vector<1x2x128xf32>
    %475 = vector.shape_cast %474 : vector<1x2x128xf32> to vector<2x128xf32>
    %476 = vector.shape_cast %472 : vector<2x128xf32> to vector<1x2x128xf32>
    tpu.vector_store %arg4[%473, %c0_109, %c0_110], %476 {strides = array<i32>} : memref<8x2x256xf32, #tpu.memory_space<vmem>>, vector<1x2x128xf32>,
    %c7_i32_111 = arith.constant 7 : i32
    %477 = arith.subi %c7_i32_111, %c6_i32 : i32
    %478 = arith.index_cast %477 : i32 to index
    %c0_112 = arith.constant 0 : index
    %c0_113 = arith.constant 0 : index
    %479 = vector.load %arg1[%478, %c0_112, %c0_113] : memref<8x2x1024xf32, #tpu.memory_space<vmem>>, vector<1x2x1024xf32>
    %480 = vector.shape_cast %479 : vector<1x2x1024xf32> to vector<2x1024xf32>
    %481 = vector.extract_strided_slice %480 {offsets = [0, 512], sizes = [2, 512], strides = [1, 1]} : vector<2x1024xf32> to vector<2x512xf32>
    %482 = arith.truncf %436 : vector<2x128xf32> to vector<2x128xbf16>
    %cst_114 = arith.constant dense<0.000000e+00> : vector<2x512xf32>
    %483 = tpu.matmul %482, %1, %cst_114 {dimension_numbers = #tpu.dot_dimension_numbers<[1], [0], [0], [1], [0, 0, 1, 1], [], []>} : vector<2x128xbf16>, vector<128x512xbf16>, vector<2x512xf32> -> vector<2x512xf32>
    %484 = arith.addf %481, %483 : vector<2x512xf32>
    %485 = vector.extract_strided_slice %484 {offsets = [0, 0], sizes = [2, 128], strides = [1, 1]} : vector<2x512xf32> to vector<2x128xf32>
    %486 = arith.negf %485 : vector<2x128xf32>
    %487 = math.exp %486 : vector<2x128xf32>
    %cst_115 = arith.constant 1.000000e+00 : f32
    %488 = vector.broadcast %cst_115 : f32 to vector<2x128xf32>
    %489 = arith.addf %488, %487 : vector<2x128xf32>
    %490 = arith.divf %488, %489 : vector<2x128xf32>
    %491 = vector.extract_strided_slice %484 {offsets = [0, 128], sizes = [2, 128], strides = [1, 1]} : vector<2x512xf32> to vector<2x128xf32>
    %492 = arith.negf %491 : vector<2x128xf32>
    %493 = math.exp %492 : vector<2x128xf32>
    %cst_116 = arith.constant 1.000000e+00 : f32
    %494 = vector.broadcast %cst_116 : f32 to vector<2x128xf32>
    %495 = arith.addf %494, %493 : vector<2x128xf32>
    %496 = arith.divf %494, %495 : vector<2x128xf32>
    %497 = vector.extract_strided_slice %484 {offsets = [0, 256], sizes = [2, 128], strides = [1, 1]} : vector<2x512xf32> to vector<2x128xf32>
    %498 = math.tanh %497 : vector<2x128xf32>
    %499 = vector.extract_strided_slice %484 {offsets = [0, 384], sizes = [2, 128], strides = [1, 1]} : vector<2x512xf32> to vector<2x128xf32>
    %500 = arith.negf %499 : vector<2x128xf32>
    %501 = math.exp %500 : vector<2x128xf32>
    %cst_117 = arith.constant 1.000000e+00 : f32
    %502 = vector.broadcast %cst_117 : f32 to vector<2x128xf32>
    %503 = arith.addf %502, %501 : vector<2x128xf32>
    %504 = arith.divf %502, %503 : vector<2x128xf32>
    %505 = arith.mulf %496, %434 : vector<2x128xf32>
    %506 = arith.mulf %490, %498 : vector<2x128xf32>
    %507 = arith.addf %505, %506 : vector<2x128xf32>
    %508 = math.tanh %507 : vector<2x128xf32>
    %509 = arith.mulf %504, %508 : vector<2x128xf32>
    %510 = arith.index_cast %477 : i32 to index
    %c0_118 = arith.constant 0 : index
    %c128_119 = arith.constant 128 : index
    %511 = vector.load %arg4[%510, %c0_118, %c128_119] : memref<8x2x256xf32, #tpu.memory_space<vmem>>, vector<1x2x128xf32>
    %512 = vector.shape_cast %511 : vector<1x2x128xf32> to vector<2x128xf32>
    %513 = vector.shape_cast %509 : vector<2x128xf32> to vector<1x2x128xf32>
    tpu.vector_store %arg4[%510, %c0_118, %c128_119], %513 {strides = array<i32>} : memref<8x2x256xf32, #tpu.memory_space<vmem>>, vector<1x2x128xf32>,
    %c7_i32_120 = arith.constant 7 : i32
    %514 = arith.index_cast %c7_i32_120 : i32 to index
    %c0_121 = arith.constant 0 : index
    %c0_122 = arith.constant 0 : index
    %515 = vector.load %arg1[%514, %c0_121, %c0_122] : memref<8x2x1024xf32, #tpu.memory_space<vmem>>, vector<1x2x1024xf32>
    %516 = vector.shape_cast %515 : vector<1x2x1024xf32> to vector<2x1024xf32>
    %517 = vector.extract_strided_slice %516 {offsets = [0, 0], sizes = [2, 512], strides = [1, 1]} : vector<2x1024xf32> to vector<2x512xf32>
    %518 = arith.truncf %472 : vector<2x128xf32> to vector<2x128xbf16>
    %cst_123 = arith.constant dense<0.000000e+00> : vector<2x512xf32>
    %519 = tpu.matmul %518, %0, %cst_123 {dimension_numbers = #tpu.dot_dimension_numbers<[1], [0], [0], [1], [0, 0, 1, 1], [], []>} : vector<2x128xbf16>, vector<128x512xbf16>, vector<2x512xf32> -> vector<2x512xf32>
    %520 = arith.addf %517, %519 : vector<2x512xf32>
    %521 = vector.extract_strided_slice %520 {offsets = [0, 0], sizes = [2, 128], strides = [1, 1]} : vector<2x512xf32> to vector<2x128xf32>
    %522 = arith.negf %521 : vector<2x128xf32>
    %523 = math.exp %522 : vector<2x128xf32>
    %cst_124 = arith.constant 1.000000e+00 : f32
    %524 = vector.broadcast %cst_124 : f32 to vector<2x128xf32>
    %525 = arith.addf %524, %523 : vector<2x128xf32>
    %526 = arith.divf %524, %525 : vector<2x128xf32>
    %527 = vector.extract_strided_slice %520 {offsets = [0, 128], sizes = [2, 128], strides = [1, 1]} : vector<2x512xf32> to vector<2x128xf32>
    %528 = arith.negf %527 : vector<2x128xf32>
    %529 = math.exp %528 : vector<2x128xf32>
    %cst_125 = arith.constant 1.000000e+00 : f32
    %530 = vector.broadcast %cst_125 : f32 to vector<2x128xf32>
    %531 = arith.addf %530, %529 : vector<2x128xf32>
    %532 = arith.divf %530, %531 : vector<2x128xf32>
    %533 = vector.extract_strided_slice %520 {offsets = [0, 256], sizes = [2, 128], strides = [1, 1]} : vector<2x512xf32> to vector<2x128xf32>
    %534 = math.tanh %533 : vector<2x128xf32>
    %535 = vector.extract_strided_slice %520 {offsets = [0, 384], sizes = [2, 128], strides = [1, 1]} : vector<2x512xf32> to vector<2x128xf32>
    %536 = arith.negf %535 : vector<2x128xf32>
    %537 = math.exp %536 : vector<2x128xf32>
    %cst_126 = arith.constant 1.000000e+00 : f32
    %538 = vector.broadcast %cst_126 : f32 to vector<2x128xf32>
    %539 = arith.addf %538, %537 : vector<2x128xf32>
    %540 = arith.divf %538, %539 : vector<2x128xf32>
    %541 = arith.mulf %532, %470 : vector<2x128xf32>
    %542 = arith.mulf %526, %534 : vector<2x128xf32>
    %543 = arith.addf %541, %542 : vector<2x128xf32>
    %544 = math.tanh %543 : vector<2x128xf32>
    %545 = arith.mulf %540, %544 : vector<2x128xf32>
    %546 = arith.index_cast %c7_i32_120 : i32 to index
    %c0_127 = arith.constant 0 : index
    %c0_128 = arith.constant 0 : index
    %547 = vector.load %arg4[%546, %c0_127, %c0_128] : memref<8x2x256xf32, #tpu.memory_space<vmem>>, vector<1x2x128xf32>
    %548 = vector.shape_cast %547 : vector<1x2x128xf32> to vector<2x128xf32>
    %549 = vector.shape_cast %545 : vector<2x128xf32> to vector<1x2x128xf32>
    tpu.vector_store %arg4[%546, %c0_127, %c0_128], %549 {strides = array<i32>} : memref<8x2x256xf32, #tpu.memory_space<vmem>>, vector<1x2x128xf32>,
    %c7_i32_129 = arith.constant 7 : i32
    %550 = arith.subi %c7_i32_129, %c7_i32_120 : i32
    %551 = arith.index_cast %550 : i32 to index
    %c0_130 = arith.constant 0 : index
    %c0_131 = arith.constant 0 : index
    %552 = vector.load %arg1[%551, %c0_130, %c0_131] : memref<8x2x1024xf32, #tpu.memory_space<vmem>>, vector<1x2x1024xf32>
    %553 = vector.shape_cast %552 : vector<1x2x1024xf32> to vector<2x1024xf32>
    %554 = vector.extract_strided_slice %553 {offsets = [0, 512], sizes = [2, 512], strides = [1, 1]} : vector<2x1024xf32> to vector<2x512xf32>
    %555 = arith.truncf %509 : vector<2x128xf32> to vector<2x128xbf16>
    %cst_132 = arith.constant dense<0.000000e+00> : vector<2x512xf32>
    %556 = tpu.matmul %555, %1, %cst_132 {dimension_numbers = #tpu.dot_dimension_numbers<[1], [0], [0], [1], [0, 0, 1, 1], [], []>} : vector<2x128xbf16>, vector<128x512xbf16>, vector<2x512xf32> -> vector<2x512xf32>
    %557 = arith.addf %554, %556 : vector<2x512xf32>
    %558 = vector.extract_strided_slice %557 {offsets = [0, 0], sizes = [2, 128], strides = [1, 1]} : vector<2x512xf32> to vector<2x128xf32>
    %559 = arith.negf %558 : vector<2x128xf32>
    %560 = math.exp %559 : vector<2x128xf32>
    %cst_133 = arith.constant 1.000000e+00 : f32
    %561 = vector.broadcast %cst_133 : f32 to vector<2x128xf32>
    %562 = arith.addf %561, %560 : vector<2x128xf32>
    %563 = arith.divf %561, %562 : vector<2x128xf32>
    %564 = vector.extract_strided_slice %557 {offsets = [0, 128], sizes = [2, 128], strides = [1, 1]} : vector<2x512xf32> to vector<2x128xf32>
    %565 = arith.negf %564 : vector<2x128xf32>
    %566 = math.exp %565 : vector<2x128xf32>
    %cst_134 = arith.constant 1.000000e+00 : f32
    %567 = vector.broadcast %cst_134 : f32 to vector<2x128xf32>
    %568 = arith.addf %567, %566 : vector<2x128xf32>
    %569 = arith.divf %567, %568 : vector<2x128xf32>
    %570 = vector.extract_strided_slice %557 {offsets = [0, 256], sizes = [2, 128], strides = [1, 1]} : vector<2x512xf32> to vector<2x128xf32>
    %571 = math.tanh %570 : vector<2x128xf32>
    %572 = vector.extract_strided_slice %557 {offsets = [0, 384], sizes = [2, 128], strides = [1, 1]} : vector<2x512xf32> to vector<2x128xf32>
    %573 = arith.negf %572 : vector<2x128xf32>
    %574 = math.exp %573 : vector<2x128xf32>
    %cst_135 = arith.constant 1.000000e+00 : f32
    %575 = vector.broadcast %cst_135 : f32 to vector<2x128xf32>
    %576 = arith.addf %575, %574 : vector<2x128xf32>
    %577 = arith.divf %575, %576 : vector<2x128xf32>
    %578 = arith.mulf %569, %507 : vector<2x128xf32>
    %579 = arith.mulf %563, %571 : vector<2x128xf32>
    %580 = arith.addf %578, %579 : vector<2x128xf32>
    %581 = math.tanh %580 : vector<2x128xf32>
    %582 = arith.mulf %577, %581 : vector<2x128xf32>
    %583 = arith.index_cast %550 : i32 to index
    %c0_136 = arith.constant 0 : index
    %c128_137 = arith.constant 128 : index
    %584 = vector.load %arg4[%583, %c0_136, %c128_137] : memref<8x2x256xf32, #tpu.memory_space<vmem>>, vector<1x2x128xf32>
    %585 = vector.shape_cast %584 : vector<1x2x128xf32> to vector<2x128xf32>
    %586 = vector.shape_cast %582 : vector<2x128xf32> to vector<1x2x128xf32>
    tpu.vector_store %arg4[%583, %c0_136, %c128_137], %586 {strides = array<i32>} : memref<8x2x256xf32, #tpu.memory_space<vmem>>, vector<1x2x128xf32>,
    %c8_i32 = arith.constant 8 : i32
    return
  }
  func.func @transform_0(%arg0: i32) -> (i32, i32, i32) {
    %c0_i32 = arith.constant 0 : i32
    %c0_i32_0 = arith.constant 0 : i32
    %c0_i32_1 = arith.constant 0 : i32
    %c0_i32_2 = arith.constant 0 : i32
    return %c0_i32, %c0_i32_0, %c0_i32_1 : i32, i32, i32
  }
  func.func @transform_1(%arg0: i32) -> (i32, i32) {
    %c0_i32 = arith.constant 0 : i32
    %c0_i32_0 = arith.constant 0 : i32
    %c0_i32_1 = arith.constant 0 : i32
    return %c0_i32, %c0_i32_0 : i32, i32
  }
  func.func @transform_2(%arg0: i32) -> (i32, i32) {
    %c0_i32 = arith.constant 0 : i32
    %c0_i32_0 = arith.constant 0 : i32
    %c0_i32_1 = arith.constant 0 : i32
    return %c0_i32, %c0_i32_0 : i32, i32
  }
  func.func @transform_3(%arg0: i32) -> (i32, i32, i32) {
    %c0_i32 = arith.constant 0 : i32
    %c0_i32_0 = arith.constant 0 : i32
    %c0_i32_1 = arith.constant 0 : i32
    %c0_i32_2 = arith.constant 0 : i32
    return %c0_i32, %c0_i32_0, %c0_i32_1 : i32, i32, i32
  }
}

module attributes {stable_mosaic.version = 11 : i64} {
  func.func @_matmul_bias_kernel(%arg0: i32, %arg1: memref<16x256xf32, #tpu.memory_space<vmem>>, %arg2: memref<256x128xbf16, #tpu.memory_space<vmem>>, %arg3: memref<1x128xf32, #tpu.memory_space<vmem>>, %arg4: memref<16x128xf32, #tpu.memory_space<vmem>>) attributes {dimension_semantics = [#tpu.dimension_semantics<arbitrary>], iteration_bounds = array<i64: 1>, scalar_prefetch = 0 : i64, scratch_operands = 0 : i64, tpu.core_type = #tpu.core_type<tc>, window_params = [{pipeline_mode = #tpu.pipeline_mode<synchronous>, transform_indices = @transform_0, window_bounds = array<i64: 16, 256>}, {pipeline_mode = #tpu.pipeline_mode<synchronous>, transform_indices = @transform_1, window_bounds = array<i64: 256, 128>}, {pipeline_mode = #tpu.pipeline_mode<synchronous>, transform_indices = @transform_2, window_bounds = array<i64: 1, 128>}, {pipeline_mode = #tpu.pipeline_mode<synchronous>, transform_indices = @transform_3, window_bounds = array<i64: 16, 128>}]} {
    %c0 = arith.constant 0 : index
    %c0_0 = arith.constant 0 : index
    %0 = vector.load %arg1[%c0, %c0_0] : memref<16x256xf32, #tpu.memory_space<vmem>>, vector<16x256xf32>
    %1 = arith.truncf %0 : vector<16x256xf32> to vector<16x256xbf16>
    %c0_1 = arith.constant 0 : index
    %c0_2 = arith.constant 0 : index
    %2 = vector.load %arg2[%c0_1, %c0_2] : memref<256x128xbf16, #tpu.memory_space<vmem>>, vector<256x128xbf16>
    %cst = arith.constant dense<0.000000e+00> : vector<16x128xf32>
    %3 = tpu.matmul %1, %2, %cst {dimension_numbers = #tpu.dot_dimension_numbers<[1], [0], [0], [1], [0, 0, 1, 1], [], []>} : vector<16x256xbf16>, vector<256x128xbf16>, vector<16x128xf32> -> vector<16x128xf32>
    %c0_3 = arith.constant 0 : index
    %c0_4 = arith.constant 0 : index
    %4 = vector.load %arg3[%c0_3, %c0_4] : memref<1x128xf32, #tpu.memory_space<vmem>>, vector<1x128xf32>
    %5 = vector.broadcast %4 : vector<1x128xf32> to vector<16x128xf32>
    %6 = arith.addf %3, %5 : vector<16x128xf32>
    %c0_5 = arith.constant 0 : index
    %c0_6 = arith.constant 0 : index
    %7 = vector.load %arg4[%c0_5, %c0_6] : memref<16x128xf32, #tpu.memory_space<vmem>>, vector<16x128xf32>
    tpu.vector_store %arg4[%c0_5, %c0_6], %6 {strides = array<i32>} : memref<16x128xf32, #tpu.memory_space<vmem>>, vector<16x128xf32>,
    return
  }
  func.func @transform_0(%arg0: i32) -> (i32, i32) {
    %c0_i32 = arith.constant 0 : i32
    %c0_i32_0 = arith.constant 0 : i32
    %c0_i32_1 = arith.constant 0 : i32
    return %c0_i32, %c0_i32_0 : i32, i32
  }
  func.func @transform_1(%arg0: i32) -> (i32, i32) {
    %c0_i32 = arith.constant 0 : i32
    %c0_i32_0 = arith.constant 0 : i32
    %c0_i32_1 = arith.constant 0 : i32
    return %c0_i32, %c0_i32_0 : i32, i32
  }
  func.func @transform_2(%arg0: i32) -> (i32, i32) {
    %c0_i32 = arith.constant 0 : i32
    %c0_i32_0 = arith.constant 0 : i32
    %c0_i32_1 = arith.constant 0 : i32
    return %c0_i32, %c0_i32_0 : i32, i32
  }
  func.func @transform_3(%arg0: i32) -> (i32, i32) {
    %c0_i32 = arith.constant 0 : i32
    %c0_i32_0 = arith.constant 0 : i32
    %c0_i32_1 = arith.constant 0 : i32
    return %c0_i32, %c0_i32_0 : i32, i32
  }
}

</mosaic_0001>

<bundles_post_ra>
// kernel: lstm_model_forward.5
= control target key start
LH: loop header
LB: loop body
LE: loop exit
PB: predicated region body
PF: predicated region fallthrough
CT: control target
= control target key end

     0   :  { %8 = vsyncpa [#allocation3], 0  ;;  %s722_s0 = inlined_call_operand.vmem [shape: f32[16,64], index: 0, kind: input, shape index: {}]   ;;  %s723_s1 = inlined_call_operand.hbm [shape: bf16[64,1024], index: 1, kind: input, shape index: {}]   ;;  %s724_s2 = inlined_call_operand.hbm [shape: f32[1,1024], index: 2, kind: input, shape index: {}]   ;;  %s725_s3 = inlined_call_operand.vmem [shape: f32[16,1024], index: 3, kind: output, shape index: {}]  }
   0x1   :  { %s16_s14 = sshll.u32 %s723_s1, 4  ;;  %s17_s14 = int_to_ptr.hbm [resolvable:$true] %s16_s14 }
   0x2   :  { %9 = vsyncpa [#allocation5], 0  ;;  %s620_s15 = smov [#allocation2]   ;;  %s30_s19 = sshll.u32 %s724_s2, 4  ;;  %s31_s19 = int_to_ptr.hbm [resolvable:$true] %s30_s19 }
   0x3   :  { %s18_s16 = sshll.u32 %s620_s15, 4  ;;  %s621_s20 = smov 512   ;;  %s19_s16 = int_to_ptr.vmem [resolvable:$true] %s18_s16 }
   0x4   :  { %s622_s21 = smov 32   ;;  %s623_s22 = smov [#allocation4]  }
   0x5   :  { %24 = dma.hbm_to_vmem [thread:$0]  %s17_s14, 4096, %s19_s16, [#allocation3], %s621_s20, %s621_s20, %s622_s21  }
   0x6   :  { %s32_s23 = sshll.u32 %s623_s22, 4  ;;  %s33_s23 = int_to_ptr.vmem [resolvable:$true] %s32_s23 }
   0x7   :  { %35 = dma.hbm_to_vmem [thread:$0]  %s31_s19, 128, %s33_s23, [#allocation5]  }
   0x8   :  { %616 = dma.done.wait [#allocation3], 4096  }
   0x9   :  { %617 = vsyncadd [#allocation3], 4294963200 }
   0xa   :  { %618 = dma.done.wait [#allocation5], 128  }
   0xb   :  { %619 = vsyncadd [#allocation5], 4294967168  ;;  %v494_v0 = vld [vmem:[#allocation2 + $0xc0] sm:$0xf]  ;;  %v556_v2 = vld [vmem:[#allocation2 + $0xc4] sm:$0xf] }
   0xc   :  { %v560_v1 = vld [vmem:[#allocation2 + $0xdc] sm:$0xf0]  ;;  %v496_v4 = vld [vmem:[#allocation2 + $0xe0] sm:$0xf0]  ;;  %v502_v5 = vld [vmem:[#allocation2 + $0xc8] sm:$0xf] }
   0xd   :  { %v495_v3 = vor.u32 %v560_v1, %v494_v0  ;;  %v561_v6 = vld [vmem:[#allocation2 + $0xe4] sm:$0xf0]  ;;  %v499_v7 = vor.u32 %v556_v2, %v496_v4  ;;  %v557_v9 = vld [vmem:[#allocation2 + $0xcc] sm:$0xf]  ;;  %v462_v11 = vld [vmem:[#allocation2 + $0x80] sm:$0xf] }
   0xe   :  { %v503_v8 = vor.u32 %v561_v6, %v502_v5  ;;  %v504_v10 = vld [vmem:[#allocation2 + $0xe8] sm:$0xf0]  ;;  %v552_v13 = vld [vmem:[#allocation2 + $0x9c] sm:$0xf0]  ;;  %v548_v14 = vld [vmem:[#allocation2 + $0x84] sm:$0xf] }
   0xf   :  { %266 = vmatpush.bf16.msra.mxu0 %v495_v3  ;;  %v507_v12 = vor.u32 %v557_v9, %v504_v10  ;;  %v464_v15 = vld [vmem:[#allocation2 + $0xa0] sm:$0xf0]  ;;  %280 = vmatpush.bf16.msra.mxu1 %v499_v7  ;;  %v463_v16 = vor.u32 %v552_v13, %v462_v11  ;;  %v470_v18 = vld [vmem:[#allocation2 + $0x88] sm:$0xf]  ;;  %v549_v20 = vld [vmem:[#allocation2 + $0x8c] sm:$0xf] }
  0x10   :  { %294 = vmatpush.bf16.msra.mxu2 %v503_v8  ;;  %v467_v17 = vor.u32 %v548_v14, %v464_v15  ;;  %v553_v19 = vld [vmem:[#allocation2 + $0xa4] sm:$0xf0]  ;;  %v472_v22 = vld [vmem:[#allocation2 + $0xa8] sm:$0xf0]  ;;  %v430_v23 = vld [vmem:[#allocation2 + $0x40] sm:$0xf] }
  0x11   :  { %308 = vmatpush.bf16.msra.mxu3 %v507_v12  ;;  %v471_v21 = vor.u32 %v553_v19, %v470_v18  ;;  %v544_v24 = vld [vmem:[#allocation2 + $0x5c] sm:$0xf0]  ;;  %v475_v25 = vor.u32 %v549_v20, %v472_v22  ;;  %v540_v26 = vld [vmem:[#allocation2 + $0x44] sm:$0xf]  ;;  %v438_v28 = vld [vmem:[#allocation2 + $0x48] sm:$0xf] }
  0x12   :  { %v432_v27 = vld [vmem:[#allocation2 + $0x60] sm:$0xf0]  ;;  %v431_v29 = vor.u32 %v544_v24, %v430_v23  ;;  %v545_v30 = vld [vmem:[#allocation2 + $0x64] sm:$0xf0]  ;;  %v541_v31 = vld [vmem:[#allocation2 + $0x4c] sm:$0xf] }
  0x13   :  { %267 = vmatpush.bf16.msra.mxu0 %v463_v16  ;;  %v440_v32 = vld [vmem:[#allocation2 + $0x68] sm:$0xf0]  ;;  %281 = vmatpush.bf16.msra.mxu1 %v467_v17  ;;  %v435_v33 = vor.u32 %v540_v26, %v432_v27  ;;  %v439_v34 = vor.u32 %v545_v30, %v438_v28  ;;  %v398_v35 = vld [vmem:[#allocation2] sm:$0xf]  ;;  %v532_v37 = vld [vmem:[#allocation2 + $0x4] sm:$0xf] }
  0x14   :  { %295 = vmatpush.bf16.msra.mxu2 %v471_v21  ;;  %v536_v36 = vld [vmem:[#allocation2 + $0x1c] sm:$0xf0]  ;;  %v443_v38 = vor.u32 %v541_v31, %v440_v32  ;;  %v400_v39 = vld [vmem:[#allocation2 + $0x20] sm:$0xf0]  ;;  %v406_v40 = vld [vmem:[#allocation2 + $0x8] sm:$0xf] }
  0x15   :  { %309 = vmatpush.bf16.msra.mxu3 %v475_v25  ;;  %v537_v41 = vld [vmem:[#allocation2 + $0x24] sm:$0xf0]  ;;  %v533_v42 = vld [vmem:[#allocation2 + $0xc] sm:$0xf]  ;;  %v45_v44 = vld [vmem:[%s722_s0] sm:$0xff]  ;;  %v399_v45 = vor.u32 %v536_v36, %v398_v35  ;;  %v403_v49 = vor.u32 %v532_v37, %v400_v39  ;;  %vm258_vm0 = vcmask 523264  }
  0x16   :  { %v408_v43 = vld [vmem:[#allocation2 + $0x28] sm:$0xf0]  ;;  %v518_v47 = vld [vmem:[#allocation2 + $0xd8] sm:$0xf]  ;;  %v407_v50 = vor.u32 %v537_v41, %v406_v40  ;;  %v559_v51 = vld [vmem:[#allocation2 + $0xdc] sm:$0xf] }
  0x17   :  { %268 = vmatpush.bf16.msra.mxu0 %v431_v29  ;;  %v46_v46 = vld [vmem:[%s722_s0 + $0x8] sm:$0xff]  ;;  %v563_v48 = vld [vmem:[#allocation2 + $0xf4] sm:$0xf0]  ;;  %282 = vmatpush.bf16.msra.mxu1 %v435_v33  ;;  %v520_v52 = vld [vmem:[#allocation2 + $0xf8] sm:$0xf0]  ;;  %v411_v53 = vor.u32 %v533_v42, %v408_v43 }
  0x18   :  { %296 = vmatpush.bf16.msra.mxu2 %v439_v34  ;;  %v519_v54 = vor.u32 %v563_v48, %v518_v47  ;;  %v510_v55 = vld [vmem:[#allocation2 + $0xd0] sm:$0xf]  ;;  %v558_v57 = vld [vmem:[#allocation2 + $0xd4] sm:$0xf]  ;;  %v656_v58 = vpack.c.bf16 %v46_v46, %v45_v44  ;;  %v523_v59 = vor.u32 %v559_v51, %v520_v52  ;;  %v486_v61 = vld [vmem:[#allocation2 + $0x98] sm:$0xf] }
  0x19   :  { %310 = vmatpush.bf16.msra.mxu3 %v443_v38  ;;  %v562_v56 = vld [vmem:[#allocation2 + $0xec] sm:$0xf0]  ;;  %v512_v60 = vld [vmem:[#allocation2 + $0xf0] sm:$0xf0]  ;;  %v555_v62 = vld [vmem:[#allocation2 + $0xb4] sm:$0xf0] }
  0x1a   :  { %v551_v63 = vld [vmem:[#allocation2 + $0x9c] sm:$0xf]  ;;  %v511_v1 = vor.u32 %v562_v56, %v510_v55  ;;  %v515_v2 = vor.u32 %v558_v57, %v512_v60  ;;  %v487_v3 = vor.u32 %v555_v62, %v486_v61  ;;  %v478_v4 = vld [vmem:[#allocation2 + $0x90] sm:$0xf]  ;;  %v550_v6 = vld [vmem:[#allocation2 + $0x94] sm:$0xf] }
  0x1b   :  { %269 = vmatpush.bf16.msra.mxu0 %v399_v45  ;;  %v488_v0 = vld [vmem:[#allocation2 + $0xb8] sm:$0xf0]  ;;  %283 = vmatpush.bf16.msra.mxu1 %v403_v49  ;;  %v554_v5 = vld [vmem:[#allocation2 + $0xac] sm:$0xf0]  ;;  %v480_v8 = vld [vmem:[#allocation2 + $0xb0] sm:$0xf0] }
  0x1c   :  { %297 = vmatpush.bf16.msra.mxu2 %v407_v50  ;;  %v491_v7 = vor.u32 %v551_v63, %v488_v0  ;;  %v454_v9 = vld [vmem:[#allocation2 + $0x58] sm:$0xf]  ;;  %v543_v11 = vld [vmem:[#allocation2 + $0x5c] sm:$0xf]  ;;  %v479_v13 = vor.u32 %v554_v5, %v478_v4  ;;  %v483_v14 = vor.u32 %v550_v6, %v480_v8  ;;  %v446_v16 = vld [vmem:[#allocation2 + $0x50] sm:$0xf] }
  0x1d   :  { %311 = vmatpush.bf16.msra.mxu3 %v411_v53  ;;  %v547_v10 = vld [vmem:[#allocation2 + $0x74] sm:$0xf0]  ;;  %v456_v12 = vld [vmem:[#allocation2 + $0x78] sm:$0xf0]  ;;  %v546_v17 = vld [vmem:[#allocation2 + $0x6c] sm:$0xf0] }
  0x1e   :  { %524 = vmatmul.msk.bf16.vlgmr.msra.gmra.mxu0 %vm258_vm0, %v656_v58  ;;  %525 = vmatmul.msk.bf16.vlgmr.msra.gmra.mxu1 %vm258_vm0, %v656_v58  ;;  %v455_v15 = vor.u32 %v547_v10, %v454_v9  ;;  %v542_v18 = vld [vmem:[#allocation2 + $0x54] sm:$0xf]  ;;  %v459_v19 = vor.u32 %v543_v11, %v456_v12  ;;  %v422_v21 = vld [vmem:[#allocation2 + $0x18] sm:$0xf]  ;;  %v535_v23 = vld [vmem:[#allocation2 + $0x1c] sm:$0xf]  ;;  %v447_v25 = vor.u32 %v546_v17, %v446_v16 }
  0x1f   :  { %526 = vmatmul.msk.bf16.vlgmr.msra.gmra.mxu2 %vm258_vm0, %v656_v58  ;;  %322 = vmatpush.bf16.msrb.mxu0 %v511_v1  ;;  %v448_v20 = vld [vmem:[#allocation2 + $0x70] sm:$0xf0]  ;;  %v539_v22 = vld [vmem:[#allocation2 + $0x34] sm:$0xf0]  ;;  %v424_v24 = vld [vmem:[#allocation2 + $0x38] sm:$0xf0] }
  0x20   :  { %350 = vmatpush.bf16.msrb.mxu2 %v519_v54  ;;  %527 = vmatmul.msk.bf16.vlgmr.msra.gmra.mxu3 %vm258_vm0, %v656_v58  ;;  %v451_v26 = vor.u32 %v542_v18, %v448_v20  ;;  %v423_v27 = vor.u32 %v539_v22, %v422_v21  ;;  %v414_v28 = vld [vmem:[#allocation2 + $0x10] sm:$0xf]  ;;  %v427_v30 = vor.u32 %v535_v23, %v424_v24  ;;  %v534_v31 = vld [vmem:[#allocation2 + $0x14] sm:$0xf]  ;;  %v80_v35 = vld [vmem:[#allocation4] sm:$0xff] }
  0x21   :  { %364 = vmatpush.bf16.msrb.mxu3 %v523_v59  ;;  %336 = vmatpush.bf16.msrb.mxu1 %v515_v2  ;;  %v538_v29 = vld [vmem:[#allocation2 + $0x2c] sm:$0xf0]  ;;  %v416_v32 = vld [vmem:[#allocation2 + $0x30] sm:$0xf0]  ;;  %v82_v36 = vperm.slane %v80_v35, 0  ;;  %v83_v37 = vperm.slane %v80_v35, 1 }
  0x22   :  { %v415_v33 = vor.u32 %v538_v29, %v414_v28  ;;  %v419_v34 = vor.u32 %v534_v31, %v416_v32  ;;  %v84_v42 = vperm.slane %v80_v35, 2  ;;  %v85_v43 = vperm.slane %v80_v35, 3 }
  0x23   :  { %323 = vmatpush.bf16.msrb.mxu0 %v479_v13  ;;  %v86_v52 = vperm.slane %v80_v35, 4  ;;  %v87_v54 = vperm.slane %v80_v35, 5  ;;  %v88_v62 = vperm.slane %v80_v35, 6  ;;  %v89_v63 = vperm.slane %v80_v35, 7 }
  0x24   :  { %351 = vmatpush.bf16.msrb.mxu2 %v487_v3 }
  0x25   :  { %365 = vmatpush.bf16.msrb.mxu3 %v491_v7  ;;  %337 = vmatpush.bf16.msrb.mxu1 %v483_v14 }
  0x27   :  { %324 = vmatpush.bf16.msrb.mxu0 %v447_v25 }
  0x28   :  { %352 = vmatpush.bf16.msrb.mxu2 %v455_v15 }
  0x29   :  { %366 = vmatpush.bf16.msrb.mxu3 %v459_v19  ;;  %338 = vmatpush.bf16.msrb.mxu1 %v451_v26 }
  0x2b   :  { %325 = vmatpush.bf16.msrb.mxu0 %v415_v33 }
  0x2c   :  { %353 = vmatpush.bf16.msrb.mxu2 %v423_v27 }
  0x2d   :  { %367 = vmatpush.bf16.msrb.mxu3 %v427_v30  ;;  %339 = vmatpush.bf16.msrb.mxu1 %v419_v34 }
  0x2e   :  { %528 = vmatmul.msk.bf16.vlgmr.msrb.gmra.mxu0 %vm258_vm0, %v656_v58 }
  0x2f   :  { %530 = vmatmul.msk.bf16.vlgmr.msrb.gmra.mxu2 %vm258_vm0, %v656_v58 }
  0x30   :  { %529 = vmatmul.msk.bf16.vlgmr.msrb.gmra.mxu1 %vm258_vm0, %v656_v58  ;;  %531 = vmatmul.msk.bf16.vlgmr.msrb.gmra.mxu3 %vm258_vm0, %v656_v58 }
  0x9b   :  { %v271_v38 = vpop.f32.mrf.mxu0  ;;  %v285_v40 = vpop.f32.mrf.mxu1 }
  0x9c   :  { %v272_v39 = vadd.f32 %v271_v38, %v82_v36  ;;  %v286_v41 = vadd.f32 %v285_v40, %v83_v37 }
  0x9e   :  { %374 = vst [vmem:[%s725_s3] sm:$0xff] %v272_v39 }
  0x9f   :  { %375 = vst [vmem:[%s725_s3 + $0x8] sm:$0xff] %v286_v41 }
  0xa2   :  { %v299_v44 = vpop.f32.mrf.mxu2 }
  0xa3   :  { %v300_v45 = vadd.f32 %v299_v44, %v84_v42  ;;  %v313_v46 = vpop.f32.mrf.mxu3  ;;  %v273_v47 = vpop.f32.mrf.mxu0 }
  0xa4   :  { %v314_v48 = vadd.f32 %v313_v46, %v85_v43  ;;  %v274_v49 = vadd.f32 %v273_v47, %v82_v36  ;;  %v287_v50 = vpop.f32.mrf.mxu1 }
  0xa5   :  { %376 = vst [vmem:[%s725_s3 + $0x10] sm:$0xff] %v300_v45  ;;  %v288_v51 = vadd.f32 %v287_v50, %v83_v37 }
  0xa6   :  { %377 = vst [vmem:[%s725_s3 + $0x18] sm:$0xff] %v314_v48 }
  0xa7   :  { %382 = vst [vmem:[%s725_s3 + $0x40] sm:$0xff] %v274_v49 }
  0xa8   :  { %383 = vst [vmem:[%s725_s3 + $0x48] sm:$0xff] %v288_v51 }
  0xaa   :  { %v301_v53 = vpop.f32.mrf.mxu2 }
  0xab   :  { %v302_v55 = vadd.f32 %v301_v53, %v84_v42  ;;  %v315_v56 = vpop.f32.mrf.mxu3  ;;  %v327_v58 = vpop.f32.mrf.mxu0 }
  0xac   :  { %v316_v57 = vadd.f32 %v315_v56, %v85_v43  ;;  %v328_v59 = vadd.f32 %v327_v58, %v86_v52 }
  0xad   :  { %384 = vst [vmem:[%s725_s3 + $0x50] sm:$0xff] %v302_v55  ;;  %v341_v60 = vpop.f32.mrf.mxu1 }
  0xae   :  { %385 = vst [vmem:[%s725_s3 + $0x58] sm:$0xff] %v316_v57  ;;  %v342_v61 = vadd.f32 %v341_v60, %v87_v54 }
  0xaf   :  { %378 = vst [vmem:[%s725_s3 + $0x20] sm:$0xff] %v328_v59 }
  0xb0   :  { %379 = vst [vmem:[%s725_s3 + $0x28] sm:$0xff] %v342_v61 }
  0xb2   :  { %v355_v0 = vpop.f32.mrf.mxu2 }
  0xb3   :  { %v356_v1 = vadd.f32 %v355_v0, %v88_v62  ;;  %v369_v2 = vpop.f32.mrf.mxu3  ;;  %v329_v4 = vpop.f32.mrf.mxu0 }
  0xb4   :  { %v370_v3 = vadd.f32 %v369_v2, %v89_v63  ;;  %v330_v5 = vadd.f32 %v329_v4, %v86_v52 }
  0xb5   :  { %380 = vst [vmem:[%s725_s3 + $0x30] sm:$0xff] %v356_v1  ;;  %v343_v6 = vpop.f32.mrf.mxu1 }
  0xb6   :  { %381 = vst [vmem:[%s725_s3 + $0x38] sm:$0xff] %v370_v3  ;;  %v344_v7 = vadd.f32 %v343_v6, %v87_v54 }
  0xb7   :  { %386 = vst [vmem:[%s725_s3 + $0x60] sm:$0xff] %v330_v5 }
  0xb8   :  { %387 = vst [vmem:[%s725_s3 + $0x68] sm:$0xff] %v344_v7 }
  0xba   :  { %v357_v8 = vpop.f32.mrf.mxu2 }
  0xbb   :  { %v358_v9 = vadd.f32 %v357_v8, %v88_v62  ;;  %v371_v10 = vpop.f32.mrf.mxu3 }
  0xbc   :  { %v372_v11 = vadd.f32 %v371_v10, %v89_v63 }
  0xbd   :  { %388 = vst [vmem:[%s725_s3 + $0x70] sm:$0xff] %v358_v9 }
  0xbe   :  { %389 = vst [vmem:[%s725_s3 + $0x78] sm:$0xff] %v372_v11 }
  0xbf   :  { %394 = vsyncpa [#allocation3], 1 }
  0xc0   :  { %395 = vsyncpa [#allocation5], 1 }

// kernel: lstm_model_forward.7
= control target key start
LH: loop header
LB: loop body
LE: loop exit
PB: predicated region body
PF: predicated region fallthrough
CT: control target
= control target key end

     0   :  { %8 = vsyncpa [#allocation3], 0  ;;  %s1736_s15 = smov [#allocation2]   ;;  %s1737_s17 = smov 512   ;;  %s1855_s0 = inlined_call_operand.vmem [shape: f32[16,256], index: 0, kind: input, shape index: {}]   ;;  %s1856_s1 = inlined_call_operand.hbm [shape: bf16[256,1024], index: 1, kind: input, shape index: {}]   ;;  %s1857_s2 = inlined_call_operand.vmem [shape: f32[1,1024], index: 2, kind: input, shape index: {}]   ;;  %s1858_s3 = inlined_call_operand.vmem [shape: f32[16,1024], index: 3, kind: output, shape index: {}]  }
   0x1   :  { %s15_s14 = sshll.u32 %s1856_s1, 4  ;;  %s17_s16 = sshll.u32 %s1736_s15, 4  ;;  %s16_s14 = int_to_ptr.hbm [resolvable:$true] %s15_s14  ;;  %s18_s16 = int_to_ptr.vmem [resolvable:$true] %s17_s16 }
   0x2   :  { %s1738_s18 = smov 32  }
   0x3   :  { %23 = dma.hbm_to_vmem [thread:$0]  %s16_s14, 16384, %s18_s16, [#allocation3], %s1737_s17, %s1737_s17, %s1738_s18  }
   0x4   :  { %1734 = dma.done.wait [#allocation3], 16384  }
   0x5   :  { %1735 = vsyncadd [#allocation3], 4294950912  ;;  %v1293_v0 = vld [vmem:[#allocation2 + $0x1c0] sm:$0xf]  ;;  %v1635_v5 = vld [vmem:[#allocation2 + $0x1c4] sm:$0xf] }
   0x6   :  { %v1639_v1 = vld [vmem:[#allocation2 + $0x1dc] sm:$0xf0]  ;;  %v1295_v6 = vld [vmem:[#allocation2 + $0x1e0] sm:$0xf0] }
   0x7   :  { %v1549_v2 = vld [vmem:[#allocation2 + $0x3c0] sm:$0xf]  ;;  %v1294_v3 = vor.u32 %v1639_v1, %v1293_v0  ;;  %v1298_v8 = vor.u32 %v1635_v5, %v1295_v6  ;;  %v1699_v9 = vld [vmem:[#allocation2 + $0x3c4] sm:$0xf] }
   0x8   :  { %v1703_v4 = vld [vmem:[#allocation2 + $0x3dc] sm:$0xf0]  ;;  %v1551_v10 = vld [vmem:[#allocation2 + $0x3e0] sm:$0xf0] }
   0x9   :  { %v1550_v7 = vor.u32 %v1703_v4, %v1549_v2  ;;  %v1261_v11 = vld [vmem:[#allocation2 + $0x180] sm:$0xf]  ;;  %822 = vmatpush.bf16.msra.mxu0 %v1294_v3  ;;  %v1554_v12 = vor.u32 %v1699_v9, %v1551_v10  ;;  %850 = vmatpush.bf16.msra.mxu2 %v1298_v8  ;;  %v1627_v18 = vld [vmem:[#allocation2 + $0x184] sm:$0xf] }
   0xa   :  { %v1631_v13 = vld [vmem:[#allocation2 + $0x19c] sm:$0xf0]  ;;  %v1263_v19 = vld [vmem:[#allocation2 + $0x1a0] sm:$0xf0] }
   0xb   :  { %v1517_v14 = vld [vmem:[#allocation2 + $0x380] sm:$0xf]  ;;  %836 = vmatpush.bf16.msra.mxu1 %v1550_v7  ;;  %v1262_v16 = vor.u32 %v1631_v13, %v1261_v11  ;;  %v1691_v20 = vld [vmem:[#allocation2 + $0x384] sm:$0xf]  ;;  %864 = vmatpush.bf16.msra.mxu3 %v1554_v12  ;;  %v1266_v21 = vor.u32 %v1627_v18, %v1263_v19 }
   0xc   :  { %v1695_v15 = vld [vmem:[#allocation2 + $0x39c] sm:$0xf0]  ;;  %v1519_v22 = vld [vmem:[#allocation2 + $0x3a0] sm:$0xf0] }
   0xd   :  { %v1518_v17 = vor.u32 %v1695_v15, %v1517_v14  ;;  %v1229_v23 = vld [vmem:[#allocation2 + $0x140] sm:$0xf]  ;;  %v1522_v25 = vor.u32 %v1691_v20, %v1519_v22  ;;  %v1619_v28 = vld [vmem:[#allocation2 + $0x144] sm:$0xf]  ;;  %823 = vmatpush.bf16.msra.mxu0 %v1262_v16  ;;  %851 = vmatpush.bf16.msra.mxu2 %v1266_v21 }
   0xe   :  { %v1623_v24 = vld [vmem:[#allocation2 + $0x15c] sm:$0xf0]  ;;  %v1231_v30 = vld [vmem:[#allocation2 + $0x160] sm:$0xf0] }
   0xf   :  { %v1485_v26 = vld [vmem:[#allocation2 + $0x340] sm:$0xf]  ;;  %v1230_v29 = vor.u32 %v1623_v24, %v1229_v23  ;;  %v1683_v31 = vld [vmem:[#allocation2 + $0x344] sm:$0xf]  ;;  %837 = vmatpush.bf16.msra.mxu1 %v1518_v17  ;;  %v1234_v34 = vor.u32 %v1619_v28, %v1231_v30  ;;  %865 = vmatpush.bf16.msra.mxu3 %v1522_v25  ;;  %v1301_v28 = vld [vmem:[#allocation2 + $0x1c8] sm:$0xf] }
  0x10   :  { %v1687_v27 = vld [vmem:[#allocation2 + $0x35c] sm:$0xf0]  ;;  %v1487_v32 = vld [vmem:[#allocation2 + $0x360] sm:$0xf0]  ;;  %v1557_v30 = vld [vmem:[#allocation2 + $0x3c8] sm:$0xf] }
  0x11   :  { %v1486_v33 = vor.u32 %v1687_v27, %v1485_v26  ;;  %v1197_v35 = vld [vmem:[#allocation2 + $0x100] sm:$0xf]  ;;  %v1490_v38 = vor.u32 %v1683_v31, %v1487_v32  ;;  %v1611_v40 = vld [vmem:[#allocation2 + $0x104] sm:$0xf]  ;;  %824 = vmatpush.bf16.msra.mxu0 %v1230_v29  ;;  %852 = vmatpush.bf16.msra.mxu2 %v1234_v34  ;;  %v1640_v29 = vld [vmem:[#allocation2 + $0x1e4] sm:$0xf0] }
  0x12   :  { %v1615_v36 = vld [vmem:[#allocation2 + $0x11c] sm:$0xf0]  ;;  %v1199_v41 = vld [vmem:[#allocation2 + $0x120] sm:$0xf0]  ;;  %v1704_v32 = vld [vmem:[#allocation2 + $0x3e4] sm:$0xf0] }
  0x13   :  { %v1453_v37 = vld [vmem:[#allocation2 + $0x300] sm:$0xf]  ;;  %v1675_v42 = vld [vmem:[#allocation2 + $0x304] sm:$0xf]  ;;  %v1198_v44 = vor.u32 %v1615_v36, %v1197_v35  ;;  %838 = vmatpush.bf16.msra.mxu1 %v1486_v33  ;;  %v1202_v46 = vor.u32 %v1611_v40, %v1199_v41  ;;  %866 = vmatpush.bf16.msra.mxu3 %v1490_v38  ;;  %v1636_v33 = vld [vmem:[#allocation2 + $0x1cc] sm:$0xf]  ;;  %v1302_v40 = vor.u32 %v1640_v29, %v1301_v28 }
  0x14   :  { %v1679_v39 = vld [vmem:[#allocation2 + $0x31c] sm:$0xf0]  ;;  %v1455_v43 = vld [vmem:[#allocation2 + $0x320] sm:$0xf0]  ;;  %v1303_v34 = vld [vmem:[#allocation2 + $0x1e8] sm:$0xf0]  ;;  %v1558_v41 = vor.u32 %v1704_v32, %v1557_v30 }
  0x15   :  { %v1454_v45 = vor.u32 %v1679_v39, %v1453_v37  ;;  %v1165_v47 = vld [vmem:[#allocation2 + $0xc0] sm:$0xf]  ;;  %v1458_v50 = vor.u32 %v1675_v42, %v1455_v43  ;;  %v1603_v52 = vld [vmem:[#allocation2 + $0xc4] sm:$0xf]  ;;  %825 = vmatpush.bf16.msra.mxu0 %v1198_v44  ;;  %853 = vmatpush.bf16.msra.mxu2 %v1202_v46  ;;  %v1700_v37 = vld [vmem:[#allocation2 + $0x3cc] sm:$0xf]  ;;  %v1306_v42 = vor.u32 %v1636_v33, %v1303_v34 }
  0x16   :  { %v1607_v48 = vld [vmem:[#allocation2 + $0xdc] sm:$0xf0]  ;;  %v1167_v53 = vld [vmem:[#allocation2 + $0xe0] sm:$0xf0]  ;;  %v1559_v38 = vld [vmem:[#allocation2 + $0x3e8] sm:$0xf0] }
  0x17   :  { %v1421_v49 = vld [vmem:[#allocation2 + $0x2c0] sm:$0xf]  ;;  %v1667_v54 = vld [vmem:[#allocation2 + $0x2c4] sm:$0xf]  ;;  %v1166_v56 = vor.u32 %v1607_v48, %v1165_v47  ;;  %839 = vmatpush.bf16.msra.mxu1 %v1454_v45  ;;  %v1170_v58 = vor.u32 %v1603_v52, %v1167_v53  ;;  %867 = vmatpush.bf16.msra.mxu3 %v1458_v50  ;;  %v1269_v43 = vld [vmem:[#allocation2 + $0x188] sm:$0xf]  ;;  %v1562_v46 = vor.u32 %v1700_v37, %v1559_v38 }
  0x18   :  { %v1671_v51 = vld [vmem:[#allocation2 + $0x2dc] sm:$0xf0]  ;;  %v1423_v55 = vld [vmem:[#allocation2 + $0x2e0] sm:$0xf0]  ;;  %v1632_v44 = vld [vmem:[#allocation2 + $0x1a4] sm:$0xf0] }
  0x19   :  { %v1422_v57 = vor.u32 %v1671_v51, %v1421_v49  ;;  %v1133_v59 = vld [vmem:[#allocation2 + $0x80] sm:$0xf]  ;;  %v1426_v62 = vor.u32 %v1667_v54, %v1423_v55  ;;  %v1595_v0 = vld [vmem:[#allocation2 + $0x84] sm:$0xf]  ;;  %826 = vmatpush.bf16.msra.mxu0 %v1166_v56  ;;  %854 = vmatpush.bf16.msra.mxu2 %v1170_v58  ;;  %v1525_v45 = vld [vmem:[#allocation2 + $0x388] sm:$0xf]  ;;  %v1270_v52 = vor.u32 %v1632_v44, %v1269_v43 }
  0x1a   :  { %v1599_v60 = vld [vmem:[#allocation2 + $0x9c] sm:$0xf0]  ;;  %v1135_v1 = vld [vmem:[#allocation2 + $0xa0] sm:$0xf0]  ;;  %v1696_v47 = vld [vmem:[#allocation2 + $0x3a4] sm:$0xf0] }
  0x1b   :  { %v1389_v61 = vld [vmem:[#allocation2 + $0x280] sm:$0xf]  ;;  %v1659_v2 = vld [vmem:[#allocation2 + $0x284] sm:$0xf]  ;;  %v1134_v4 = vor.u32 %v1599_v60, %v1133_v59  ;;  %840 = vmatpush.bf16.msra.mxu1 %v1422_v57  ;;  %v1138_v6 = vor.u32 %v1595_v0, %v1135_v1  ;;  %868 = vmatpush.bf16.msra.mxu3 %v1426_v62  ;;  %v1628_v48 = vld [vmem:[#allocation2 + $0x18c] sm:$0xf]  ;;  %v1526_v53 = vor.u32 %v1696_v47, %v1525_v45 }
  0x1c   :  { %v1663_v63 = vld [vmem:[#allocation2 + $0x29c] sm:$0xf0]  ;;  %v1391_v3 = vld [vmem:[#allocation2 + $0x2a0] sm:$0xf0]  ;;  %v1271_v49 = vld [vmem:[#allocation2 + $0x1a8] sm:$0xf0] }
  0x1d   :  { %v1390_v5 = vor.u32 %v1663_v63, %v1389_v61  ;;  %v1101_v7 = vld [vmem:[#allocation2 + $0x40] sm:$0xf]  ;;  %v1394_v10 = vor.u32 %v1659_v2, %v1391_v3  ;;  %v1587_v12 = vld [vmem:[#allocation2 + $0x44] sm:$0xf]  ;;  %827 = vmatpush.bf16.msra.mxu0 %v1134_v4  ;;  %855 = vmatpush.bf16.msra.mxu2 %v1138_v6  ;;  %v1692_v50 = vld [vmem:[#allocation2 + $0x38c] sm:$0xf]  ;;  %v1274_v54 = vor.u32 %v1628_v48, %v1271_v49 }
  0x1e   :  { %v1591_v8 = vld [vmem:[#allocation2 + $0x5c] sm:$0xf0]  ;;  %v1103_v13 = vld [vmem:[#allocation2 + $0x60] sm:$0xf0]  ;;  %v1527_v51 = vld [vmem:[#allocation2 + $0x3a8] sm:$0xf0] }
  0x1f   :  { %v1357_v9 = vld [vmem:[#allocation2 + $0x240] sm:$0xf]  ;;  %v1651_v14 = vld [vmem:[#allocation2 + $0x244] sm:$0xf]  ;;  %v1102_v16 = vor.u32 %v1591_v8, %v1101_v7  ;;  %841 = vmatpush.bf16.msra.mxu1 %v1390_v5  ;;  %v1106_v20 = vor.u32 %v1587_v12, %v1103_v13  ;;  %869 = vmatpush.bf16.msra.mxu3 %v1394_v10  ;;  %v1237_v55 = vld [vmem:[#allocation2 + $0x148] sm:$0xf]  ;;  %v1530_v58 = vor.u32 %v1692_v50, %v1527_v51 }
  0x20   :  { %v1655_v11 = vld [vmem:[#allocation2 + $0x25c] sm:$0xf0]  ;;  %v1359_v15 = vld [vmem:[#allocation2 + $0x260] sm:$0xf0]  ;;  %v1624_v56 = vld [vmem:[#allocation2 + $0x164] sm:$0xf0] }
  0x21   :  { %v1069_v17 = vld [vmem:[#allocation2] sm:$0xf]  ;;  %v1358_v19 = vor.u32 %v1655_v11, %v1357_v9  ;;  %v1579_v23 = vld [vmem:[#allocation2 + $0x4] sm:$0xf]  ;;  %v1362_v24 = vor.u32 %v1651_v14, %v1359_v15  ;;  %828 = vmatpush.bf16.msra.mxu0 %v1102_v16  ;;  %856 = vmatpush.bf16.msra.mxu2 %v1106_v20  ;;  %v1493_v57 = vld [vmem:[#allocation2 + $0x348] sm:$0xf]  ;;  %v1238_v1 = vor.u32 %v1624_v56, %v1237_v55 }
  0x22   :  { %v1583_v18 = vld [vmem:[#allocation2 + $0x1c] sm:$0xf0]  ;;  %v1071_v25 = vld [vmem:[#allocation2 + $0x20] sm:$0xf0]  ;;  %v1688_v59 = vld [vmem:[#allocation2 + $0x364] sm:$0xf0] }
  0x23   :  { %v1325_v21 = vld [vmem:[#allocation2 + $0x200] sm:$0xf]  ;;  %v1643_v26 = vld [vmem:[#allocation2 + $0x204] sm:$0xf]  ;;  %v1070_v31 = vor.u32 %v1583_v18, %v1069_v17  ;;  %842 = vmatpush.bf16.msra.mxu1 %v1358_v19  ;;  %v1074_v36 = vor.u32 %v1579_v23, %v1071_v25  ;;  %870 = vmatpush.bf16.msra.mxu3 %v1362_v24  ;;  %v1620_v60 = vld [vmem:[#allocation2 + $0x14c] sm:$0xf]  ;;  %v1494_v5 = vor.u32 %v1688_v59, %v1493_v57 }
  0x24   :  { %v1647_v22 = vld [vmem:[#allocation2 + $0x21c] sm:$0xf0]  ;;  %v1327_v27 = vld [vmem:[#allocation2 + $0x220] sm:$0xf0]  ;;  %v1239_v61 = vld [vmem:[#allocation2 + $0x168] sm:$0xf0] }
  0x25   :  { %v1326_v35 = vor.u32 %v1647_v22, %v1325_v21  ;;  %v1330_v39 = vor.u32 %v1643_v26, %v1327_v27  ;;  %829 = vmatpush.bf16.msra.mxu0 %v1070_v31  ;;  %857 = vmatpush.bf16.msra.mxu2 %v1074_v36  ;;  %v1684_v62 = vld [vmem:[#allocation2 + $0x34c] sm:$0xf]  ;;  %v1205_v0 = vld [vmem:[#allocation2 + $0x108] sm:$0xf]  ;;  %v30_v3 = vld [vmem:[%s1855_s0] sm:$0xff]  ;;  %v1242_v6 = vor.u32 %v1620_v60, %v1239_v61 }
  0x26   :  { %v1495_v63 = vld [vmem:[#allocation2 + $0x368] sm:$0xf0]  ;;  %v1616_v2 = vld [vmem:[#allocation2 + $0x124] sm:$0xf0]  ;;  %v32_v4 = vld [vmem:[%s1855_s0 + $0x10] sm:$0xff] }
  0x27   :  { %843 = vmatpush.bf16.msra.mxu1 %v1326_v35  ;;  %871 = vmatpush.bf16.msra.mxu3 %v1330_v39  ;;  %v1461_v7 = vld [vmem:[#allocation2 + $0x308] sm:$0xf]  ;;  %v1768_v8 = vpack.c.bf16 %v32_v4, %v30_v3  ;;  %v33_v10 = vld [vmem:[%s1855_s0 + $0x18] sm:$0xff]  ;;  %v1498_v11 = vor.u32 %v1684_v62, %v1495_v63  ;;  %v1612_v13 = vld [vmem:[#allocation2 + $0x10c] sm:$0xf]  ;;  %v1206_v18 = vor.u32 %v1616_v2, %v1205_v0 }
  0x28   :  { %v31_v9 = vld [vmem:[%s1855_s0 + $0x8] sm:$0xff]  ;;  %v1309_v2 = vld [vmem:[#allocation2 + $0x1d0] sm:$0xf] }
  0x29   :  { %878 = vmatpush.bf16.msrb.mxu0 %v1302_v40  ;;  %906 = vmatpush.bf16.msrb.mxu2 %v1306_v42  ;;  %v1680_v12 = vld [vmem:[#allocation2 + $0x324] sm:$0xf0]  ;;  %v1207_v14 = vld [vmem:[#allocation2 + $0x128] sm:$0xf0]  ;;  %v1776_v15 = vpack.c.bf16 %v33_v10, %v31_v9  ;;  %v1641_v3 = vld [vmem:[#allocation2 + $0x1ec] sm:$0xf0] }
  0x2a   :  { %v1676_v16 = vld [vmem:[#allocation2 + $0x30c] sm:$0xf]  ;;  %858 = vmatmul.bf16.vlgmr.msra.gmra.mxu2 %v1768_v8  ;;  %830 = vmatmul.bf16.vlgmr.msra.gmra.mxu0 %v1768_v8  ;;  %v1462_v19 = vor.u32 %v1680_v12, %v1461_v7  ;;  %v1210_v20 = vor.u32 %v1612_v13, %v1207_v14  ;;  %v1173_v21 = vld [vmem:[#allocation2 + $0xc8] sm:$0xf]  ;;  %v1565_v4 = vld [vmem:[#allocation2 + $0x3d0] sm:$0xf] }
  0x2b   :  { %892 = vmatpush.bf16.msrb.mxu1 %v1558_v41  ;;  %920 = vmatpush.bf16.msrb.mxu3 %v1562_v46  ;;  %v1463_v17 = vld [vmem:[#allocation2 + $0x328] sm:$0xf0]  ;;  %v1608_v22 = vld [vmem:[#allocation2 + $0xe4] sm:$0xf0]  ;;  %v1637_v7 = vld [vmem:[#allocation2 + $0x1d4] sm:$0xf] }
  0x2c   :  { %872 = vmatmul.bf16.vlgmr.msra.gmra.mxu3 %v1776_v15  ;;  %v1429_v23 = vld [vmem:[#allocation2 + $0x2c8] sm:$0xf]  ;;  %v1466_v24 = vor.u32 %v1676_v16, %v1463_v17  ;;  %v1604_v26 = vld [vmem:[#allocation2 + $0xcc] sm:$0xf]  ;;  %844 = vmatmul.bf16.vlgmr.msra.gmra.mxu1 %v1776_v15  ;;  %v1174_v30 = vor.u32 %v1608_v22, %v1173_v21  ;;  %v1311_v9 = vld [vmem:[#allocation2 + $0x1f0] sm:$0xf0]  ;;  %v1310_v16 = vor.u32 %v1641_v3, %v1309_v2 }
  0x2d   :  { %879 = vmatpush.bf16.msrb.mxu0 %v1270_v52  ;;  %907 = vmatpush.bf16.msrb.mxu2 %v1274_v54  ;;  %v1672_v25 = vld [vmem:[#allocation2 + $0x2e4] sm:$0xf0]  ;;  %v1175_v27 = vld [vmem:[#allocation2 + $0xe8] sm:$0xf0]  ;;  %v1701_v12 = vld [vmem:[#allocation2 + $0x3d4] sm:$0xf] }
  0x2e   :  { %v1668_v28 = vld [vmem:[#allocation2 + $0x2cc] sm:$0xf]  ;;  %v1430_v31 = vor.u32 %v1672_v25, %v1429_v23  ;;  %v1178_v32 = vor.u32 %v1604_v26, %v1175_v27  ;;  %v1141_v33 = vld [vmem:[#allocation2 + $0x88] sm:$0xf]  ;;  %v1567_v13 = vld [vmem:[#allocation2 + $0x3f0] sm:$0xf0] }
  0x2f   :  { %893 = vmatpush.bf16.msrb.mxu1 %v1526_v53  ;;  %921 = vmatpush.bf16.msrb.mxu3 %v1530_v58  ;;  %v1431_v29 = vld [vmem:[#allocation2 + $0x2e8] sm:$0xf0]  ;;  %v1600_v34 = vld [vmem:[#allocation2 + $0xa4] sm:$0xf0]  ;;  %v1533_v21 = vld [vmem:[#allocation2 + $0x390] sm:$0xf]  ;;  %v1570_v22 = vor.u32 %v1701_v12, %v1567_v13 }
  0x30   :  { %v1397_v35 = vld [vmem:[#allocation2 + $0x288] sm:$0xf]  ;;  %v1434_v36 = vor.u32 %v1668_v28, %v1431_v29  ;;  %v1596_v38 = vld [vmem:[#allocation2 + $0x8c] sm:$0xf]  ;;  %v1142_v42 = vor.u32 %v1600_v34, %v1141_v33  ;;  %v1697_v23 = vld [vmem:[#allocation2 + $0x3ac] sm:$0xf0] }
  0x31   :  { %880 = vmatpush.bf16.msrb.mxu0 %v1238_v1  ;;  %908 = vmatpush.bf16.msrb.mxu2 %v1242_v6  ;;  %v1664_v37 = vld [vmem:[#allocation2 + $0x2a4] sm:$0xf0]  ;;  %v1143_v39 = vld [vmem:[#allocation2 + $0xa8] sm:$0xf0]  ;;  %v1705_v6 = vld [vmem:[#allocation2 + $0x3ec] sm:$0xf0]  ;;  %v1534_v29 = vor.u32 %v1697_v23, %v1533_v21 }
  0x32   :  { %v1660_v40 = vld [vmem:[#allocation2 + $0x28c] sm:$0xf]  ;;  %v1398_v43 = vor.u32 %v1664_v37, %v1397_v35  ;;  %v1146_v44 = vor.u32 %v1596_v38, %v1143_v39  ;;  %v1109_v45 = vld [vmem:[#allocation2 + $0x48] sm:$0xf]  ;;  %v1566_v17 = vor.u32 %v1705_v6, %v1565_v4  ;;  %v1279_v25 = vld [vmem:[#allocation2 + $0x1b0] sm:$0xf0] }
  0x33   :  { %894 = vmatpush.bf16.msrb.mxu1 %v1494_v5  ;;  %922 = vmatpush.bf16.msrb.mxu3 %v1498_v11  ;;  %v1399_v41 = vld [vmem:[#allocation2 + $0x2a8] sm:$0xf0]  ;;  %v1592_v46 = vld [vmem:[#allocation2 + $0x64] sm:$0xf0]  ;;  %v1693_v26 = vld [vmem:[#allocation2 + $0x394] sm:$0xf] }
  0x34   :  { %v1365_v47 = vld [vmem:[#allocation2 + $0x248] sm:$0xf]  ;;  %v1402_v48 = vor.u32 %v1660_v40, %v1399_v41  ;;  %v1588_v50 = vld [vmem:[#allocation2 + $0x4c] sm:$0xf]  ;;  %v1110_v54 = vor.u32 %v1592_v46, %v1109_v45  ;;  %v1535_v27 = vld [vmem:[#allocation2 + $0x3b0] sm:$0xf0] }
  0x35   :  { %881 = vmatpush.bf16.msrb.mxu0 %v1206_v18  ;;  %909 = vmatpush.bf16.msrb.mxu2 %v1210_v20  ;;  %v1656_v49 = vld [vmem:[#allocation2 + $0x264] sm:$0xf0]  ;;  %v1111_v51 = vld [vmem:[#allocation2 + $0x68] sm:$0xf0]  ;;  %v1314_v18 = vor.u32 %v1637_v7, %v1311_v9  ;;  %v1633_v20 = vld [vmem:[#allocation2 + $0x1ac] sm:$0xf0]  ;;  %v1538_v34 = vor.u32 %v1693_v26, %v1535_v27 }
  0x36   :  { %v1652_v52 = vld [vmem:[#allocation2 + $0x24c] sm:$0xf]  ;;  %v1077_v55 = vld [vmem:[#allocation2 + $0x8] sm:$0xf]  ;;  %v1366_v57 = vor.u32 %v1656_v49, %v1365_v47  ;;  %v1114_v58 = vor.u32 %v1588_v50, %v1111_v51  ;;  %v1501_v33 = vld [vmem:[#allocation2 + $0x350] sm:$0xf] }
  0x37   :  { %895 = vmatpush.bf16.msrb.mxu1 %v1462_v19  ;;  %923 = vmatpush.bf16.msrb.mxu3 %v1466_v24  ;;  %v1367_v53 = vld [vmem:[#allocation2 + $0x268] sm:$0xf0]  ;;  %v1584_v56 = vld [vmem:[#allocation2 + $0x24] sm:$0xf0]  ;;  %v1277_v19 = vld [vmem:[#allocation2 + $0x190] sm:$0xf] }
  0x38   :  { %v1333_v59 = vld [vmem:[#allocation2 + $0x208] sm:$0xf]  ;;  %v1580_v61 = vld [vmem:[#allocation2 + $0xc] sm:$0xf]  ;;  %v1370_v62 = vor.u32 %v1652_v52, %v1367_v53  ;;  %v1078_v5 = vor.u32 %v1584_v56, %v1077_v55  ;;  %v1629_v24 = vld [vmem:[#allocation2 + $0x194] sm:$0xf]  ;;  %v1278_v28 = vor.u32 %v1633_v20, %v1277_v19 }
  0x39   :  { %882 = vmatpush.bf16.msrb.mxu0 %v1174_v30  ;;  %910 = vmatpush.bf16.msrb.mxu2 %v1178_v32  ;;  %v1648_v60 = vld [vmem:[#allocation2 + $0x224] sm:$0xf0]  ;;  %v1079_v63 = vld [vmem:[#allocation2 + $0x28] sm:$0xf0]  ;;  %v1282_v30 = vor.u32 %v1629_v24, %v1279_v25  ;;  %v1625_v32 = vld [vmem:[#allocation2 + $0x16c] sm:$0xf0] }
  0x3a   :  { %v1644_v0 = vld [vmem:[#allocation2 + $0x20c] sm:$0xf]  ;;  %v1334_v10 = vor.u32 %v1648_v60, %v1333_v59  ;;  %v1082_v11 = vor.u32 %v1580_v61, %v1079_v63  ;;  %v1689_v35 = vld [vmem:[#allocation2 + $0x36c] sm:$0xf0]  ;;  %v1247_v37 = vld [vmem:[#allocation2 + $0x170] sm:$0xf0] }
  0x3b   :  { %896 = vmatpush.bf16.msrb.mxu1 %v1430_v31  ;;  %924 = vmatpush.bf16.msrb.mxu3 %v1434_v36  ;;  %v1335_v1 = vld [vmem:[#allocation2 + $0x228] sm:$0xf0]  ;;  %v1245_v31 = vld [vmem:[#allocation2 + $0x150] sm:$0xf]  ;;  %v1621_v36 = vld [vmem:[#allocation2 + $0x154] sm:$0xf]  ;;  %v1502_v41 = vor.u32 %v1689_v35, %v1501_v33 }
  0x3c   :  { %v1338_v14 = vor.u32 %v1644_v0, %v1335_v1  ;;  %v1685_v38 = vld [vmem:[#allocation2 + $0x354] sm:$0xf]  ;;  %v1246_v40 = vor.u32 %v1625_v32, %v1245_v31  ;;  %v1469_v45 = vld [vmem:[#allocation2 + $0x310] sm:$0xf] }
  0x3d   :  { %883 = vmatpush.bf16.msrb.mxu0 %v1142_v42  ;;  %911 = vmatpush.bf16.msrb.mxu2 %v1146_v44  ;;  %v1503_v39 = vld [vmem:[#allocation2 + $0x370] sm:$0xf0]  ;;  %v1250_v42 = vor.u32 %v1621_v36, %v1247_v37  ;;  %v1617_v44 = vld [vmem:[#allocation2 + $0x12c] sm:$0xf0] }
  0x3e   :  { %v1506_v46 = vor.u32 %v1685_v38, %v1503_v39  ;;  %v1681_v47 = vld [vmem:[#allocation2 + $0x32c] sm:$0xf0]  ;;  %v1215_v49 = vld [vmem:[#allocation2 + $0x130] sm:$0xf0]  ;;  %v1317_v38 = vld [vmem:[#allocation2 + $0x1d8] sm:$0xf] }
  0x3f   :  { %897 = vmatpush.bf16.msrb.mxu1 %v1398_v43  ;;  %925 = vmatpush.bf16.msrb.mxu3 %v1402_v48  ;;  %v1213_v43 = vld [vmem:[#allocation2 + $0x110] sm:$0xf]  ;;  %v1613_v48 = vld [vmem:[#allocation2 + $0x114] sm:$0xf]  ;;  %v1470_v53 = vor.u32 %v1681_v47, %v1469_v45  ;;  %v1642_v39 = vld [vmem:[#allocation2 + $0x1f4] sm:$0xf0] }
  0x40   :  { %v1677_v50 = vld [vmem:[#allocation2 + $0x314] sm:$0xf]  ;;  %v1214_v52 = vor.u32 %v1617_v44, %v1213_v43  ;;  %v1181_v55 = vld [vmem:[#allocation2 + $0xd0] sm:$0xf]  ;;  %v1638_v43 = vld [vmem:[#allocation2 + $0x1dc] sm:$0xf] }
  0x41   :  { %884 = vmatpush.bf16.msrb.mxu0 %v1110_v54  ;;  %912 = vmatpush.bf16.msrb.mxu2 %v1114_v58  ;;  %v1471_v51 = vld [vmem:[#allocation2 + $0x330] sm:$0xf0]  ;;  %v1218_v54 = vor.u32 %v1613_v48, %v1215_v49  ;;  %v1609_v56 = vld [vmem:[#allocation2 + $0xec] sm:$0xf0]  ;;  %v1319_v44 = vld [vmem:[#allocation2 + $0x1f8] sm:$0xf0] }
  0x42   :  { %v1474_v58 = vor.u32 %v1677_v50, %v1471_v51  ;;  %v1673_v59 = vld [vmem:[#allocation2 + $0x2ec] sm:$0xf0]  ;;  %v1605_v60 = vld [vmem:[#allocation2 + $0xd4] sm:$0xf]  ;;  %v1182_v0 = vor.u32 %v1609_v56, %v1181_v55  ;;  %v1702_v47 = vld [vmem:[#allocation2 + $0x3dc] sm:$0xf]  ;;  %v1318_v50 = vor.u32 %v1642_v39, %v1317_v38 }
  0x43   :  { %898 = vmatpush.bf16.msrb.mxu1 %v1366_v57  ;;  %926 = vmatpush.bf16.msrb.mxu3 %v1370_v62  ;;  %v1437_v57 = vld [vmem:[#allocation2 + $0x2d0] sm:$0xf]  ;;  %v1183_v61 = vld [vmem:[#allocation2 + $0xf0] sm:$0xf0]  ;;  %v1575_v48 = vld [vmem:[#allocation2 + $0x3f8] sm:$0xf0] }
  0x44   :  { %v1669_v62 = vld [vmem:[#allocation2 + $0x2d4] sm:$0xf]  ;;  %v1438_v1 = vor.u32 %v1673_v59, %v1437_v57  ;;  %v1186_v2 = vor.u32 %v1605_v60, %v1183_v61  ;;  %v1149_v3 = vld [vmem:[#allocation2 + $0x90] sm:$0xf]  ;;  %v1541_v55 = vld [vmem:[#allocation2 + $0x398] sm:$0xf]  ;;  %v1578_v56 = vor.u32 %v1702_v47, %v1575_v48 }
  0x45   :  { %885 = vmatpush.bf16.msrb.mxu0 %v1078_v5  ;;  %913 = vmatpush.bf16.msrb.mxu2 %v1082_v11  ;;  %v1439_v63 = vld [vmem:[#allocation2 + $0x2f0] sm:$0xf0]  ;;  %v1601_v4 = vld [vmem:[#allocation2 + $0xac] sm:$0xf0]  ;;  %v1698_v57 = vld [vmem:[#allocation2 + $0x3b4] sm:$0xf0] }
  0x46   :  { %v1405_v5 = vld [vmem:[#allocation2 + $0x290] sm:$0xf]  ;;  %v1442_v6 = vor.u32 %v1669_v62, %v1439_v63  ;;  %v1597_v9 = vld [vmem:[#allocation2 + $0x94] sm:$0xf]  ;;  %v1150_v13 = vor.u32 %v1601_v4, %v1149_v3  ;;  %v1287_v59 = vld [vmem:[#allocation2 + $0x1b8] sm:$0xf0]  ;;  %v1542_v63 = vor.u32 %v1698_v57, %v1541_v55 }
  0x47   :  { %899 = vmatpush.bf16.msrb.mxu1 %v1334_v10  ;;  %927 = vmatpush.bf16.msrb.mxu3 %v1338_v14  ;;  %v1665_v7 = vld [vmem:[#allocation2 + $0x2ac] sm:$0xf0]  ;;  %v1151_v10 = vld [vmem:[#allocation2 + $0xb0] sm:$0xf0]  ;;  %v1694_v60 = vld [vmem:[#allocation2 + $0x39c] sm:$0xf] }
  0x48   :  { %914 = vmatmul.bf16.vlgmr.msrb.gmra.mxu2 %v1768_v8  ;;  %886 = vmatmul.bf16.vlgmr.msrb.gmra.mxu0 %v1768_v8  ;;  %v1661_v11 = vld [vmem:[#allocation2 + $0x294] sm:$0xf]  ;;  %v1406_v14 = vor.u32 %v1665_v7, %v1405_v5  ;;  %v1373_v19 = vld [vmem:[#allocation2 + $0x250] sm:$0xf]  ;;  %v1543_v61 = vld [vmem:[#allocation2 + $0x3b8] sm:$0xf0] }
  0x49   :  { %934 = vmatpush.bf16.msra.mxu0 %v1310_v16  ;;  %962 = vmatpush.bf16.msra.mxu2 %v1314_v18  ;;  %v1407_v12 = vld [vmem:[#allocation2 + $0x2b0] sm:$0xf0]  ;;  %v1154_v16 = vor.u32 %v1597_v9, %v1151_v10  ;;  %v1593_v18 = vld [vmem:[#allocation2 + $0x6c] sm:$0xf0]  ;;  %v1509_v3 = vld [vmem:[#allocation2 + $0x358] sm:$0xf]  ;;  %v1546_v4 = vor.u32 %v1694_v60, %v1543_v61 }
  0x4a   :  { %928 = vmatmul.bf16.vlgmr.msrb.gmra.mxu3 %v1776_v15  ;;  %900 = vmatmul.bf16.vlgmr.msrb.gmra.mxu1 %v1776_v15  ;;  %v1410_v20 = vor.u32 %v1661_v11, %v1407_v12  ;;  %v1657_v21 = vld [vmem:[#allocation2 + $0x26c] sm:$0xf0]  ;;  %v1119_v23 = vld [vmem:[#allocation2 + $0x70] sm:$0xf0]  ;;  %v1690_v5 = vld [vmem:[#allocation2 + $0x374] sm:$0xf0] }
  0x4b   :  { %948 = vmatpush.bf16.msra.mxu1 %v1566_v17  ;;  %976 = vmatpush.bf16.msra.mxu3 %v1570_v22  ;;  %v1117_v17 = vld [vmem:[#allocation2 + $0x50] sm:$0xf]  ;;  %v1589_v22 = vld [vmem:[#allocation2 + $0x54] sm:$0xf]  ;;  %v1255_v7 = vld [vmem:[#allocation2 + $0x178] sm:$0xf0]  ;;  %v1510_v12 = vor.u32 %v1690_v5, %v1509_v3 }
  0x4c   :  { %v1653_v24 = vld [vmem:[#allocation2 + $0x254] sm:$0xf]  ;;  %v1118_v26 = vor.u32 %v1593_v18, %v1117_v17  ;;  %v1085_v27 = vld [vmem:[#allocation2 + $0x10] sm:$0xf]  ;;  %v1686_v9 = vld [vmem:[#allocation2 + $0x35c] sm:$0xf] }
  0x4d   :  { %935 = vmatpush.bf16.msra.mxu0 %v1278_v28  ;;  %963 = vmatpush.bf16.msra.mxu2 %v1282_v30  ;;  %v1375_v25 = vld [vmem:[#allocation2 + $0x270] sm:$0xf0]  ;;  %v1585_v28 = vld [vmem:[#allocation2 + $0x2c] sm:$0xf0]  ;;  %v1122_v30 = vor.u32 %v1589_v22, %v1119_v23  ;;  %v1511_v10 = vld [vmem:[#allocation2 + $0x378] sm:$0xf0] }
  0x4e   :  { %v1341_v31 = vld [vmem:[#allocation2 + $0x210] sm:$0xf]  ;;  %v1581_v33 = vld [vmem:[#allocation2 + $0x14] sm:$0xf]  ;;  %v1477_v17 = vld [vmem:[#allocation2 + $0x318] sm:$0xf]  ;;  %v1514_v18 = vor.u32 %v1686_v9, %v1511_v10 }
  0x4f   :  { %949 = vmatpush.bf16.msra.mxu1 %v1534_v29  ;;  %977 = vmatpush.bf16.msra.mxu3 %v1538_v34  ;;  %v1374_v29 = vor.u32 %v1657_v21, %v1373_v19  ;;  %v1649_v32 = vld [vmem:[#allocation2 + $0x22c] sm:$0xf0]  ;;  %v1378_v34 = vor.u32 %v1653_v24, %v1375_v25  ;;  %v1087_v35 = vld [vmem:[#allocation2 + $0x30] sm:$0xf0]  ;;  %v1682_v19 = vld [vmem:[#allocation2 + $0x334] sm:$0xf0] }
  0x50   :  { %v1645_v36 = vld [vmem:[#allocation2 + $0x214] sm:$0xf]  ;;  %v1342_v45 = vor.u32 %v1649_v32, %v1341_v31  ;;  %v1223_v21 = vld [vmem:[#allocation2 + $0x138] sm:$0xf0]  ;;  %v1478_v25 = vor.u32 %v1682_v19, %v1477_v17  ;;  %v1674_v31 = vld [vmem:[#allocation2 + $0x2f4] sm:$0xf0] }
  0x51   :  { %936 = vmatpush.bf16.msra.mxu0 %v1246_v40  ;;  %964 = vmatpush.bf16.msra.mxu2 %v1250_v42  ;;  %v1343_v37 = vld [vmem:[#allocation2 + $0x230] sm:$0xf0]  ;;  %v1573_v40 = vld [vmem:[#allocation2 + $0x3d8] sm:$0xf]  ;;  %v1678_v22 = vld [vmem:[#allocation2 + $0x31c] sm:$0xf] }
  0x52   :  { %v1706_v42 = vld [vmem:[#allocation2 + $0x3f4] sm:$0xf0]  ;;  %v1346_v49 = vor.u32 %v1645_v36, %v1343_v37  ;;  %v1479_v23 = vld [vmem:[#allocation2 + $0x338] sm:$0xf0] }
  0x53   :  { %950 = vmatpush.bf16.msra.mxu1 %v1502_v41  ;;  %978 = vmatpush.bf16.msra.mxu3 %v1506_v46  ;;  %v1086_v41 = vor.u32 %v1585_v28, %v1085_v27  ;;  %v1090_v46 = vor.u32 %v1581_v33, %v1087_v35  ;;  %v1574_v51 = vor.u32 %v1706_v42, %v1573_v40  ;;  %v1189_v27 = vld [vmem:[#allocation2 + $0xd8] sm:$0xf]  ;;  %v1606_v32 = vld [vmem:[#allocation2 + $0xdc] sm:$0xf] }
  0x54   :  { %v1610_v28 = vld [vmem:[#allocation2 + $0xf4] sm:$0xf0]  ;;  %v1191_v33 = vld [vmem:[#allocation2 + $0xf8] sm:$0xf0] }
  0x55   :  { %937 = vmatpush.bf16.msra.mxu0 %v1214_v52  ;;  %965 = vmatpush.bf16.msra.mxu2 %v1218_v54  ;;  %v1322_v52 = vor.u32 %v1638_v43, %v1319_v44  ;;  %v1634_v54 = vld [vmem:[#allocation2 + $0x1b4] sm:$0xf0]  ;;  %v1447_v35 = vld [vmem:[#allocation2 + $0x2f8] sm:$0xf0]  ;;  %v1190_v36 = vor.u32 %v1610_v28, %v1189_v27  ;;  %v1194_v38 = vor.u32 %v1606_v32, %v1191_v33 }
  0x56   :  { %v1157_v39 = vld [vmem:[#allocation2 + $0x98] sm:$0xf]  ;;  %v1598_v44 = vld [vmem:[#allocation2 + $0x9c] sm:$0xf] }
  0x57   :  { %951 = vmatpush.bf16.msra.mxu1 %v1470_v53  ;;  %979 = vmatpush.bf16.msra.mxu3 %v1474_v58  ;;  %v1285_v53 = vld [vmem:[#allocation2 + $0x198] sm:$0xf]  ;;  %v1630_v58 = vld [vmem:[#allocation2 + $0x19c] sm:$0xf] }
  0x58   :  { %v1286_v62 = vor.u32 %v1634_v54, %v1285_v53  ;;  %v1602_v40 = vld [vmem:[#allocation2 + $0xb4] sm:$0xf0]  ;;  %v1415_v47 = vld [vmem:[#allocation2 + $0x2b8] sm:$0xf0] }
  0x59   :  { %938 = vmatpush.bf16.msra.mxu0 %v1182_v0  ;;  %966 = vmatpush.bf16.msra.mxu2 %v1186_v2  ;;  %v1290_v0 = vor.u32 %v1630_v58, %v1287_v59  ;;  %v1626_v2 = vld [vmem:[#allocation2 + $0x174] sm:$0xf0]  ;;  %v1158_v48 = vor.u32 %v1602_v40, %v1157_v39  ;;  %v1127_v57 = vld [vmem:[#allocation2 + $0x78] sm:$0xf0] }
  0x5a   :  { %v1666_v43 = vld [vmem:[#allocation2 + $0x2b4] sm:$0xf0]  ;;  %v1654_v58 = vld [vmem:[#allocation2 + $0x25c] sm:$0xf] }
  0x5b   :  { %952 = vmatpush.bf16.msra.mxu1 %v1438_v1  ;;  %980 = vmatpush.bf16.msra.mxu3 %v1442_v6  ;;  %v1253_v1 = vld [vmem:[#allocation2 + $0x158] sm:$0xf]  ;;  %v1622_v6 = vld [vmem:[#allocation2 + $0x15c] sm:$0xf] }
  0x5c   :  { %v1254_v11 = vor.u32 %v1626_v2, %v1253_v1  ;;  %v1381_v53 = vld [vmem:[#allocation2 + $0x258] sm:$0xf]  ;;  %v1383_v59 = vld [vmem:[#allocation2 + $0x278] sm:$0xf0] }
  0x5d   :  { %939 = vmatpush.bf16.msra.mxu0 %v1150_v13  ;;  %967 = vmatpush.bf16.msra.mxu2 %v1154_v16  ;;  %v1258_v13 = vor.u32 %v1622_v6, %v1255_v7  ;;  %v1618_v16 = vld [vmem:[#allocation2 + $0x134] sm:$0xf0]  ;;  %v1386_v2 = vor.u32 %v1654_v58, %v1383_v59  ;;  %v1095_v5 = vld [vmem:[#allocation2 + $0x38] sm:$0xf0] }
  0x5e   :  { %v1658_v55 = vld [vmem:[#allocation2 + $0x274] sm:$0xf0]  ;;  %v1646_v6 = vld [vmem:[#allocation2 + $0x21c] sm:$0xf] }
  0x5f   :  { %953 = vmatpush.bf16.msra.mxu1 %v1406_v14  ;;  %981 = vmatpush.bf16.msra.mxu3 %v1410_v20  ;;  %v1221_v14 = vld [vmem:[#allocation2 + $0x118] sm:$0xf]  ;;  %v1614_v20 = vld [vmem:[#allocation2 + $0x11c] sm:$0xf]  ;;  %v1382_v61 = vor.u32 %v1658_v55, %v1381_v53 }
  0x60   :  { %v1222_v24 = vor.u32 %v1618_v16, %v1221_v14  ;;  %v1349_v1 = vld [vmem:[#allocation2 + $0x218] sm:$0xf]  ;;  %v1351_v7 = vld [vmem:[#allocation2 + $0x238] sm:$0xf0] }
  0x61   :  { %940 = vmatpush.bf16.msra.mxu0 %v1118_v26  ;;  %968 = vmatpush.bf16.msra.mxu2 %v1122_v30  ;;  %v1226_v26 = vor.u32 %v1614_v20, %v1223_v21  ;;  %v1482_v30 = vor.u32 %v1678_v22, %v1479_v23  ;;  %v1650_v3 = vld [vmem:[#allocation2 + $0x234] sm:$0xf0] }
  0x62   :  { %v1350_v10 = vor.u32 %v1650_v3, %v1349_v1 }
  0x63   :  { %954 = vmatpush.bf16.msra.mxu1 %v1374_v29  ;;  %982 = vmatpush.bf16.msra.mxu3 %v1378_v34  ;;  %v1445_v29 = vld [vmem:[#allocation2 + $0x2d8] sm:$0xf]  ;;  %v1670_v34 = vld [vmem:[#allocation2 + $0x2dc] sm:$0xf] }
  0x64   :  { %v1446_v37 = vor.u32 %v1674_v31, %v1445_v29  ;;  %v1450_v42 = vor.u32 %v1670_v34, %v1447_v35 }
  0x65   :  { %941 = vmatpush.bf16.msra.mxu0 %v1086_v41  ;;  %969 = vmatpush.bf16.msra.mxu2 %v1090_v46  ;;  %v1413_v41 = vld [vmem:[#allocation2 + $0x298] sm:$0xf]  ;;  %v1662_v46 = vld [vmem:[#allocation2 + $0x29c] sm:$0xf] }
  0x66   :  { %v1418_v54 = vor.u32 %v1662_v46, %v1415_v47 }
  0x67   :  { %955 = vmatpush.bf16.msra.mxu1 %v1342_v45  ;;  %983 = vmatpush.bf16.msra.mxu3 %v1346_v49  ;;  %v1159_v45 = vld [vmem:[#allocation2 + $0xb8] sm:$0xf0]  ;;  %v1414_v49 = vor.u32 %v1666_v43, %v1413_v41 }
  0x68   :  { %970 = vmatmul.bf16.vlgmr.msra.gmra.mxu2 %v1768_v8  ;;  %942 = vmatmul.bf16.vlgmr.msra.gmra.mxu0 %v1768_v8 }
  0x69   :  { %990 = vmatpush.bf16.msrb.mxu0 %v1318_v50  ;;  %1018 = vmatpush.bf16.msrb.mxu2 %v1322_v52  ;;  %v1162_v50 = vor.u32 %v1598_v44, %v1159_v45  ;;  %v1594_v52 = vld [vmem:[#allocation2 + $0x74] sm:$0xf0] }
  0x6a   :  { %984 = vmatmul.bf16.vlgmr.msra.gmra.mxu3 %v1776_v15  ;;  %956 = vmatmul.bf16.vlgmr.msra.gmra.mxu1 %v1776_v15 }
  0x6b   :  { %1004 = vmatpush.bf16.msrb.mxu1 %v1574_v51  ;;  %1032 = vmatpush.bf16.msrb.mxu3 %v1578_v56  ;;  %v1125_v51 = vld [vmem:[#allocation2 + $0x58] sm:$0xf]  ;;  %v1590_v56 = vld [vmem:[#allocation2 + $0x5c] sm:$0xf] }
  0x6c   :  { %v1126_v60 = vor.u32 %v1594_v52, %v1125_v51 }
  0x6d   :  { %991 = vmatpush.bf16.msrb.mxu0 %v1286_v62  ;;  %1019 = vmatpush.bf16.msrb.mxu2 %v1290_v0  ;;  %v1130_v62 = vor.u32 %v1590_v56, %v1127_v57  ;;  %v1586_v0 = vld [vmem:[#allocation2 + $0x34] sm:$0xf0] }
  0x6f   :  { %1005 = vmatpush.bf16.msrb.mxu1 %v1542_v63  ;;  %1033 = vmatpush.bf16.msrb.mxu3 %v1546_v4  ;;  %v1093_v63 = vld [vmem:[#allocation2 + $0x18] sm:$0xf]  ;;  %v1582_v4 = vld [vmem:[#allocation2 + $0x1c] sm:$0xf] }
  0x70   :  { %v1094_v9 = vor.u32 %v1586_v0, %v1093_v63 }
  0x71   :  { %992 = vmatpush.bf16.msrb.mxu0 %v1254_v11  ;;  %1020 = vmatpush.bf16.msrb.mxu2 %v1258_v13  ;;  %v1098_v11 = vor.u32 %v1582_v4, %v1095_v5  ;;  %v1797_v13 = vld [vmem:[%s1857_s2] sm:$0xff] }
  0x72   :  { %v166_v14 = vperm.slane %v1797_v13, 0  ;;  %v168_v31 = vperm.slane %v1797_v13, 2  ;;  %v169_v35 = vperm.slane %v1797_v13, 3  ;;  %v171_v53 = vperm.slane %v1797_v13, 5 }
  0x73   :  { %1006 = vmatpush.bf16.msrb.mxu1 %v1510_v12  ;;  %1034 = vmatpush.bf16.msrb.mxu3 %v1514_v18  ;;  %v1354_v12 = vor.u32 %v1646_v6, %v1351_v7  ;;  %v167_v18 = vperm.slane %v1797_v13, 1  ;;  %v172_v3 = vperm.slane %v1797_v13, 6 }
  0x75   :  { %993 = vmatpush.bf16.msrb.mxu0 %v1222_v24  ;;  %1021 = vmatpush.bf16.msrb.mxu2 %v1226_v26 }
  0x77   :  { %1007 = vmatpush.bf16.msrb.mxu1 %v1478_v25  ;;  %1035 = vmatpush.bf16.msrb.mxu3 %v1482_v30 }
  0x79   :  { %994 = vmatpush.bf16.msrb.mxu0 %v1190_v36  ;;  %1022 = vmatpush.bf16.msrb.mxu2 %v1194_v38 }
  0x7b   :  { %1008 = vmatpush.bf16.msrb.mxu1 %v1446_v37  ;;  %1036 = vmatpush.bf16.msrb.mxu3 %v1450_v42 }
  0x7d   :  { %995 = vmatpush.bf16.msrb.mxu0 %v1158_v48  ;;  %1023 = vmatpush.bf16.msrb.mxu2 %v1162_v50 }
  0x7f   :  { %1009 = vmatpush.bf16.msrb.mxu1 %v1414_v49  ;;  %1037 = vmatpush.bf16.msrb.mxu3 %v1418_v54  ;;  %v170_v49 = vperm.slane %v1797_v13, 4 }
  0x81   :  { %996 = vmatpush.bf16.msrb.mxu0 %v1126_v60  ;;  %1024 = vmatpush.bf16.msrb.mxu2 %v1130_v62 }
  0x83   :  { %1010 = vmatpush.bf16.msrb.mxu1 %v1382_v61  ;;  %1038 = vmatpush.bf16.msrb.mxu3 %v1386_v2 }
  0x85   :  { %997 = vmatpush.bf16.msrb.mxu0 %v1094_v9  ;;  %1025 = vmatpush.bf16.msrb.mxu2 %v1098_v11  ;;  %v173_v9 = vperm.slane %v1797_v13, 7 }
  0x87   :  { %1011 = vmatpush.bf16.msrb.mxu1 %v1350_v10  ;;  %1039 = vmatpush.bf16.msrb.mxu3 %v1354_v12 }
  0x88   :  { %998 = vmatmul.bf16.vlgmr.msrb.gmra.mxu0 %v1768_v8  ;;  %1026 = vmatmul.bf16.vlgmr.msrb.gmra.mxu2 %v1768_v8 }
  0x8a   :  { %1012 = vmatmul.bf16.vlgmr.msrb.gmra.mxu1 %v1776_v15  ;;  %1040 = vmatmul.bf16.vlgmr.msrb.gmra.mxu3 %v1776_v15 }
  0xa7   :  { %v831_v16 = vpop.f32.mrf.mxu0 }
  0xa8   :  { %v832_v17 = vadd.f32 %v831_v16, %v166_v14 }
  0xa9   :  { %v845_v19 = vpop.f32.mrf.mxu1 }
  0xaa   :  { %v846_v20 = vadd.f32 %v845_v19, %v832_v17 }
  0xac   :  { %1046 = vst [vmem:[%s1858_s3] sm:$0xff] %v846_v20 }
  0xad   :  { %v859_v21 = vpop.f32.mrf.mxu2 }
  0xae   :  { %v860_v8 = vadd.f32 %v859_v21, %v167_v18 }
  0xaf   :  { %v873_v15 = vpop.f32.mrf.mxu3  ;;  %v833_v22 = vpop.f32.mrf.mxu0 }
  0xb0   :  { %v874_v23 = vadd.f32 %v873_v15, %v860_v8  ;;  %v834_v24 = vadd.f32 %v833_v22, %v166_v14 }
  0xb1   :  { %v847_v25 = vpop.f32.mrf.mxu1 }
  0xb2   :  { %1047 = vst [vmem:[%s1858_s3 + $0x8] sm:$0xff] %v874_v23  ;;  %v848_v26 = vadd.f32 %v847_v25, %v834_v24 }
  0xb4   :  { %1054 = vst [vmem:[%s1858_s3 + $0x40] sm:$0xff] %v848_v26 }
  0xb5   :  { %v861_v27 = vpop.f32.mrf.mxu2 }
  0xb6   :  { %v862_v28 = vadd.f32 %v861_v27, %v167_v18 }
  0xb7   :  { %v875_v29 = vpop.f32.mrf.mxu3 }
  0xb8   :  { %v876_v30 = vadd.f32 %v875_v29, %v862_v28 }
  0xba   :  { %1055 = vst [vmem:[%s1858_s3 + $0x48] sm:$0xff] %v876_v30 }
  0xc5   :  { %v887_v32 = vpop.f32.mrf.mxu0 }
  0xc6   :  { %v888_v33 = vadd.f32 %v887_v32, %v168_v31 }
  0xc7   :  { %v901_v34 = vpop.f32.mrf.mxu1 }
  0xc8   :  { %v902_v36 = vadd.f32 %v901_v34, %v888_v33 }
  0xca   :  { %1048 = vst [vmem:[%s1858_s3 + $0x10] sm:$0xff] %v902_v36 }
  0xcb   :  { %v915_v37 = vpop.f32.mrf.mxu2 }
  0xcc   :  { %v916_v38 = vadd.f32 %v915_v37, %v169_v35 }
  0xcd   :  { %v929_v39 = vpop.f32.mrf.mxu3  ;;  %v889_v41 = vpop.f32.mrf.mxu0 }
  0xce   :  { %v930_v40 = vadd.f32 %v929_v39, %v916_v38  ;;  %v890_v42 = vadd.f32 %v889_v41, %v168_v31 }
  0xcf   :  { %v903_v43 = vpop.f32.mrf.mxu1 }
  0xd0   :  { %1049 = vst [vmem:[%s1858_s3 + $0x18] sm:$0xff] %v930_v40  ;;  %v904_v44 = vadd.f32 %v903_v43, %v890_v42 }
  0xd2   :  { %1056 = vst [vmem:[%s1858_s3 + $0x50] sm:$0xff] %v904_v44 }
  0xd3   :  { %v917_v45 = vpop.f32.mrf.mxu2 }
  0xd4   :  { %v918_v46 = vadd.f32 %v917_v45, %v169_v35 }
  0xd5   :  { %v931_v47 = vpop.f32.mrf.mxu3 }
  0xd6   :  { %v932_v48 = vadd.f32 %v931_v47, %v918_v46 }
  0xd8   :  { %1057 = vst [vmem:[%s1858_s3 + $0x58] sm:$0xff] %v932_v48 }
  0xe5   :  { %v943_v50 = vpop.f32.mrf.mxu0 }
  0xe6   :  { %v944_v51 = vadd.f32 %v943_v50, %v170_v49 }
  0xe7   :  { %v957_v52 = vpop.f32.mrf.mxu1 }
  0xe8   :  { %v958_v54 = vadd.f32 %v957_v52, %v944_v51 }
  0xea   :  { %1050 = vst [vmem:[%s1858_s3 + $0x20] sm:$0xff] %v958_v54 }
  0xeb   :  { %v971_v55 = vpop.f32.mrf.mxu2 }
  0xec   :  { %v972_v56 = vadd.f32 %v971_v55, %v171_v53 }
  0xed   :  { %v985_v57 = vpop.f32.mrf.mxu3  ;;  %v945_v59 = vpop.f32.mrf.mxu0 }
  0xee   :  { %v986_v58 = vadd.f32 %v985_v57, %v972_v56  ;;  %v946_v60 = vadd.f32 %v945_v59, %v170_v49 }
  0xef   :  { %v959_v61 = vpop.f32.mrf.mxu1 }
  0xf0   :  { %1051 = vst [vmem:[%s1858_s3 + $0x28] sm:$0xff] %v986_v58  ;;  %v960_v62 = vadd.f32 %v959_v61, %v946_v60 }
  0xf2   :  { %1058 = vst [vmem:[%s1858_s3 + $0x60] sm:$0xff] %v960_v62 }
  0xf3   :  { %v973_v63 = vpop.f32.mrf.mxu2 }
  0xf4   :  { %v974_v0 = vadd.f32 %v973_v63, %v171_v53 }
  0xf5   :  { %v987_v1 = vpop.f32.mrf.mxu3 }
  0xf6   :  { %v988_v2 = vadd.f32 %v987_v1, %v974_v0 }
  0xf8   :  { %1059 = vst [vmem:[%s1858_s3 + $0x68] sm:$0xff] %v988_v2 }
 0x105   :  { %v999_v4 = vpop.f32.mrf.mxu0 }
 0x106   :  { %v1000_v5 = vadd.f32 %v999_v4, %v172_v3 }
 0x107   :  { %v1013_v6 = vpop.f32.mrf.mxu1 }
 0x108   :  { %v1014_v7 = vadd.f32 %v1013_v6, %v1000_v5 }
 0x10a   :  { %1052 = vst [vmem:[%s1858_s3 + $0x30] sm:$0xff] %v1014_v7 }
 0x10b   :  { %v1027_v10 = vpop.f32.mrf.mxu2 }
 0x10c   :  { %v1028_v11 = vadd.f32 %v1027_v10, %v173_v9 }
 0x10d   :  { %v1041_v12 = vpop.f32.mrf.mxu3  ;;  %v1001_v14 = vpop.f32.mrf.mxu0 }
 0x10e   :  { %v1002_v16 = vadd.f32 %v1001_v14, %v172_v3  ;;  %v1042_v17 = vadd.f32 %v1041_v12, %v1028_v11 }
 0x10f   :  { %v1015_v18 = vpop.f32.mrf.mxu1 }
 0x110   :  { %v1016_v19 = vadd.f32 %v1015_v18, %v1002_v16  ;;  %1053 = vst [vmem:[%s1858_s3 + $0x38] sm:$0xff] %v1042_v17 }
 0x112   :  { %1060 = vst [vmem:[%s1858_s3 + $0x70] sm:$0xff] %v1016_v19 }
 0x113   :  { %v1029_v13 = vpop.f32.mrf.mxu2 }
 0x114   :  { %v1030_v20 = vadd.f32 %v1029_v13, %v173_v9 }
 0x115   :  { %v1043_v21 = vpop.f32.mrf.mxu3 }
 0x116   :  { %v1044_v8 = vadd.f32 %v1043_v21, %v1030_v20 }
 0x118   :  { %1061 = vst [vmem:[%s1858_s3 + $0x78] sm:$0xff] %v1044_v8 }
 0x119   :  { %1066 = vsyncpa [#allocation3], 1 }

// kernel: lstm_model_forward.9
= control target key start
LH: loop header
LB: loop body
LE: loop exit
PB: predicated region body
PF: predicated region fallthrough
CT: control target
= control target key end

     0   :  { %s400_s0 = inlined_call_operand.vmem [shape: f32[16,256], index: 0, kind: input, shape index: {}]   ;;  %s401_s1 = inlined_call_operand.vmem [shape: bf16[256,128], index: 1, kind: input, shape index: {}]   ;;  %s402_s2 = inlined_call_operand.vmem [shape: f32[1,128], index: 2, kind: input, shape index: {}]   ;;  %s403_s3 = inlined_call_operand.hbm [shape: f32[16,128], index: 3, kind: output, shape index: {}]  }
   0x1   :  { %v272_v0 = vld [vmem:[%s401_s1 + $0x38] sm:$0xff]  ;;  %v271_v2 = vld [vmem:[%s401_s1 + $0x30] sm:$0xff]  ;;  %v270_v4 = vld [vmem:[%s401_s1 + $0x28] sm:$0xff] }
   0x2   :  { %v280_v1 = vld [vmem:[%s401_s1 + $0x78] sm:$0xff]  ;;  %153 = vmatpush.bf16.msra.mxu0 %v272_v0  ;;  %v279_v3 = vld [vmem:[%s401_s1 + $0x70] sm:$0xff]  ;;  %v278_v5 = vld [vmem:[%s401_s1 + $0x68] sm:$0xff] }
   0x3   :  { %167 = vmatpush.bf16.msra.mxu1 %v280_v1 }
   0x6   :  { %154 = vmatpush.bf16.msra.mxu0 %v271_v2 }
   0x7   :  { %168 = vmatpush.bf16.msra.mxu1 %v279_v3 }
   0x8   :  { %8 = vsyncpa [#allocation3], 0  ;;  %v269_v6 = vld [vmem:[%s401_s1 + $0x20] sm:$0xff]  ;;  %v268_v8 = vld [vmem:[%s401_s1 + $0x18] sm:$0xff]  ;;  %s311_s26 = smov [#allocation2]   ;;  %s312_s30 = smov 128  }
   0x9   :  { %v277_v7 = vld [vmem:[%s401_s1 + $0x60] sm:$0xff]  ;;  %v276_v9 = vld [vmem:[%s401_s1 + $0x58] sm:$0xff]  ;;  %v267_v10 = vld [vmem:[%s401_s1 + $0x10] sm:$0xff]  ;;  %s187_s27 = sshll.u32 %s311_s26, 4  ;;  %s188_s27 = int_to_ptr.vmem [resolvable:$true] %s187_s27 }
   0xa   :  { %155 = vmatpush.bf16.msra.mxu0 %v270_v4  ;;  %v275_v11 = vld [vmem:[%s401_s1 + $0x50] sm:$0xff]  ;;  %v266_v12 = vld [vmem:[%s401_s1 + $0x8] sm:$0xff]  ;;  %v265_v14 = vld [vmem:[%s401_s1] sm:$0xff] }
   0xb   :  { %169 = vmatpush.bf16.msra.mxu1 %v278_v5  ;;  %v274_v13 = vld [vmem:[%s401_s1 + $0x48] sm:$0xff]  ;;  %v273_v15 = vld [vmem:[%s401_s1 + $0x40] sm:$0xff]  ;;  %v17_v17 = vld [vmem:[%s400_s0 + $0x10] sm:$0xff] }
   0xc   :  { %v15_v16 = vld [vmem:[%s400_s0] sm:$0xff]  ;;  %v16_v18 = vld [vmem:[%s400_s0 + $0x8] sm:$0xff]  ;;  %v18_v19 = vld [vmem:[%s400_s0 + $0x18] sm:$0xff]  ;;  %s189_s0 = sshll.u32 %s403_s3, 4  ;;  %s190_s0 = int_to_ptr.hbm [resolvable:$true] %s189_s0 }
   0xd   :  { %v19_v20 = vpack.c.bf16 %v17_v17, %v15_v16  ;;  %v20_v21 = vpack.c.bf16 %v18_v19, %v16_v18  ;;  %v284_v22 = vld [vmem:[%s402_s2] ss:$0 sm:$0xff]  ;;  %s313_s2 = smov 8  }
   0xe   :  { %156 = vmatpush.bf16.msra.mxu0 %v269_v6 }
   0xf   :  { %170 = vmatpush.bf16.msra.mxu1 %v277_v7 }
  0x12   :  { %157 = vmatpush.bf16.msra.mxu0 %v268_v8 }
  0x13   :  { %171 = vmatpush.bf16.msra.mxu1 %v276_v9 }
  0x16   :  { %158 = vmatpush.bf16.msra.mxu0 %v267_v10 }
  0x17   :  { %172 = vmatpush.bf16.msra.mxu1 %v275_v11 }
  0x1a   :  { %159 = vmatpush.bf16.msra.mxu0 %v266_v12 }
  0x1b   :  { %173 = vmatpush.bf16.msra.mxu1 %v274_v13 }
  0x1e   :  { %160 = vmatpush.bf16.msra.mxu0 %v265_v14 }
  0x1f   :  { %174 = vmatpush.bf16.msra.mxu1 %v273_v15 }
  0x21   :  { %161 = vmatmul.bf16.vlgmr.msra.gmra.mxu0 %v19_v20 }
  0x22   :  { %175 = vmatmul.bf16.vlgmr.msra.gmra.mxu1 %v20_v21 }
  0x9e   :  { %v162_v23 = vpop.f32.mrf.mxu0 }
  0x9f   :  { %v176_v24 = vpop.f32.mrf.mxu1  ;;  %v163_v25 = vadd.f32 %v284_v22, %v162_v23 }
  0xa1   :  { %v177_v26 = vadd.f32 %v176_v24, %v163_v25 }
  0xa3   :  { %181 = vst [vmem:[#allocation2] sm:$0xff] %v177_v26 }
  0xa6   :  { %v164_v27 = vpop.f32.mrf.mxu0 }
  0xa7   :  { %v165_v28 = vadd.f32 %v284_v22, %v164_v27  ;;  %v178_v29 = vpop.f32.mrf.mxu1 }
  0xa9   :  { %v179_v30 = vadd.f32 %v178_v29, %v165_v28 }
  0xab   :  { %182 = vst [vmem:[#allocation2 + $0x8] sm:$0xff] %v179_v30 }
  0xac   :  { %195 = dma.vmem_to_hbm [thread:$0]  %s188_s27, 256, %s190_s0, [#allocation3], %s312_s30, %s312_s30, %s313_s2  }
  0xad   :  { %309 = dma.done.wait [#allocation3], 256  }
  0xae   :  { %310 = vsyncadd [#allocation3], 4294967040 }
  0xaf   :  { %200 = vsyncpa [#allocation3], 1 }

// kernel: lstm_model_forward.6
= control target key start
LH: loop header
LB: loop body
LE: loop exit
PB: predicated region body
PF: predicated region fallthrough
CT: control target
= control target key end

     0   :  { %8 = vsyncpa [#allocation3], 0  ;;  %s3309_s15 = smov [#allocation2]   ;;  %s3310_s17 = smov 256   ;;  %s4656_s0 = inlined_call_operand.vmem [shape: f32[8,2,1024], index: 0, kind: input, shape index: {}]   ;;  %s4657_s1 = inlined_call_operand.vmem [shape: bf16[128,512], index: 1, kind: input, shape index: {}]   ;;  %s4658_s2 = inlined_call_operand.hbm [shape: bf16[128,512], index: 2, kind: input, shape index: {}]   ;;  %s4659_s3 = inlined_call_operand.vmem [shape: f32[8,2,256], index: 3, kind: output, shape index: {}]  }
   0x1   :  { %s17_s14 = sshll.u32 %s4658_s2, 4  ;;  %s19_s16 = sshll.u32 %s3309_s15, 4  ;;  %s18_s14 = int_to_ptr.hbm [resolvable:$true] %s17_s14  ;;  %s20_s16 = int_to_ptr.vmem [resolvable:$true] %s19_s16 }
   0x2   :  { %s3311_s18 = smov 16  }
   0x3   :  { %25 = dma.hbm_to_vmem [thread:$0]  %s18_s14, 4096, %s20_s16, [#allocation3], %s3310_s17, %s3310_s17, %s3311_s18  }
   0x4   :  { %3307 = dma.done.wait [#allocation3], 4096  }
   0x5   :  { %3308 = vsyncadd [#allocation3], 4294963200  ;;  %v2741_v0 = vld [vmem:[%s4657_s1 + $0xe0] sm:$0xf]  ;;  %v2989_v1 = vld [vmem:[%s4657_s1 + $0xec] sm:$0xf0] }
   0x6   :  { %v2987_v2 = vld [vmem:[%s4657_s1 + $0xe4] sm:$0xf]  ;;  %v3345_v3 = vor.u32 %v2989_v1, %v2741_v0  ;;  %v2743_v4 = vld [vmem:[%s4657_s1 + $0xf0] sm:$0xf0]  ;;  %v2749_v5 = vld [vmem:[%s4657_s1 + $0xe8] sm:$0xf] }
   0x7   :  { %v2990_v6 = vld [vmem:[%s4657_s1 + $0xf4] sm:$0xf0]  ;;  %v3356_v7 = vor.u32 %v2987_v2, %v2743_v4  ;;  %v2988_v9 = vld [vmem:[%s4657_s1 + $0xec] sm:$0xf]  ;;  %v2751_v10 = vld [vmem:[%s4657_s1 + $0xf8] sm:$0xf0] }
   0x8   :  { %v3358_v8 = vor.u32 %v2990_v6, %v2749_v5  ;;  %v2725_v11 = vld [vmem:[%s4657_s1 + $0xc0] sm:$0xf]  ;;  %256 = vmatpush.bf16.msra.mxu0 %v3345_v3  ;;  %v3370_v12 = vor.u32 %v2988_v9, %v2751_v10  ;;  %v2985_v13 = vld [vmem:[%s4657_s1 + $0xcc] sm:$0xf0]  ;;  %v2983_v14 = vld [vmem:[%s4657_s1 + $0xc4] sm:$0xf] }
   0x9   :  { %v2727_v15 = vld [vmem:[%s4657_s1 + $0xd0] sm:$0xf0]  ;;  %269 = vmatpush.bf16.msra.mxu1 %v3356_v7  ;;  %v3383_v16 = vor.u32 %v2985_v13, %v2725_v11  ;;  %v2733_v18 = vld [vmem:[%s4657_s1 + $0xc8] sm:$0xf]  ;;  %v2986_v19 = vld [vmem:[%s4657_s1 + $0xd4] sm:$0xf0] }
   0xa   :  { %282 = vmatpush.bf16.msra.mxu2 %v3358_v8  ;;  %v3385_v17 = vor.u32 %v2983_v14, %v2727_v15  ;;  %v2984_v20 = vld [vmem:[%s4657_s1 + $0xcc] sm:$0xf]  ;;  %295 = vmatpush.bf16.msra.mxu3 %v3370_v12  ;;  %v3397_v21 = vor.u32 %v2986_v19, %v2733_v18  ;;  %v2735_v22 = vld [vmem:[%s4657_s1 + $0xd8] sm:$0xf0]  ;;  %v2709_v23 = vld [vmem:[%s4657_s1 + $0xa0] sm:$0xf] }
   0xb   :  { %v2981_v24 = vld [vmem:[%s4657_s1 + $0xac] sm:$0xf0]  ;;  %v3408_v25 = vor.u32 %v2984_v20, %v2735_v22  ;;  %v2979_v26 = vld [vmem:[%s4657_s1 + $0xa4] sm:$0xf]  ;;  %v2711_v27 = vld [vmem:[%s4657_s1 + $0xb0] sm:$0xf0] }
   0xc   :  { %v2717_v28 = vld [vmem:[%s4657_s1 + $0xa8] sm:$0xf]  ;;  %257 = vmatpush.bf16.msra.mxu0 %v3383_v16  ;;  %v3420_v29 = vor.u32 %v2981_v24, %v2709_v23  ;;  %v2982_v30 = vld [vmem:[%s4657_s1 + $0xb4] sm:$0xf0]  ;;  %v2980_v31 = vld [vmem:[%s4657_s1 + $0xac] sm:$0xf]  ;;  %v3433_v33 = vor.u32 %v2979_v26, %v2711_v27 }
   0xd   :  { %v2719_v32 = vld [vmem:[%s4657_s1 + $0xb8] sm:$0xf0]  ;;  %270 = vmatpush.bf16.msra.mxu1 %v3385_v17  ;;  %v3435_v34 = vor.u32 %v2982_v30, %v2717_v28  ;;  %v2693_v35 = vld [vmem:[%s4657_s1 + $0x80] sm:$0xf]  ;;  %v2977_v36 = vld [vmem:[%s4657_s1 + $0x8c] sm:$0xf0] }
   0xe   :  { %283 = vmatpush.bf16.msra.mxu2 %v3397_v21  ;;  %v2975_v37 = vld [vmem:[%s4657_s1 + $0x84] sm:$0xf]  ;;  %296 = vmatpush.bf16.msra.mxu3 %v3408_v25  ;;  %v3447_v38 = vor.u32 %v2980_v31, %v2719_v32  ;;  %v2695_v39 = vld [vmem:[%s4657_s1 + $0x90] sm:$0xf0]  ;;  %v2701_v40 = vld [vmem:[%s4657_s1 + $0x88] sm:$0xf]  ;;  %v3465_v44 = vor.u32 %v2977_v36, %v2693_v35 }
   0xf   :  { %v2978_v41 = vld [vmem:[%s4657_s1 + $0x94] sm:$0xf0]  ;;  %v2976_v42 = vld [vmem:[%s4657_s1 + $0x8c] sm:$0xf]  ;;  %v2703_v43 = vld [vmem:[%s4657_s1 + $0x98] sm:$0xf0]  ;;  %v3469_v45 = vor.u32 %v2975_v37, %v2695_v39 }
  0x10   :  { %258 = vmatpush.bf16.msra.mxu0 %v3420_v29  ;;  %v3471_v46 = vor.u32 %v2978_v41, %v2701_v40  ;;  %v2677_v47 = vld [vmem:[%s4657_s1 + $0x60] sm:$0xf]  ;;  %v2973_v48 = vld [vmem:[%s4657_s1 + $0x6c] sm:$0xf0]  ;;  %v2971_v49 = vld [vmem:[%s4657_s1 + $0x64] sm:$0xf]  ;;  %v3483_v50 = vor.u32 %v2976_v42, %v2703_v43 }
  0x11   :  { %271 = vmatpush.bf16.msra.mxu1 %v3433_v33  ;;  %v2679_v51 = vld [vmem:[%s4657_s1 + $0x70] sm:$0xf0]  ;;  %v2685_v52 = vld [vmem:[%s4657_s1 + $0x68] sm:$0xf]  ;;  %v2974_v53 = vld [vmem:[%s4657_s1 + $0x74] sm:$0xf0]  ;;  %v3501_v56 = vor.u32 %v2973_v48, %v2677_v47 }
  0x12   :  { %284 = vmatpush.bf16.msra.mxu2 %v3435_v34  ;;  %297 = vmatpush.bf16.msra.mxu3 %v3447_v38  ;;  %v2972_v54 = vld [vmem:[%s4657_s1 + $0x6c] sm:$0xf]  ;;  %v2687_v55 = vld [vmem:[%s4657_s1 + $0x78] sm:$0xf0]  ;;  %v3505_v57 = vor.u32 %v2971_v49, %v2679_v51  ;;  %v3507_v58 = vor.u32 %v2974_v53, %v2685_v52  ;;  %v2661_v59 = vld [vmem:[%s4657_s1 + $0x40] sm:$0xf] }
  0x13   :  { %v2969_v60 = vld [vmem:[%s4657_s1 + $0x4c] sm:$0xf0]  ;;  %v2967_v61 = vld [vmem:[%s4657_s1 + $0x44] sm:$0xf]  ;;  %v3519_v62 = vor.u32 %v2972_v54, %v2687_v55  ;;  %v2663_v63 = vld [vmem:[%s4657_s1 + $0x50] sm:$0xf0] }
  0x14   :  { %259 = vmatpush.bf16.msra.mxu0 %v3465_v44  ;;  %v2669_v0 = vld [vmem:[%s4657_s1 + $0x48] sm:$0xf]  ;;  %v2970_v1 = vld [vmem:[%s4657_s1 + $0x54] sm:$0xf0]  ;;  %v2968_v2 = vld [vmem:[%s4657_s1 + $0x4c] sm:$0xf]  ;;  %v3537_v5 = vor.u32 %v2969_v60, %v2661_v59  ;;  %v3541_v6 = vor.u32 %v2967_v61, %v2663_v63 }
  0x15   :  { %272 = vmatpush.bf16.msra.mxu1 %v3469_v45  ;;  %v2671_v4 = vld [vmem:[%s4657_s1 + $0x58] sm:$0xf0]  ;;  %v3543_v9 = vor.u32 %v2970_v1, %v2669_v0  ;;  %v2645_v10 = vld [vmem:[%s4657_s1 + $0x20] sm:$0xf]  ;;  %v2965_v11 = vld [vmem:[%s4657_s1 + $0x2c] sm:$0xf0] }
  0x16   :  { %285 = vmatpush.bf16.msra.mxu2 %v3471_v46  ;;  %298 = vmatpush.bf16.msra.mxu3 %v3483_v50  ;;  %v2963_v13 = vld [vmem:[%s4657_s1 + $0x24] sm:$0xf]  ;;  %v3555_v14 = vor.u32 %v2968_v2, %v2671_v4  ;;  %v2647_v15 = vld [vmem:[%s4657_s1 + $0x30] sm:$0xf0]  ;;  %v2653_v18 = vld [vmem:[%s4657_s1 + $0x28] sm:$0xf]  ;;  %v3573_v23 = vor.u32 %v2965_v11, %v2645_v10 }
  0x17   :  { %v2966_v19 = vld [vmem:[%s4657_s1 + $0x34] sm:$0xf0]  ;;  %v2964_v20 = vld [vmem:[%s4657_s1 + $0x2c] sm:$0xf]  ;;  %v2655_v22 = vld [vmem:[%s4657_s1 + $0x38] sm:$0xf0]  ;;  %v3583_v27 = vor.u32 %v2963_v13, %v2647_v15 }
  0x18   :  { %260 = vmatpush.bf16.msra.mxu0 %v3501_v56  ;;  %v2629_v24 = vld [vmem:[%s4657_s1] sm:$0xf]  ;;  %v2961_v26 = vld [vmem:[%s4657_s1 + $0xc] sm:$0xf0]  ;;  %v3585_v28 = vor.u32 %v2966_v19, %v2653_v18  ;;  %v2959_v30 = vld [vmem:[%s4657_s1 + $0x4] sm:$0xf]  ;;  %v3597_v35 = vor.u32 %v2964_v20, %v2655_v22 }
  0x19   :  { %273 = vmatpush.bf16.msra.mxu1 %v3505_v57  ;;  %v2631_v31 = vld [vmem:[%s4657_s1 + $0x10] sm:$0xf0]  ;;  %v2637_v32 = vld [vmem:[%s4657_s1 + $0x8] sm:$0xf]  ;;  %v2962_v36 = vld [vmem:[%s4657_s1 + $0x14] sm:$0xf0]  ;;  %v3609_v43 = vor.u32 %v2961_v26, %v2629_v24 }
  0x1a   :  { %286 = vmatpush.bf16.msra.mxu2 %v3507_v58  ;;  %299 = vmatpush.bf16.msra.mxu3 %v3519_v62  ;;  %v2960_v37 = vld [vmem:[%s4657_s1 + $0xc] sm:$0xf]  ;;  %v2639_v39 = vld [vmem:[%s4657_s1 + $0x18] sm:$0xf0]  ;;  %v2873_v40 = vld [vmem:[#allocation2 + $0xe0] sm:$0xf]  ;;  %v3613_v51 = vor.u32 %v2959_v30, %v2631_v31  ;;  %v3615_v52 = vor.u32 %v2962_v36, %v2637_v32 }
  0x1b   :  { %v3021_v41 = vld [vmem:[#allocation2 + $0xec] sm:$0xf0]  ;;  %v3019_v42 = vld [vmem:[#allocation2 + $0xe4] sm:$0xf]  ;;  %v2875_v47 = vld [vmem:[#allocation2 + $0xf0] sm:$0xf0]  ;;  %v3618_v55 = vor.u32 %v2960_v37, %v2639_v39 }
  0x1c   :  { %261 = vmatpush.bf16.msra.mxu0 %v3537_v5  ;;  %v2881_v48 = vld [vmem:[#allocation2 + $0xe8] sm:$0xf]  ;;  %v3022_v49 = vld [vmem:[#allocation2 + $0xf4] sm:$0xf0]  ;;  %v3020_v53 = vld [vmem:[#allocation2 + $0xec] sm:$0xf]  ;;  %v3620_v59 = vor.u32 %v3021_v41, %v2873_v40  ;;  %v3622_v60 = vor.u32 %v3019_v42, %v2875_v47 }
  0x1d   :  { %274 = vmatpush.bf16.msra.mxu1 %v3541_v6  ;;  %v2883_v54 = vld [vmem:[#allocation2 + $0xf8] sm:$0xf0]  ;;  %4724 = vst [vmem:[#allocation5_spill] sm:$0xff] %v3618_v55  ;;  %v3624_v61 = vor.u32 %v3022_v49, %v2881_v48  ;;  %v2857_v63 = vld [vmem:[#allocation2 + $0xc0] sm:$0xf]  ;;  %v4660_v30 = vmov 0  }
  0x1e   :  { %287 = vmatpush.bf16.msra.mxu2 %v3543_v9  ;;  %300 = vmatpush.bf16.msra.mxu3 %v3555_v14  ;;  %v3017_v0 = vld [vmem:[#allocation2 + $0xcc] sm:$0xf0]  ;;  %v3015_v1 = vld [vmem:[#allocation2 + $0xc4] sm:$0xf]  ;;  %v3627_v2 = vor.u32 %v3020_v53, %v2883_v54  ;;  %v2859_v4 = vld [vmem:[#allocation2 + $0xd0] sm:$0xf0] }
  0x1f   :  { %4725 = vst [vmem:[#allocation6_spill] sm:$0xff] %v3624_v61  ;;  %v2865_v10 = vld [vmem:[#allocation2 + $0xc8] sm:$0xf]  ;;  %v3018_v11 = vld [vmem:[#allocation2 + $0xd4] sm:$0xf0]  ;;  %v3633_v18 = vor.u32 %v3017_v0, %v2857_v63  ;;  %v3637_v19 = vor.u32 %v3015_v1, %v2859_v4  ;;  %vm315_vm0 = vcmask 1041408  }
  0x20   :  { %262 = vmatpush.bf16.msra.mxu0 %v3573_v23  ;;  %4726 = vst [vmem:[#allocation7_spill] sm:$0xff] %v3627_v2  ;;  %v3016_v13 = vld [vmem:[#allocation2 + $0xcc] sm:$0xf]  ;;  %v2867_v15 = vld [vmem:[#allocation2 + $0xd8] sm:$0xf0]  ;;  %v3639_v20 = vor.u32 %v3018_v11, %v2865_v10  ;;  %vm317_vm1 = vcmask 1045508  }
  0x21   :  { %275 = vmatpush.bf16.msra.mxu1 %v3583_v27  ;;  %4727 = vst [vmem:[#allocation8_spill] sm:$0xff] %v3633_v18  ;;  %v2841_v22 = vld [vmem:[#allocation2 + $0xa0] sm:$0xf]  ;;  %v3013_v24 = vld [vmem:[#allocation2 + $0xac] sm:$0xf0]  ;;  %v3643_v31 = vor.u32 %v3016_v13, %v2867_v15  ;;  %vm319_vm2 = vcmask 1043456  }
  0x22   :  { %288 = vmatpush.bf16.msra.mxu2 %v3585_v28  ;;  %301 = vmatpush.bf16.msra.mxu3 %v3597_v35  ;;  %4728 = vst [vmem:[#allocation9_spill] sm:$0xff] %v3637_v19  ;;  %v3011_v26 = vld [vmem:[#allocation2 + $0xa4] sm:$0xf]  ;;  %v2843_v32 = vld [vmem:[#allocation2 + $0xb0] sm:$0xf0]  ;;  %v3648_v41 = vor.u32 %v3013_v24, %v2841_v22 }
  0x23   :  { %4729 = vst [vmem:[#allocation10_spill] sm:$0xff] %v3639_v20  ;;  %v2849_v36 = vld [vmem:[#allocation2 + $0xa8] sm:$0xf]  ;;  %v3014_v37 = vld [vmem:[#allocation2 + $0xb4] sm:$0xf0]  ;;  %v3652_v42 = vor.u32 %v3011_v26, %v2843_v32 }
  0x24   :  { %263 = vmatpush.bf16.msra.mxu0 %v3609_v43  ;;  %4730 = vst [vmem:[#allocation11_spill] sm:$0xff] %v3643_v31  ;;  %v3012_v39 = vld [vmem:[#allocation2 + $0xac] sm:$0xf]  ;;  %v2851_v40 = vld [vmem:[#allocation2 + $0xb8] sm:$0xf0]  ;;  %v3654_v47 = vor.u32 %v3014_v37, %v2849_v36 }
  0x25   :  { %276 = vmatpush.bf16.msra.mxu1 %v3613_v51  ;;  %4731 = vst [vmem:[#allocation12_spill] sm:$0xff] %v3648_v41  ;;  %v2825_v48 = vld [vmem:[#allocation2 + $0x80] sm:$0xf]  ;;  %v3009_v49 = vld [vmem:[#allocation2 + $0x8c] sm:$0xf0]  ;;  %v3657_v54 = vor.u32 %v3012_v39, %v2851_v40 }
  0x26   :  { %289 = vmatpush.bf16.msra.mxu2 %v3615_v52  ;;  %302 = vmatpush.bf16.msra.mxu3 %v3618_v55  ;;  %4732 = vst [vmem:[#allocation13_spill] sm:$0xff] %v3652_v42  ;;  %v3007_v53 = vld [vmem:[#allocation2 + $0x84] sm:$0xf]  ;;  %v2827_v63 = vld [vmem:[#allocation2 + $0x90] sm:$0xf0]  ;;  %v3661_v11 = vor.u32 %v3009_v49, %v2825_v48 }
  0x27   :  { %4733 = vst [vmem:[#allocation14_spill] sm:$0xff] %v3654_v47  ;;  %264 = vmatmul.bf16.vlgmr.msra.gmra.mxu0 %v4660_v30  ;;  %v2833_v0 = vld [vmem:[#allocation2 + $0x88] sm:$0xf]  ;;  %v3010_v1 = vld [vmem:[#allocation2 + $0x94] sm:$0xf0]  ;;  %v3665_v13 = vor.u32 %v3007_v53, %v2827_v63 }
  0x28   :  { %556 = vmatpush.bf16.msrb.mxu0 %v3620_v59  ;;  %277 = vmatmul.bf16.vlgmr.msra.gmra.mxu1 %v4660_v30  ;;  %4734 = vst [vmem:[#allocation15_spill] sm:$0xff] %v3657_v54  ;;  %v3008_v4 = vld [vmem:[#allocation2 + $0x8c] sm:$0xf]  ;;  %v2835_v10 = vld [vmem:[#allocation2 + $0x98] sm:$0xf0]  ;;  %v3667_v15 = vor.u32 %v3010_v1, %v2833_v0 }
  0x29   :  { %569 = vmatpush.bf16.msrb.mxu1 %v3622_v60  ;;  %290 = vmatmul.bf16.vlgmr.msra.gmra.mxu2 %v4660_v30  ;;  %4735 = vst [vmem:[#allocation16_spill] sm:$0xff] %v3661_v11  ;;  %v2809_v22 = vld [vmem:[#allocation2 + $0x60] sm:$0xf]  ;;  %v3005_v24 = vld [vmem:[#allocation2 + $0x6c] sm:$0xf0]  ;;  %v3670_v32 = vor.u32 %v3008_v4, %v2835_v10 }
  0x2a   :  { %582 = vmatpush.bf16.msrb.mxu2 %v3624_v61  ;;  %595 = vmatpush.bf16.msrb.mxu3 %v3627_v2  ;;  %4736 = vst [vmem:[#allocation17_spill] sm:$0xff] %v3665_v13  ;;  %v3003_v26 = vld [vmem:[#allocation2 + $0x64] sm:$0xf]  ;;  %v2811_v36 = vld [vmem:[#allocation2 + $0x70] sm:$0xf0]  ;;  %v3673_v49 = vor.u32 %v3005_v24, %v2809_v22 }
  0x2b   :  { %303 = vmatmul.bf16.vlgmr.msra.gmra.mxu3 %v4660_v30  ;;  %4737 = vst [vmem:[#allocation18_spill] sm:$0xff] %v3667_v15  ;;  %v2817_v37 = vld [vmem:[#allocation2 + $0x68] sm:$0xf]  ;;  %v3006_v39 = vld [vmem:[#allocation2 + $0x74] sm:$0xf0]  ;;  %v3677_v53 = vor.u32 %v3003_v26, %v2811_v36 }
  0x2c   :  { %557 = vmatpush.bf16.msrb.mxu0 %v3633_v18  ;;  %4738 = vst [vmem:[#allocation19_spill] sm:$0xff] %v3670_v32  ;;  %v3004_v40 = vld [vmem:[#allocation2 + $0x6c] sm:$0xf]  ;;  %v2819_v48 = vld [vmem:[#allocation2 + $0x78] sm:$0xf0]  ;;  %v3679_v63 = vor.u32 %v3006_v39, %v2817_v37 }
  0x2d   :  { %570 = vmatpush.bf16.msrb.mxu1 %v3637_v19  ;;  %4739 = vst [vmem:[#allocation20_spill] sm:$0xff] %v3673_v49  ;;  %v2793_v0 = vld [vmem:[#allocation2 + $0x40] sm:$0xf]  ;;  %v3001_v1 = vld [vmem:[#allocation2 + $0x4c] sm:$0xf0]  ;;  %v3682_v10 = vor.u32 %v3004_v40, %v2819_v48 }
  0x2e   :  { %583 = vmatpush.bf16.msrb.mxu2 %v3639_v20  ;;  %596 = vmatpush.bf16.msrb.mxu3 %v3643_v31  ;;  %4740 = vst [vmem:[#allocation21_spill] sm:$0xff] %v3677_v53  ;;  %v2999_v4 = vld [vmem:[#allocation2 + $0x44] sm:$0xf]  ;;  %v2795_v30 = vld [vmem:[#allocation2 + $0x50] sm:$0xf0] }
  0x2f   :  { %4741 = vst [vmem:[#allocation22_spill] sm:$0xff] %v3679_v63  ;;  %v3000_v22 = vld [vmem:[#allocation2 + $0x4c] sm:$0xf]  ;;  %v2803_v24 = vld [vmem:[#allocation2 + $0x58] sm:$0xf0]  ;;  %v3689_v26 = vor.u32 %v2999_v4, %v2795_v30 }
  0x30   :  { %558 = vmatpush.bf16.msrb.mxu0 %v3648_v41  ;;  %4742 = vst [vmem:[#allocation23_spill] sm:$0xff] %v3682_v10  ;;  %v2777_v37 = vld [vmem:[#allocation2 + $0x20] sm:$0xf]  ;;  %v2997_v39 = vld [vmem:[#allocation2 + $0x2c] sm:$0xf0]  ;;  %v3694_v48 = vor.u32 %v3000_v22, %v2803_v24 }
  0x31   :  { %571 = vmatpush.bf16.msrb.mxu1 %v3652_v42  ;;  %4744 = vst [vmem:[#allocation25_spill] sm:$0xff] %v3689_v26  ;;  %v2995_v40 = vld [vmem:[#allocation2 + $0x24] sm:$0xf]  ;;  %v2993_v4 = vld [vmem:[#allocation2 + $0xc] sm:$0xf0] }
  0x32   :  { %584 = vmatpush.bf16.msrb.mxu2 %v3654_v47  ;;  %597 = vmatpush.bf16.msrb.mxu3 %v3657_v54  ;;  %v2801_v54 = vld [vmem:[#allocation2 + $0x48] sm:$0xf]  ;;  %4746 = vst [vmem:[#allocation27_spill] sm:$0xff] %v3694_v48  ;;  %v2991_v22 = vld [vmem:[#allocation2 + $0x4] sm:$0xf] }
  0x34   :  { %559 = vmatpush.bf16.msrb.mxu0 %v3661_v11  ;;  %v3002_v11 = vld [vmem:[#allocation2 + $0x54] sm:$0xf0] }
  0x35   :  { %572 = vmatpush.bf16.msrb.mxu1 %v3665_v13  ;;  %v3685_v13 = vor.u32 %v3001_v1, %v2793_v0  ;;  %v3691_v36 = vor.u32 %v3002_v11, %v2801_v54  ;;  %v2996_v0 = vld [vmem:[#allocation2 + $0x2c] sm:$0xf]  ;;  %v2787_v1 = vld [vmem:[#allocation2 + $0x38] sm:$0xf0]  ;;  %v2761_v11 = vld [vmem:[#allocation2] sm:$0xf] }
  0x36   :  { %585 = vmatpush.bf16.msrb.mxu2 %v3667_v15  ;;  %598 = vmatpush.bf16.msrb.mxu3 %v3670_v32  ;;  %v2779_v32 = vld [vmem:[#allocation2 + $0x30] sm:$0xf0]  ;;  %v2785_v15 = vld [vmem:[#allocation2 + $0x28] sm:$0xf]  ;;  %v3706_v24 = vor.u32 %v2996_v0, %v2787_v1 }
  0x37   :  { %4743 = vst [vmem:[#allocation24_spill] sm:$0xff] %v3685_v13  ;;  %v3701_v30 = vor.u32 %v2995_v40, %v2779_v32  ;;  %v4755_v40 = vmov 0   ;;  %v4759_v0 = vld [vmem:[#allocation18_spill] sm:$0xff]  ;;  %v4760_v1 = vld [vmem:[#allocation19_spill] sm:$0xff] }
  0x38   :  { %560 = vmatpush.bf16.msrb.mxu0 %v3673_v49  ;;  %4745 = vst [vmem:[#allocation26_spill] sm:$0xff] %v3691_v36  ;;  %v2998_v49 = vld [vmem:[#allocation2 + $0x34] sm:$0xf0] }
  0x39   :  { %573 = vmatpush.bf16.msrb.mxu1 %v3677_v53  ;;  %v3697_v53 = vor.u32 %v2997_v39, %v2777_v37  ;;  %4748 = vst [vmem:[#allocation29_spill] sm:$0xff] %v3701_v30  ;;  %v3703_v54 = vor.u32 %v2998_v49, %v2785_v15  ;;  %v2992_v37 = vld [vmem:[#allocation2 + $0xc] sm:$0xf]  ;;  %v2771_v39 = vld [vmem:[#allocation2 + $0x18] sm:$0xf0] }
  0x3a   :  { %586 = vmatpush.bf16.msrb.mxu2 %v3679_v63  ;;  %599 = vmatpush.bf16.msrb.mxu3 %v3682_v10  ;;  %4750 = vst [vmem:[#allocation31_spill] sm:$0xff] %v3706_v24  ;;  %v2763_v10 = vld [vmem:[#allocation2 + $0x10] sm:$0xf0]  ;;  %v2769_v63 = vld [vmem:[#allocation2 + $0x8] sm:$0xf]  ;;  %v3718_v49 = vor.u32 %v2992_v37, %v2771_v39 }
  0x3b   :  { %4747 = vst [vmem:[#allocation28_spill] sm:$0xff] %v3697_v53  ;;  %v3713_v15 = vor.u32 %v2991_v22, %v2763_v10  ;;  %v4758_v10 = vld [vmem:[#allocation17_spill] sm:$0xff]  ;;  %v4763_v22 = vld [vmem:[#allocation22_spill] sm:$0xff]  ;;  %v4764_v37 = vld [vmem:[#allocation23_spill] sm:$0xff] }
  0x3c   :  { %561 = vmatpush.bf16.msrb.mxu0 %v3685_v13  ;;  %4749 = vst [vmem:[#allocation30_spill] sm:$0xff] %v3703_v54  ;;  %v2994_v13 = vld [vmem:[#allocation2 + $0x14] sm:$0xf0] }
  0x3d   :  { %574 = vmatpush.bf16.msrb.mxu1 %v3689_v26  ;;  %v3709_v26 = vor.u32 %v2993_v4, %v2761_v11  ;;  %4752 = vst [vmem:[#allocation33_spill] sm:$0xff] %v3713_v15  ;;  %v3715_v32 = vor.u32 %v2994_v13, %v2769_v63  ;;  %v4756_v13 = vld [vmem:[#allocation15_spill] sm:$0xff]  ;;  %v4757_v63 = vld [vmem:[#allocation16_spill] sm:$0xff]  ;;  %v4762_v4 = vld [vmem:[#allocation21_spill] sm:$0xff] }
  0x3e   :  { %587 = vmatpush.bf16.msrb.mxu2 %v3691_v36  ;;  %600 = vmatpush.bf16.msrb.mxu3 %v3694_v48  ;;  %4754 = vst [vmem:[#allocation35_spill] sm:$0xff] %v3718_v49  ;;  %v4761_v11 = vld [vmem:[#allocation20_spill] sm:$0xff] }
  0x3f   :  { %4751 = vst [vmem:[#allocation32_spill] sm:$0xff] %v3709_v26  ;;  %v4765_v39 = vld [vmem:[#allocation24_spill] sm:$0xff] }
  0x40   :  { %562 = vmatpush.bf16.msrb.mxu0 %v3697_v53  ;;  %4753 = vst [vmem:[#allocation34_spill] sm:$0xff] %v3715_v32 }
  0x41   :  { %575 = vmatpush.bf16.msrb.mxu1 %v3701_v30 }
  0x42   :  { %588 = vmatpush.bf16.msrb.mxu2 %v3703_v54  ;;  %601 = vmatpush.bf16.msrb.mxu3 %v3706_v24 }
  0x44   :  { %563 = vmatpush.bf16.msrb.mxu0 %v3709_v26 }
  0x45   :  { %576 = vmatpush.bf16.msrb.mxu1 %v3713_v15 }
  0x46   :  { %589 = vmatpush.bf16.msrb.mxu2 %v3715_v32  ;;  %602 = vmatpush.bf16.msrb.mxu3 %v3718_v49 }
  0x47   :  { %564 = vmatmul.bf16.vlgmr.msrb.gmra.mxu0 %v4755_v40 }
  0x48   :  { %695 = vmatpush.bf16.msra.mxu0 %v3345_v3  ;;  %577 = vmatmul.bf16.vlgmr.msrb.gmra.mxu1 %v4755_v40 }
  0x49   :  { %708 = vmatpush.bf16.msra.mxu1 %v3356_v7  ;;  %590 = vmatmul.bf16.vlgmr.msrb.gmra.mxu2 %v4755_v40 }
  0x4a   :  { %603 = vmatmul.bf16.vlgmr.msrb.gmra.mxu3 %v4755_v40  ;;  %721 = vmatpush.bf16.msra.mxu2 %v3358_v8  ;;  %v4766_v40 = vld [vmem:[#allocation25_spill] sm:$0xff] }
  0x4b   :  { %734 = vmatpush.bf16.msra.mxu3 %v3370_v12 }
  0x4c   :  { %696 = vmatpush.bf16.msra.mxu0 %v3383_v16 }
  0x4d   :  { %709 = vmatpush.bf16.msra.mxu1 %v3385_v17 }
  0x4e   :  { %722 = vmatpush.bf16.msra.mxu2 %v3397_v21 }
  0x4f   :  { %735 = vmatpush.bf16.msra.mxu3 %v3408_v25 }
  0x50   :  { %697 = vmatpush.bf16.msra.mxu0 %v3420_v29 }
  0x51   :  { %710 = vmatpush.bf16.msra.mxu1 %v3433_v33 }
  0x52   :  { %723 = vmatpush.bf16.msra.mxu2 %v3435_v34 }
  0x53   :  { %736 = vmatpush.bf16.msra.mxu3 %v3447_v38 }
  0x54   :  { %698 = vmatpush.bf16.msra.mxu0 %v3465_v44 }
  0x55   :  { %711 = vmatpush.bf16.msra.mxu1 %v3469_v45 }
  0x56   :  { %724 = vmatpush.bf16.msra.mxu2 %v3471_v46 }
  0x57   :  { %737 = vmatpush.bf16.msra.mxu3 %v3483_v50 }
  0x58   :  { %699 = vmatpush.bf16.msra.mxu0 %v3501_v56 }
  0x59   :  { %712 = vmatpush.bf16.msra.mxu1 %v3505_v57 }
  0x5a   :  { %725 = vmatpush.bf16.msra.mxu2 %v3507_v58 }
  0x5b   :  { %738 = vmatpush.bf16.msra.mxu3 %v3519_v62 }
  0x5c   :  { %700 = vmatpush.bf16.msra.mxu0 %v3537_v5 }
  0x5d   :  { %713 = vmatpush.bf16.msra.mxu1 %v3541_v6 }
  0x5e   :  { %726 = vmatpush.bf16.msra.mxu2 %v3543_v9 }
  0x5f   :  { %739 = vmatpush.bf16.msra.mxu3 %v3555_v14 }
  0x60   :  { %701 = vmatpush.bf16.msra.mxu0 %v3573_v23 }
  0x61   :  { %714 = vmatpush.bf16.msra.mxu1 %v3583_v27 }
  0x62   :  { %727 = vmatpush.bf16.msra.mxu2 %v3585_v28 }
  0x63   :  { %740 = vmatpush.bf16.msra.mxu3 %v3597_v35 }
  0x64   :  { %702 = vmatpush.bf16.msra.mxu0 %v3609_v43 }
  0x65   :  { %715 = vmatpush.bf16.msra.mxu1 %v3613_v51 }
  0x66   :  { %728 = vmatpush.bf16.msra.mxu2 %v3615_v52 }
  0x67   :  { %741 = vmatpush.bf16.msra.mxu3 %v3618_v55 }
  0x68   :  { %834 = vmatpush.bf16.msrb.mxu0 %v3620_v59 }
  0x69   :  { %847 = vmatpush.bf16.msrb.mxu1 %v3622_v60 }
  0x6a   :  { %860 = vmatpush.bf16.msrb.mxu2 %v3624_v61 }
  0x6b   :  { %873 = vmatpush.bf16.msrb.mxu3 %v3627_v2 }
  0x6c   :  { %835 = vmatpush.bf16.msrb.mxu0 %v3633_v18 }
  0x6d   :  { %848 = vmatpush.bf16.msrb.mxu1 %v3637_v19 }
  0x6e   :  { %861 = vmatpush.bf16.msrb.mxu2 %v3639_v20 }
  0x6f   :  { %874 = vmatpush.bf16.msrb.mxu3 %v3643_v31 }
  0x70   :  { %836 = vmatpush.bf16.msrb.mxu0 %v3648_v41 }
  0x71   :  { %849 = vmatpush.bf16.msrb.mxu1 %v3652_v42 }
  0x72   :  { %862 = vmatpush.bf16.msrb.mxu2 %v3654_v47 }
  0x73   :  { %875 = vmatpush.bf16.msrb.mxu3 %v4756_v13 }
  0x74   :  { %837 = vmatpush.bf16.msrb.mxu0 %v4757_v63 }
  0x75   :  { %850 = vmatpush.bf16.msrb.mxu1 %v4758_v10 }
  0x76   :  { %863 = vmatpush.bf16.msrb.mxu2 %v4759_v0 }
  0x77   :  { %876 = vmatpush.bf16.msrb.mxu3 %v4760_v1 }
  0x78   :  { %838 = vmatpush.bf16.msrb.mxu0 %v4761_v11 }
  0x79   :  { %851 = vmatpush.bf16.msrb.mxu1 %v4762_v4 }
  0x7a   :  { %864 = vmatpush.bf16.msrb.mxu2 %v4763_v22 }
  0x7b   :  { %877 = vmatpush.bf16.msrb.mxu3 %v4764_v37 }
  0x7c   :  { %839 = vmatpush.bf16.msrb.mxu0 %v4765_v39 }
  0x7d   :  { %852 = vmatpush.bf16.msrb.mxu1 %v4766_v40 }
  0x7e   :  { %865 = vmatpush.bf16.msrb.mxu2 %v3691_v36 }
  0x7f   :  { %878 = vmatpush.bf16.msrb.mxu3 %v3694_v48 }
  0x80   :  { %840 = vmatpush.bf16.msrb.mxu0 %v3697_v53 }
  0x81   :  { %853 = vmatpush.bf16.msrb.mxu1 %v3701_v30 }
  0x82   :  { %866 = vmatpush.bf16.msrb.mxu2 %v3703_v54 }
  0x83   :  { %879 = vmatpush.bf16.msrb.mxu3 %v3706_v24 }
  0x84   :  { %841 = vmatpush.bf16.msrb.mxu0 %v3709_v26 }
  0x85   :  { %854 = vmatpush.bf16.msrb.mxu1 %v3713_v15  ;;  %v95_v15 = vld [vmem:[%s4656_s0] sm:$0xff] }
  0x86   :  { %867 = vmatpush.bf16.msrb.mxu2 %v3715_v32 }
  0x87   :  { %880 = vmatpush.bf16.msrb.mxu3 %v3718_v49 }
  0xa4   :  { %v265_v39 = vpop.f32.mrf.mxu0 }
  0xa5   :  { %v278_v40 = vpop.f32.mrf.mxu1 }
  0xa6   :  { %v312_v36 = vrot.slane %v278_v40, 6 }
  0xa8   :  { %v316_v54 = vsel %vm315_vm0, %v265_v39, %v312_v36 }
  0xac   :  { %v291_v48 = vpop.f32.mrf.mxu2  ;;  %v267_v24 = vpop.f32.mrf.mxu0 }
  0xad   :  { %v313_v53 = vrot.slane %v291_v48, 4  ;;  %v280_v26 = vpop.f32.mrf.mxu1 }
  0xae   :  { %v304_v37 = vpop.f32.mrf.mxu3 }
  0xaf   :  { %v314_v30 = vrot.slane %v304_v37, 2 }
  0xb1   :  { %v318_v32 = vsel %vm317_vm1, %v313_v53, %v314_v30 }
  0xb2   :  { %v320_v49 = vsel %vm319_vm2, %v316_v54, %v318_v32 }
  0xb3   :  { %v322_v40 = vadd.f32 %v320_v49, %v95_v15 }
  0xb4   :  { %v293_v11 = vpop.f32.mrf.mxu2 }
  0xb5   :  { %v2755_v22 = vmul.f32 -1.442695, %v322_v40  ;;  %v343_v4 = vrot.slane %v322_v40, 2  ;;  %v367_v48 = vrot.slane %v322_v40, 6 }
  0xb6   :  { %v306_v1 = vpop.f32.mrf.mxu3 }
  0xb7   :  { %3027 = vpow2.f32 %v2755_v22  ;;  %v2756_v37 = vmul.f32 -1.442695, %v343_v4  ;;  %v2757_v36 = vmul.f32 -1.442695, %v367_v48  ;;  %v364_v1 = vrot.slane %v322_v40, 4 }
  0xb9   :  { %3029 = vpow2.f32 %v2756_v37 }
  0xba   :  { %3031 = vpow2.f32 %v2757_v36 }
  0xbd   :  { %v3028_v39 = vpop.eup %3027 }
  0xbe   :  { %v326_v0 = vadd.f32 1.0, %v3028_v39 }
  0xbf   :  { %v3030_v10 = vpop.eup %3029 }
  0xc0   :  { %v3032_v26 = vpop.eup %3031  ;;  %3033 = vrcp.f32 %v326_v0  ;;  %v348_v53 = vadd.f32 1.0, %v3030_v10  ;;  %vm332_vm3 = vweird.f32 %v326_v0  ;;  %v338_v11 = vand.u32 2147483648, %v326_v0 }
  0xc1   :  { %v3798_v30 = vadd.f32 1.0, %v3032_v26  ;;  %v336_v10 = vand.u32 2147483647, %v326_v0 }
  0xc2   :  { %3035 = vrcp.f32 %v348_v53  ;;  %vm354_vm5 = vweird.f32 %v348_v53  ;;  %v360_v36 = vand.u32 2147483648, %v348_v53  ;;  %v358_v13 = vand.u32 2147483647, %v348_v53 }
  0xc3   :  { %3037 = vrcp.f32 %v3798_v30  ;;  %vm337_vm8 = vcmp.eq.f32.partialorder %v336_v10, 8.507059e+37  ;;  %vm378_vm11 = vweird.f32 %v3798_v30 }
  0xc4   :  { %v565_v54 = vpop.f32.mrf.mxu0  ;;  %3039 = vtanh.f32 %v364_v1  ;;  %v2758_v1 = vld [vmem:[%s4656_s0 + $0x78] sm:$0xff]  ;;  %vm359_vm10 = vcmp.eq.f32.partialorder %v358_v13, 8.507059e+37 }
  0xc5   :  { %v578_v24 = vpop.f32.mrf.mxu1 }
  0xc6   :  { %v3034_v15 = vpop.eup %3033  ;;  %v612_v37 = vrot.slane %v578_v24, 6 }
  0xc7   :  { %v328_v32 = vmul.f32 %v3034_v15, %v326_v0  ;;  %vm333_vm4 = vweird.f32 %v3034_v15  ;;  %v361_v0 = vor.u32 1.1754944e-38, %v360_v36 }
  0xc8   :  { %v3036_v49 = vpop.eup %3035  ;;  %vm3804_vm7 = vmor %vm332_vm3, %vm333_vm4  ;;  %v615_v31 = vsel %vm315_vm0, %v565_v54, %v612_v37 }
  0xc9   :  { %v3801_v4 = vpop.eup %3037  ;;  %v329_v22 = vsub.f32 1.0, %v328_v32  ;;  %v350_v48 = vmul.f32 %v3036_v49, %v348_v53  ;;  %vm355_vm6 = vweird.f32 %v3036_v49  ;;  %v339_v32 = vor.u32 1.1754944e-38, %v338_v11 }
  0xca   :  { %v374_v24 = vmul.f32 %v3801_v4, %v3798_v30  ;;  %vm356_vm9 = vmor %vm354_vm5, %vm355_vm6  ;;  %vm379_vm12 = vweird.f32 %v3801_v4 }
  0xcb   :  { %v351_v39 = vsub.f32 1.0, %v350_v48  ;;  %v330_v63 = vmul.f32 %v3034_v15, %v329_v22  ;;  %vm380_vm13 = vmor %vm378_vm11, %vm379_vm12 }
  0xcc   :  { %v591_v26 = vpop.f32.mrf.mxu2  ;;  %v567_v40 = vpop.f32.mrf.mxu0 }
  0xcd   :  { %v613_v47 = vrot.slane %v591_v26, 4  ;;  %v604_v42 = vpop.f32.mrf.mxu3  ;;  %v580_v20 = vpop.f32.mrf.mxu1  ;;  %v331_v22 = vadd.f32 %v3034_v15, %v330_v63  ;;  %v352_v19 = vmul.f32 %v3036_v49, %v351_v39 }
  0xce   :  { %v614_v48 = vrot.slane %v604_v42, 2  ;;  %v375_v42 = vsub.f32 1.0, %v374_v24  ;;  %v3040_v39 = vpop.eup %3039 }
  0xcf   :  { %v335_v26 = vsel %vm3804_vm7, %v3034_v15, %v331_v22  ;;  %v353_v40 = vadd.f32 %v3036_v49, %v352_v19 }
  0xd0   :  { %v616_v11 = vsel %vm317_vm1, %v613_v47, %v614_v48  ;;  %v340_v54 = vsel %vm337_vm8, %v339_v32, %v335_v26  ;;  %v376_v19 = vmul.f32 %v3801_v4, %v375_v42  ;;  %v384_v32 = vand.u32 2147483648, %v3798_v30 }
  0xd1   :  { %v617_v20 = vsel %vm319_vm2, %v615_v31, %v616_v11  ;;  %v357_v37 = vsel %vm356_vm9, %v3036_v49, %v353_v40  ;;  %v389_v15 = vmul.f32 %v3040_v39, %v340_v54 }
  0xd2   :  { %v3820_v63 = vadd.f32 %v2758_v1, %v617_v20  ;;  %v362_v10 = vsel %vm359_vm10, %v361_v0, %v357_v37  ;;  %v377_v22 = vadd.f32 %v3801_v4, %v376_v19  ;;  %v382_v1 = vand.u32 2147483647, %v3798_v30 }
  0xd3   :  { %v388_v13 = vmul.f32 0.0, %v362_v10  ;;  %v385_v11 = vor.u32 1.1754944e-38, %v384_v32 }
  0xd4   :  { %v2887_v53 = vmul.f32 -1.442695, %v3820_v63  ;;  %v640_v36 = vrot.slane %v3820_v63, 2  ;;  %v664_v47 = vrot.slane %v3820_v63, 6  ;;  %v593_v48 = vpop.f32.mrf.mxu2  ;;  %v381_v40 = vsel %vm380_vm13, %v3801_v4, %v377_v22 }
  0xd5   :  { %v606_v41 = vpop.f32.mrf.mxu3  ;;  %v3828_v49 = vadd.f32 %v389_v15, %v388_v13  ;;  %vm383_vm14 = vcmp.eq.f32.partialorder %v382_v1, 8.507059e+37  ;;  %v661_v48 = vrot.slane %v3820_v63, 4 }
  0xd6   :  { %3041 = vpow2.f32 %v2887_v53  ;;  %v2888_v31 = vmul.f32 -1.442695, %v640_v36  ;;  %v2889_v24 = vmul.f32 -1.442695, %v664_v47  ;;  %v386_v10 = vsel %vm383_vm14, %v385_v11, %v381_v40 }
  0xd8   :  { %3043 = vpow2.f32 %v2888_v31 }
  0xd9   :  { %3045 = vpow2.f32 %v2889_v24 }
  0xda   :  { %3047 = vtanh.f32 %v3828_v49 }
  0xdc   :  { %v3042_v0 = vpop.eup %3041 }
  0xdd   :  { %v623_v26 = vadd.f32 1.0, %v3042_v0 }
  0xde   :  { %v3044_v20 = vpop.eup %3043 }
  0xdf   :  { %v3046_v42 = vpop.eup %3045  ;;  %3049 = vrcp.f32 %v623_v26  ;;  %v645_v54 = vadd.f32 1.0, %v3044_v20  ;;  %v635_v15 = vand.u32 2147483648, %v623_v26  ;;  %v633_v32 = vand.u32 2147483647, %v623_v26 }
  0xe0   :  { %v3048_v37 = vpop.eup %3047  ;;  %v3835_v39 = vadd.f32 1.0, %v3046_v42  ;;  %vm629_vm3 = vweird.f32 %v623_v26 }
  0xe1   :  { %3051 = vrcp.f32 %v645_v54  ;;  %v392_v53 = vmul.f32 %v3048_v37, %v386_v10  ;;  %v657_v22 = vand.u32 2147483648, %v645_v54  ;;  %v655_v11 = vand.u32 2147483647, %v645_v54 }
  0xe2   :  { %3053 = vrcp.f32 %v3835_v39  ;;  %v636_v40 = vor.u32 1.1754944e-38, %v635_v15  ;;  %vm634_vm6 = vcmp.eq.f32.partialorder %v633_v32, 8.507059e+37  ;;  %vm651_vm7 = vweird.f32 %v645_v54 }
  0xe3   :  { %393 = vst [vmem:[%s4659_s3] sm:$0x3] %v392_v53  ;;  %v694_v30 = vpack.c.bf16 %v392_v53, %v392_v53  ;;  %3055 = vtanh.f32 %v661_v48  ;;  %v658_v10 = vor.u32 1.1754944e-38, %v657_v22  ;;  %vm656_vm9 = vcmp.eq.f32.partialorder %v655_v11, 8.507059e+37  ;;  %v4772_v11 = vld [vmem:[#allocation12_spill] sm:$0xff] }
  0xe4   :  { %vm675_vm11 = vweird.f32 %v3835_v39  ;;  %v679_v15 = vand.u32 2147483647, %v3835_v39 }
  0xe5   :  { %v3050_v36 = vpop.eup %3049  ;;  %703 = vmatmul.bf16.vlgmr.msra.gmra.mxu0 %v694_v30  ;;  %716 = vmatmul.bf16.vlgmr.msra.gmra.mxu1 %v694_v30 }
  0xe6   :  { %v625_v4 = vmul.f32 %v3050_v36, %v623_v26  ;;  %729 = vmatmul.bf16.vlgmr.msra.gmra.mxu2 %v694_v30  ;;  %742 = vmatmul.bf16.vlgmr.msra.gmra.mxu3 %v694_v30  ;;  %vm630_vm15 = vweird.f32 %v3050_v36  ;;  %vm680_vm13 = vcmp.eq.f32.partialorder %v679_v15, 8.507059e+37  ;;  %v4787_v15 = vld [vmem:[#allocation27_spill] sm:$0xff] }
  0xe7   :  { %v3052_v47 = vpop.eup %3051  ;;  %973 = vmatpush.bf16.msra.mxu0 %v3345_v3  ;;  %986 = vmatpush.bf16.msra.mxu1 %v3356_v7  ;;  %vm631_vm5 = vmor %vm629_vm3, %vm630_vm15 }
  0xe8   :  { %v3844_v41 = vpop.eup %3053  ;;  %v626_v19 = vsub.f32 1.0, %v625_v4  ;;  %v647_v13 = vmul.f32 %v3052_v47, %v645_v54  ;;  %999 = vmatpush.bf16.msra.mxu2 %v3358_v8  ;;  %1012 = vmatpush.bf16.msra.mxu3 %v3370_v12  ;;  %vm652_vm4 = vweird.f32 %v3052_v47 }
  0xe9   :  { %v671_v31 = vmul.f32 %v3844_v41, %v3835_v39  ;;  %vm653_vm8 = vmor %vm651_vm7, %vm652_vm4  ;;  %v3056_v30 = vpop.eup %3055  ;;  %vm676_vm10 = vweird.f32 %v3844_v41 }
  0xea   :  { %v627_v24 = vmul.f32 %v3050_v36, %v626_v19  ;;  %v648_v63 = vsub.f32 1.0, %v647_v13  ;;  %v681_v13 = vand.u32 2147483648, %v3835_v39  ;;  %vm677_vm12 = vmor %vm675_vm11, %vm676_vm10 }
  0xeb   :  { %974 = vmatpush.bf16.msra.mxu0 %v3383_v16  ;;  %987 = vmatpush.bf16.msra.mxu1 %v3385_v17  ;;  %v672_v20 = vsub.f32 1.0, %v671_v31 }
  0xec   :  { %v628_v1 = vadd.f32 %v3050_v36, %v627_v24  ;;  %v649_v0 = vmul.f32 %v3052_v47, %v648_v63  ;;  %1000 = vmatpush.bf16.msra.mxu2 %v3397_v21  ;;  %1013 = vmatpush.bf16.msra.mxu3 %v3408_v25  ;;  %v682_v24 = vor.u32 1.1754944e-38, %v681_v13  ;;  %v4786_v13 = vld [vmem:[#allocation26_spill] sm:$0xff] }
  0xee   :  { %v632_v42 = vsel %vm631_vm5, %v3050_v36, %v628_v1  ;;  %v650_v37 = vadd.f32 %v3052_v47, %v649_v0  ;;  %v673_v36 = vmul.f32 %v3844_v41, %v672_v20  ;;  %v4770_v1 = vld [vmem:[#allocation10_spill] sm:$0xff]  ;;  %v4771_v0 = vld [vmem:[#allocation11_spill] sm:$0xff] }
  0xef   :  { %v637_v26 = vsel %vm634_vm6, %v636_v40, %v632_v42  ;;  %975 = vmatpush.bf16.msra.mxu0 %v3420_v29  ;;  %988 = vmatpush.bf16.msra.mxu1 %v3433_v33  ;;  %v4773_v40 = vld [vmem:[#allocation13_spill] sm:$0xff]  ;;  %v4774_v20 = vld [vmem:[#allocation14_spill] sm:$0xff]  ;;  %v4775_v42 = vld [vmem:[#allocation15_spill] sm:$0xff] }
  0xf0   :  { %v654_v53 = vsel %vm653_vm8, %v3052_v47, %v650_v37  ;;  %1001 = vmatpush.bf16.msra.mxu2 %v3435_v34  ;;  %1014 = vmatpush.bf16.msra.mxu3 %v3447_v38  ;;  %v686_v19 = vmul.f32 %v3056_v30, %v637_v26  ;;  %v674_v47 = vadd.f32 %v3844_v41, %v673_v36  ;;  %v4776_v37 = vld [vmem:[#allocation16_spill] sm:$0xff]  ;;  %v4777_v26 = vld [vmem:[#allocation17_spill] sm:$0xff]  ;;  %v4782_v36 = vld [vmem:[#allocation22_spill] sm:$0xff] }
  0xf1   :  { %v659_v4 = vsel %vm656_vm9, %v658_v10, %v654_v53  ;;  %v4778_v10 = vld [vmem:[#allocation18_spill] sm:$0xff]  ;;  %v4779_v53 = vld [vmem:[#allocation19_spill] sm:$0xff]  ;;  %v4780_v30 = vld [vmem:[#allocation20_spill] sm:$0xff] }
  0xf2   :  { %v685_v48 = vmul.f32 0.0, %v659_v4  ;;  %v678_v31 = vsel %vm677_vm12, %v3844_v41, %v674_v47  ;;  %v4769_v41 = vld [vmem:[#allocation9_spill] sm:$0xff] }
  0xf3   :  { %976 = vmatpush.bf16.msra.mxu0 %v3465_v44  ;;  %989 = vmatpush.bf16.msra.mxu1 %v3469_v45  ;;  %v683_v63 = vsel %vm680_vm13, %v682_v24, %v678_v31  ;;  %v4781_v4 = vld [vmem:[#allocation21_spill] sm:$0xff]  ;;  %v4788_v31 = vld [vmem:[#allocation28_spill] sm:$0xff] }
  0xf4   :  { %v3861_v54 = vadd.f32 %v686_v19, %v685_v48  ;;  %1002 = vmatpush.bf16.msra.mxu2 %v3471_v46  ;;  %1015 = vmatpush.bf16.msra.mxu3 %v3483_v50  ;;  %v4783_v48 = vld [vmem:[#allocation23_spill] sm:$0xff]  ;;  %v4784_v19 = vld [vmem:[#allocation24_spill] sm:$0xff]  ;;  %v4785_v47 = vld [vmem:[#allocation25_spill] sm:$0xff] }
  0xf5   :  { %v4789_v24 = vld [vmem:[#allocation29_spill] sm:$0xff] }
  0xf6   :  { %3057 = vtanh.f32 %v3861_v54 }
  0xf7   :  { %977 = vmatpush.bf16.msra.mxu0 %v3501_v56  ;;  %990 = vmatpush.bf16.msra.mxu1 %v3505_v57 }
  0xf8   :  { %1003 = vmatpush.bf16.msra.mxu2 %v3507_v58  ;;  %1016 = vmatpush.bf16.msra.mxu3 %v3519_v62 }
  0xfb   :  { %978 = vmatpush.bf16.msra.mxu0 %v3537_v5  ;;  %991 = vmatpush.bf16.msra.mxu1 %v3541_v6 }
  0xfc   :  { %v3058_v32 = vpop.eup %3057  ;;  %1004 = vmatpush.bf16.msra.mxu2 %v3543_v9  ;;  %1017 = vmatpush.bf16.msra.mxu3 %v3555_v14 }
  0xfd   :  { %v689_v39 = vmul.f32 %v3058_v32, %v683_v63  ;;  %v4790_v32 = vld [vmem:[#allocation30_spill] sm:$0xff]  ;;  %v4791_v63 = vld [vmem:[#allocation31_spill] sm:$0xff] }
  0xff   :  { %2890 = vst [vmem:[%s4659_s3 + $0x1e] sm:$0x3] %v689_v39  ;;  %v833_v22 = vpack.c.bf16 %v689_v39, %v689_v39  ;;  %979 = vmatpush.bf16.msra.mxu0 %v3573_v23  ;;  %992 = vmatpush.bf16.msra.mxu1 %v3583_v27  ;;  %v4792_v39 = vld [vmem:[#allocation32_spill] sm:$0xff] }
 0x100   :  { %1005 = vmatpush.bf16.msra.mxu2 %v3585_v28  ;;  %1018 = vmatpush.bf16.msra.mxu3 %v3597_v35 }
 0x101   :  { %842 = vmatmul.bf16.vlgmr.msrb.gmra.mxu0 %v833_v22  ;;  %855 = vmatmul.bf16.vlgmr.msrb.gmra.mxu1 %v833_v22 }
 0x102   :  { %868 = vmatmul.bf16.vlgmr.msrb.gmra.mxu2 %v833_v22  ;;  %881 = vmatmul.bf16.vlgmr.msrb.gmra.mxu3 %v833_v22  ;;  %v4793_v22 = vld [vmem:[#allocation33_spill] sm:$0xff] }
 0x103   :  { %980 = vmatpush.bf16.msra.mxu0 %v3609_v43  ;;  %993 = vmatpush.bf16.msra.mxu1 %v3613_v51 }
 0x104   :  { %1006 = vmatpush.bf16.msra.mxu2 %v3615_v52  ;;  %1019 = vmatpush.bf16.msra.mxu3 %v3618_v55 }
 0x107   :  { %1112 = vmatpush.bf16.msrb.mxu0 %v3620_v59  ;;  %1125 = vmatpush.bf16.msrb.mxu1 %v3622_v60 }
 0x108   :  { %1138 = vmatpush.bf16.msrb.mxu2 %v3624_v61  ;;  %1151 = vmatpush.bf16.msrb.mxu3 %v3627_v2 }
 0x10b   :  { %1113 = vmatpush.bf16.msrb.mxu0 %v3633_v18  ;;  %1126 = vmatpush.bf16.msrb.mxu1 %v4769_v41 }
 0x10c   :  { %1139 = vmatpush.bf16.msrb.mxu2 %v4770_v1  ;;  %1152 = vmatpush.bf16.msrb.mxu3 %v4771_v0 }
 0x10f   :  { %1114 = vmatpush.bf16.msrb.mxu0 %v4772_v11  ;;  %1127 = vmatpush.bf16.msrb.mxu1 %v4773_v40 }
 0x110   :  { %1140 = vmatpush.bf16.msrb.mxu2 %v4774_v20  ;;  %1153 = vmatpush.bf16.msrb.mxu3 %v4775_v42 }
 0x113   :  { %1115 = vmatpush.bf16.msrb.mxu0 %v4776_v37  ;;  %1128 = vmatpush.bf16.msrb.mxu1 %v4777_v26 }
 0x114   :  { %1141 = vmatpush.bf16.msrb.mxu2 %v4778_v10  ;;  %1154 = vmatpush.bf16.msrb.mxu3 %v4779_v53 }
 0x117   :  { %1116 = vmatpush.bf16.msrb.mxu0 %v4780_v30  ;;  %1129 = vmatpush.bf16.msrb.mxu1 %v4781_v4 }
 0x118   :  { %1142 = vmatpush.bf16.msrb.mxu2 %v4782_v36  ;;  %1155 = vmatpush.bf16.msrb.mxu3 %v4783_v48  ;;  %v4794_v48 = vld [vmem:[#allocation34_spill] sm:$0xff] }
 0x11b   :  { %1117 = vmatpush.bf16.msrb.mxu0 %v4784_v19  ;;  %1130 = vmatpush.bf16.msrb.mxu1 %v4785_v47  ;;  %v4795_v19 = vld [vmem:[#allocation35_spill] sm:$0xff] }
 0x11c   :  { %1143 = vmatpush.bf16.msrb.mxu2 %v4786_v13  ;;  %1156 = vmatpush.bf16.msrb.mxu3 %v4787_v15 }
 0x11f   :  { %1118 = vmatpush.bf16.msrb.mxu0 %v4788_v31  ;;  %1131 = vmatpush.bf16.msrb.mxu1 %v4789_v24 }
 0x120   :  { %1144 = vmatpush.bf16.msrb.mxu2 %v4790_v32  ;;  %1157 = vmatpush.bf16.msrb.mxu3 %v4791_v63  ;;  %v2891_v63 = vld [vmem:[%s4656_s0 + $0x10] sm:$0xff] }
 0x123   :  { %1119 = vmatpush.bf16.msrb.mxu0 %v4792_v39  ;;  %1132 = vmatpush.bf16.msrb.mxu1 %v4793_v22 }
 0x124   :  { %1145 = vmatpush.bf16.msrb.mxu2 %v4794_v48  ;;  %1158 = vmatpush.bf16.msrb.mxu3 %v4795_v19 }
 0x162   :  { %v704_v47 = vpop.f32.mrf.mxu0  ;;  %v717_v13 = vpop.f32.mrf.mxu1 }
 0x163   :  { %v751_v36 = vrot.slane %v717_v13, 6 }
 0x165   :  { %v754_v39 = vsel %vm315_vm0, %v704_v47, %v751_v36 }
 0x169   :  { %v730_v15 = vpop.f32.mrf.mxu2  ;;  %v743_v4 = vpop.f32.mrf.mxu3 }
 0x16a   :  { %v752_v31 = vrot.slane %v730_v15, 4  ;;  %v753_v30 = vrot.slane %v743_v4, 2  ;;  %v706_v24 = vpop.f32.mrf.mxu0  ;;  %v719_v53 = vpop.f32.mrf.mxu1 }
 0x16c   :  { %v755_v22 = vsel %vm317_vm1, %v752_v31, %v753_v30 }
 0x16d   :  { %v756_v48 = vsel %vm319_vm2, %v754_v39, %v755_v22 }
 0x16e   :  { %v758_v19 = vadd.f32 %v2891_v63, %v756_v48 }
 0x170   :  { %v2892_v32 = vmul.f32 -1.442695, %v758_v19  ;;  %v779_v10 = vrot.slane %v758_v19, 2  ;;  %v803_v13 = vrot.slane %v758_v19, 6 }
 0x171   :  { %v732_v26 = vpop.f32.mrf.mxu2  ;;  %v745_v37 = vpop.f32.mrf.mxu3 }
 0x172   :  { %3059 = vpow2.f32 %v2892_v32  ;;  %v2893_v4 = vmul.f32 -1.442695, %v779_v10  ;;  %v2894_v15 = vmul.f32 -1.442695, %v803_v13  ;;  %v800_v10 = vrot.slane %v758_v19, 4  ;;  %v2896_v19 = vld [vmem:[%s4656_s0 + $0x68] sm:$0xff] }
 0x174   :  { %3061 = vpow2.f32 %v2893_v4 }
 0x175   :  { %3063 = vpow2.f32 %v2894_v15 }
 0x178   :  { %v3060_v53 = vpop.eup %3059 }
 0x179   :  { %v762_v24 = vadd.f32 1.0, %v3060_v53 }
 0x17a   :  { %v3062_v42 = vpop.eup %3061 }
 0x17b   :  { %v3064_v20 = vpop.eup %3063  ;;  %3065 = vrcp.f32 %v762_v24  ;;  %v784_v36 = vadd.f32 1.0, %v3062_v42  ;;  %v774_v42 = vand.u32 2147483648, %v762_v24  ;;  %vm768_vm15 = vweird.f32 %v762_v24 }
 0x17c   :  { %v3929_v30 = vadd.f32 1.0, %v3064_v20 }
 0x17d   :  { %3067 = vrcp.f32 %v784_v36  ;;  %vm790_vm6 = vweird.f32 %v784_v36 }
 0x17e   :  { %3069 = vrcp.f32 %v3929_v30  ;;  %v843_v48 = vpop.f32.mrf.mxu0  ;;  %v856_v47 = vpop.f32.mrf.mxu1  ;;  %vm814_vm10 = vweird.f32 %v3929_v30 }
 0x17f   :  { %v890_v22 = vrot.slane %v856_v47, 6  ;;  %3071 = vtanh.f32 %v800_v10  ;;  %v772_v47 = vand.u32 2147483647, %v762_v24 }
 0x181   :  { %v3066_v26 = vpop.eup %3065  ;;  %v893_v41 = vsel %vm315_vm0, %v843_v48, %v890_v22  ;;  %vm773_vm5 = vcmp.eq.f32.partialorder %v772_v47, 8.507059e+37 }
 0x182   :  { %v764_v37 = vmul.f32 %v3066_v26, %v762_v24  ;;  %vm769_vm14 = vweird.f32 %v3066_v26 }
 0x183   :  { %v3068_v31 = vpop.eup %3067  ;;  %vm770_vm3 = vmor %vm768_vm15, %vm769_vm14 }
 0x184   :  { %v3932_v32 = vpop.eup %3069  ;;  %v765_v63 = vsub.f32 1.0, %v764_v37  ;;  %v786_v39 = vmul.f32 %v3068_v31, %v784_v36  ;;  %v796_v37 = vand.u32 2147483648, %v784_v36  ;;  %vm791_vm4 = vweird.f32 %v3068_v31 }
 0x185   :  { %v869_v13 = vpop.f32.mrf.mxu2  ;;  %v882_v4 = vpop.f32.mrf.mxu3  ;;  %v810_v20 = vmul.f32 %v3932_v32, %v3929_v30  ;;  %vm792_vm7 = vmor %vm790_vm6, %vm791_vm4  ;;  %vm815_vm9 = vweird.f32 %v3932_v32 }
 0x186   :  { %v787_v15 = vsub.f32 1.0, %v786_v39  ;;  %v891_v53 = vrot.slane %v869_v13, 4  ;;  %v892_v40 = vrot.slane %v882_v4, 2  ;;  %v845_v11 = vpop.f32.mrf.mxu0  ;;  %v858_v0 = vpop.f32.mrf.mxu1  ;;  %v766_v1 = vmul.f32 %v3066_v26, %v765_v63  ;;  %vm816_vm11 = vmor %vm814_vm10, %vm815_vm9 }
 0x187   :  { %v794_v0 = vand.u32 2147483647, %v784_v36  ;;  %v811_v11 = vsub.f32 1.0, %v810_v20  ;;  %v775_v13 = vor.u32 1.1754944e-38, %v774_v42  ;;  %v797_v24 = vor.u32 1.1754944e-38, %v796_v37 }
 0x188   :  { %v894_v18 = vsel %vm317_vm1, %v891_v53, %v892_v40  ;;  %v767_v2 = vadd.f32 %v3066_v26, %v766_v1  ;;  %v788_v61 = vmul.f32 %v3068_v31, %v787_v15 }
 0x189   :  { %v895_v39 = vsel %vm319_vm2, %v893_v41, %v894_v18  ;;  %v3072_v41 = vpop.eup %3071  ;;  %vm795_vm8 = vcmp.eq.f32.partialorder %v794_v0, 8.507059e+37 }
 0x18a   :  { %v3943_v10 = vadd.f32 %v2896_v19, %v895_v39  ;;  %v771_v63 = vsel %vm770_vm3, %v3066_v26, %v767_v2  ;;  %v789_v4 = vadd.f32 %v3068_v31, %v788_v61  ;;  %v812_v2 = vmul.f32 %v3932_v32, %v811_v11 }
 0x18b   :  { %v776_v18 = vsel %vm773_vm5, %v775_v13, %v771_v63  ;;  %v818_v39 = vand.u32 2147483647, %v3929_v30 }
 0x18c   :  { %v2897_v48 = vmul.f32 -1.442695, %v3943_v10  ;;  %v918_v1 = vrot.slane %v3943_v10, 2  ;;  %v942_v40 = vrot.slane %v3943_v10, 6  ;;  %v793_v20 = vsel %vm792_vm7, %v3068_v31, %v789_v4 }
 0x18d   :  { %v871_v22 = vpop.f32.mrf.mxu2  ;;  %v884_v15 = vpop.f32.mrf.mxu3  ;;  %v798_v36 = vsel %vm795_vm8, %v797_v24, %v793_v20  ;;  %v825_v53 = vmul.f32 %v3072_v41, %v776_v18  ;;  %v813_v47 = vadd.f32 %v3932_v32, %v812_v2  ;;  %v820_v31 = vand.u32 2147483648, %v3929_v30 }
 0x18e   :  { %3073 = vpow2.f32 %v2897_v48  ;;  %v2898_v61 = vmul.f32 -1.442695, %v918_v1  ;;  %v2899_v26 = vmul.f32 -1.442695, %v942_v40  ;;  %v824_v42 = vmul.f32 %v798_v36, %v3828_v49 }
 0x18f   :  { %v817_v11 = vsel %vm816_vm11, %v3932_v32, %v813_v47  ;;  %v821_v4 = vor.u32 1.1754944e-38, %v820_v31  ;;  %vm819_vm12 = vcmp.eq.f32.partialorder %v818_v39, 8.507059e+37  ;;  %v939_v22 = vrot.slane %v3943_v10, 4 }
 0x190   :  { %3075 = vpow2.f32 %v2898_v61  ;;  %v3950_v19 = vadd.f32 %v825_v53, %v824_v42 }
 0x191   :  { %3077 = vpow2.f32 %v2899_v26  ;;  %v822_v1 = vsel %vm819_vm12, %v821_v4, %v817_v11 }
 0x192   :  { %3079 = vtanh.f32 %v3950_v19 }
 0x194   :  { %v3074_v37 = vpop.eup %3073 }
 0x195   :  { %v901_v0 = vadd.f32 1.0, %v3074_v37 }
 0x196   :  { %v3076_v49 = vpop.eup %3075 }
 0x197   :  { %v3078_v63 = vpop.eup %3077  ;;  %3081 = vrcp.f32 %v901_v0  ;;  %v923_v13 = vadd.f32 1.0, %v3076_v49  ;;  %v913_v61 = vand.u32 2147483648, %v901_v0  ;;  %v911_v42 = vand.u32 2147483647, %v901_v0 }
 0x198   :  { %v3959_v24 = vadd.f32 1.0, %v3078_v63  ;;  %v3080_v48 = vpop.eup %3079  ;;  %vm907_vm14 = vweird.f32 %v901_v0 }
 0x199   :  { %3083 = vrcp.f32 %v923_v13  ;;  %v828_v40 = vmul.f32 %v3080_v48, %v822_v1  ;;  %v935_v53 = vand.u32 2147483648, %v923_v13  ;;  %v933_v37 = vand.u32 2147483647, %v923_v13 }
 0x19a   :  { %3085 = vrcp.f32 %v3959_v24  ;;  %v914_v39 = vor.u32 1.1754944e-38, %v913_v61  ;;  %vm912_vm4 = vcmp.eq.f32.partialorder %v911_v42, 8.507059e+37  ;;  %vm929_vm5 = vweird.f32 %v923_v13  ;;  %v4798_v42 = vld [vmem:[#allocation8_spill] sm:$0xff] }
 0x19b   :  { %2895 = vst [vmem:[%s4659_s3 + $0x4] sm:$0x3] %v828_v40  ;;  %v972_v30 = vpack.c.bf16 %v828_v40, %v828_v40  ;;  %3087 = vtanh.f32 %v939_v22  ;;  %v936_v4 = vor.u32 1.1754944e-38, %v935_v53  ;;  %vm934_vm7 = vcmp.eq.f32.partialorder %v933_v37, 8.507059e+37  ;;  %v4799_v53 = vld [vmem:[#allocation9_spill] sm:$0xff]  ;;  %v4802_v37 = vld [vmem:[#allocation12_spill] sm:$0xff] }
 0x19c   :  { %v959_v22 = vand.u32 2147483648, %v3959_v24  ;;  %vm953_vm9 = vweird.f32 %v3959_v24 }
 0x19d   :  { %v3082_v18 = vpop.eup %3081  ;;  %981 = vmatmul.bf16.vlgmr.msra.gmra.mxu0 %v972_v30  ;;  %994 = vmatmul.bf16.vlgmr.msra.gmra.mxu1 %v972_v30 }
 0x19e   :  { %v903_v32 = vmul.f32 %v3082_v18, %v901_v0  ;;  %1007 = vmatmul.bf16.vlgmr.msra.gmra.mxu2 %v972_v30  ;;  %1020 = vmatmul.bf16.vlgmr.msra.gmra.mxu3 %v972_v30  ;;  %vm908_vm13 = vweird.f32 %v3082_v18 }
 0x19f   :  { %v3084_v41 = vpop.eup %3083  ;;  %1251 = vmatpush.bf16.msra.mxu0 %v3345_v3  ;;  %1264 = vmatpush.bf16.msra.mxu1 %v3356_v7  ;;  %vm909_vm3 = vmor %vm907_vm14, %vm908_vm13 }
 0x1a0   :  { %v3966_v15 = vpop.eup %3085  ;;  %v904_v20 = vsub.f32 1.0, %v903_v32  ;;  %v925_v2 = vmul.f32 %v3084_v41, %v923_v13  ;;  %1277 = vmatpush.bf16.msra.mxu2 %v3358_v8  ;;  %1290 = vmatpush.bf16.msra.mxu3 %v3370_v12  ;;  %vm930_vm15 = vweird.f32 %v3084_v41 }
 0x1a1   :  { %v949_v26 = vmul.f32 %v3966_v15, %v3959_v24  ;;  %vm931_vm6 = vmor %vm929_vm5, %vm930_vm15  ;;  %v3088_v1 = vpop.eup %3087  ;;  %vm954_vm8 = vweird.f32 %v3966_v15 }
 0x1a2   :  { %v926_v36 = vsub.f32 1.0, %v925_v2  ;;  %v905_v10 = vmul.f32 %v3082_v18, %v904_v20  ;;  %vm955_vm10 = vmor %vm953_vm9, %vm954_vm8  ;;  %v960_v2 = vor.u32 1.1754944e-38, %v959_v22  ;;  %v4816_v22 = vld [vmem:[#allocation26_spill] sm:$0xff] }
 0x1a3   :  { %1252 = vmatpush.bf16.msra.mxu0 %v3383_v16  ;;  %1265 = vmatpush.bf16.msra.mxu1 %v3385_v17  ;;  %v950_v49 = vsub.f32 1.0, %v949_v26 }
 0x1a4   :  { %v906_v47 = vadd.f32 %v3082_v18, %v905_v10  ;;  %v927_v31 = vmul.f32 %v3084_v41, %v926_v36  ;;  %1278 = vmatpush.bf16.msra.mxu2 %v3397_v21  ;;  %1291 = vmatpush.bf16.msra.mxu3 %v3408_v25  ;;  %v4796_v36 = vld [vmem:[#allocation6_spill] sm:$0xff]  ;;  %v4797_v10 = vld [vmem:[#allocation7_spill] sm:$0xff] }
 0x1a5   :  { %v951_v30 = vmul.f32 %v3966_v15, %v950_v49  ;;  %v4804_v49 = vld [vmem:[#allocation14_spill] sm:$0xff] }
 0x1a6   :  { %v910_v11 = vsel %vm909_vm3, %v3082_v18, %v906_v47  ;;  %v928_v63 = vadd.f32 %v3084_v41, %v927_v31  ;;  %v4800_v47 = vld [vmem:[#allocation10_spill] sm:$0xff]  ;;  %v4801_v31 = vld [vmem:[#allocation11_spill] sm:$0xff] }
 0x1a7   :  { %v915_v0 = vsel %vm912_vm4, %v914_v39, %v910_v11  ;;  %1253 = vmatpush.bf16.msra.mxu0 %v3420_v29  ;;  %1266 = vmatpush.bf16.msra.mxu1 %v3433_v33  ;;  %v4803_v39 = vld [vmem:[#allocation13_spill] sm:$0xff]  ;;  %v4805_v11 = vld [vmem:[#allocation15_spill] sm:$0xff] }
 0x1a8   :  { %v932_v48 = vsel %vm931_vm6, %v3084_v41, %v928_v63  ;;  %1279 = vmatpush.bf16.msra.mxu2 %v3435_v34  ;;  %1292 = vmatpush.bf16.msra.mxu3 %v3447_v38  ;;  %v964_v13 = vmul.f32 %v3088_v1, %v915_v0  ;;  %v952_v41 = vadd.f32 %v3966_v15, %v951_v30  ;;  %v4806_v63 = vld [vmem:[#allocation16_spill] sm:$0xff]  ;;  %v4807_v0 = vld [vmem:[#allocation17_spill] sm:$0xff]  ;;  %v4812_v30 = vld [vmem:[#allocation22_spill] sm:$0xff] }
 0x1a9   :  { %v937_v40 = vsel %vm934_vm7, %v936_v4, %v932_v48  ;;  %v4808_v4 = vld [vmem:[#allocation18_spill] sm:$0xff]  ;;  %v4809_v48 = vld [vmem:[#allocation19_spill] sm:$0xff]  ;;  %v4810_v1 = vld [vmem:[#allocation20_spill] sm:$0xff] }
 0x1aa   :  { %v963_v18 = vmul.f32 %v937_v40, %v3861_v54  ;;  %v957_v54 = vand.u32 2147483647, %v3959_v24  ;;  %v956_v20 = vsel %vm955_vm10, %v3966_v15, %v952_v41  ;;  %v4811_v40 = vld [vmem:[#allocation21_spill] sm:$0xff] }
 0x1ab   :  { %1254 = vmatpush.bf16.msra.mxu0 %v3465_v44  ;;  %1267 = vmatpush.bf16.msra.mxu1 %v3469_v45  ;;  %v4815_v41 = vld [vmem:[#allocation25_spill] sm:$0xff] }
 0x1ac   :  { %v3984_v32 = vadd.f32 %v964_v13, %v963_v18  ;;  %1280 = vmatpush.bf16.msra.mxu2 %v3471_v46  ;;  %1293 = vmatpush.bf16.msra.mxu3 %v3483_v50  ;;  %vm958_vm11 = vcmp.eq.f32.partialorder %v957_v54, 8.507059e+37  ;;  %v4813_v18 = vld [vmem:[#allocation23_spill] sm:$0xff]  ;;  %v4814_v13 = vld [vmem:[#allocation24_spill] sm:$0xff] }
 0x1ad   :  { %v961_v26 = vsel %vm958_vm11, %v960_v2, %v956_v20  ;;  %v4817_v54 = vld [vmem:[#allocation27_spill] sm:$0xff]  ;;  %v4818_v20 = vld [vmem:[#allocation28_spill] sm:$0xff]  ;;  %v4819_v2 = vld [vmem:[#allocation29_spill] sm:$0xff] }
 0x1ae   :  { %3089 = vtanh.f32 %v3984_v32 }
 0x1af   :  { %1255 = vmatpush.bf16.msra.mxu0 %v3501_v56  ;;  %1268 = vmatpush.bf16.msra.mxu1 %v3505_v57 }
 0x1b0   :  { %1281 = vmatpush.bf16.msra.mxu2 %v3507_v58  ;;  %1294 = vmatpush.bf16.msra.mxu3 %v3519_v62 }
 0x1b3   :  { %1256 = vmatpush.bf16.msra.mxu0 %v3537_v5  ;;  %1269 = vmatpush.bf16.msra.mxu1 %v3541_v6 }
 0x1b4   :  { %v3090_v61 = vpop.eup %3089  ;;  %1282 = vmatpush.bf16.msra.mxu2 %v3543_v9  ;;  %1295 = vmatpush.bf16.msra.mxu3 %v3555_v14 }
 0x1b5   :  { %v967_v24 = vmul.f32 %v3090_v61, %v961_v26  ;;  %v4820_v61 = vld [vmem:[#allocation30_spill] sm:$0xff]  ;;  %v4821_v26 = vld [vmem:[#allocation31_spill] sm:$0xff] }
 0x1b7   :  { %2900 = vst [vmem:[%s4659_s3 + $0x1a] sm:$0x3] %v967_v24  ;;  %v1111_v15 = vpack.c.bf16 %v967_v24, %v967_v24  ;;  %1257 = vmatpush.bf16.msra.mxu0 %v3573_v23  ;;  %1270 = vmatpush.bf16.msra.mxu1 %v3583_v27  ;;  %v4822_v24 = vld [vmem:[#allocation32_spill] sm:$0xff] }
 0x1b8   :  { %1283 = vmatpush.bf16.msra.mxu2 %v3585_v28  ;;  %1296 = vmatpush.bf16.msra.mxu3 %v3597_v35 }
 0x1b9   :  { %1120 = vmatmul.bf16.vlgmr.msrb.gmra.mxu0 %v1111_v15  ;;  %1133 = vmatmul.bf16.vlgmr.msrb.gmra.mxu1 %v1111_v15 }
 0x1ba   :  { %1146 = vmatmul.bf16.vlgmr.msrb.gmra.mxu2 %v1111_v15  ;;  %1159 = vmatmul.bf16.vlgmr.msrb.gmra.mxu3 %v1111_v15  ;;  %v4823_v15 = vld [vmem:[#allocation33_spill] sm:$0xff] }
 0x1bb   :  { %1258 = vmatpush.bf16.msra.mxu0 %v3609_v43  ;;  %1271 = vmatpush.bf16.msra.mxu1 %v3613_v51 }
 0x1bc   :  { %1284 = vmatpush.bf16.msra.mxu2 %v3615_v52  ;;  %1297 = vmatpush.bf16.msra.mxu3 %v3618_v55 }
 0x1bf   :  { %1390 = vmatpush.bf16.msrb.mxu0 %v3620_v59  ;;  %1403 = vmatpush.bf16.msrb.mxu1 %v3622_v60 }
 0x1c0   :  { %1416 = vmatpush.bf16.msrb.mxu2 %v4796_v36  ;;  %1429 = vmatpush.bf16.msrb.mxu3 %v4797_v10 }
 0x1c3   :  { %1391 = vmatpush.bf16.msrb.mxu0 %v4798_v42  ;;  %1404 = vmatpush.bf16.msrb.mxu1 %v4799_v53 }
 0x1c4   :  { %1417 = vmatpush.bf16.msrb.mxu2 %v4800_v47  ;;  %1430 = vmatpush.bf16.msrb.mxu3 %v4801_v31 }
 0x1c7   :  { %1392 = vmatpush.bf16.msrb.mxu0 %v4802_v37  ;;  %1405 = vmatpush.bf16.msrb.mxu1 %v4803_v39 }
 0x1c8   :  { %1418 = vmatpush.bf16.msrb.mxu2 %v4804_v49  ;;  %1431 = vmatpush.bf16.msrb.mxu3 %v4805_v11 }
 0x1cb   :  { %1393 = vmatpush.bf16.msrb.mxu0 %v4806_v63  ;;  %1406 = vmatpush.bf16.msrb.mxu1 %v4807_v0 }
 0x1cc   :  { %1419 = vmatpush.bf16.msrb.mxu2 %v4808_v4  ;;  %1432 = vmatpush.bf16.msrb.mxu3 %v4809_v48 }
 0x1cf   :  { %1394 = vmatpush.bf16.msrb.mxu0 %v4810_v1  ;;  %1407 = vmatpush.bf16.msrb.mxu1 %v4811_v40 }
 0x1d0   :  { %1420 = vmatpush.bf16.msrb.mxu2 %v4812_v30  ;;  %1433 = vmatpush.bf16.msrb.mxu3 %v4813_v18  ;;  %v4824_v18 = vld [vmem:[#allocation34_spill] sm:$0xff] }
 0x1d3   :  { %1395 = vmatpush.bf16.msrb.mxu0 %v4814_v13  ;;  %1408 = vmatpush.bf16.msrb.mxu1 %v4815_v41  ;;  %v4825_v13 = vld [vmem:[#allocation35_spill] sm:$0xff] }
 0x1d4   :  { %1421 = vmatpush.bf16.msrb.mxu2 %v4816_v22  ;;  %1434 = vmatpush.bf16.msrb.mxu3 %v4817_v54 }
 0x1d7   :  { %1396 = vmatpush.bf16.msrb.mxu0 %v4818_v20  ;;  %1409 = vmatpush.bf16.msrb.mxu1 %v4819_v2 }
 0x1d8   :  { %1422 = vmatpush.bf16.msrb.mxu2 %v4820_v61  ;;  %1435 = vmatpush.bf16.msrb.mxu3 %v4821_v26  ;;  %v2901_v26 = vld [vmem:[%s4656_s0 + $0x20] sm:$0xff] }
 0x1db   :  { %1397 = vmatpush.bf16.msrb.mxu0 %v4822_v24  ;;  %1410 = vmatpush.bf16.msrb.mxu1 %v4823_v15 }
 0x1dc   :  { %1423 = vmatpush.bf16.msrb.mxu2 %v4824_v18  ;;  %1436 = vmatpush.bf16.msrb.mxu3 %v4825_v13 }
 0x21a   :  { %v982_v41 = vpop.f32.mrf.mxu0  ;;  %v995_v22 = vpop.f32.mrf.mxu1 }
 0x21b   :  { %v1029_v30 = vrot.slane %v995_v22, 6 }
 0x21d   :  { %v1032_v24 = vsel %vm315_vm0, %v982_v41, %v1029_v30 }
 0x221   :  { %v1008_v54 = vpop.f32.mrf.mxu2  ;;  %v1021_v40 = vpop.f32.mrf.mxu3 }
 0x222   :  { %v1030_v20 = vrot.slane %v1008_v54, 4  ;;  %v1031_v1 = vrot.slane %v1021_v40, 2  ;;  %v984_v2 = vpop.f32.mrf.mxu0  ;;  %v997_v48 = vpop.f32.mrf.mxu1 }
 0x224   :  { %v1033_v15 = vsel %vm317_vm1, %v1030_v20, %v1031_v1 }
 0x225   :  { %v1034_v18 = vsel %vm319_vm2, %v1032_v24, %v1033_v15 }
 0x226   :  { %v1036_v13 = vadd.f32 %v2901_v26, %v1034_v18 }
 0x228   :  { %v2902_v61 = vmul.f32 -1.442695, %v1036_v13  ;;  %v1057_v4 = vrot.slane %v1036_v13, 2  ;;  %v1081_v22 = vrot.slane %v1036_v13, 6 }
 0x229   :  { %v1010_v0 = vpop.f32.mrf.mxu2  ;;  %v1023_v63 = vpop.f32.mrf.mxu3 }
 0x22a   :  { %3091 = vpow2.f32 %v2902_v61  ;;  %v2903_v40 = vmul.f32 -1.442695, %v1057_v4  ;;  %v2904_v54 = vmul.f32 -1.442695, %v1081_v22  ;;  %v1078_v0 = vrot.slane %v1036_v13, 4 }
 0x22c   :  { %3093 = vpow2.f32 %v2903_v40 }
 0x22d   :  { %3095 = vpow2.f32 %v2904_v54 }
 0x230   :  { %v3092_v48 = vpop.eup %3091 }
 0x231   :  { %v1040_v2 = vadd.f32 1.0, %v3092_v48 }
 0x232   :  { %v3094_v11 = vpop.eup %3093 }
 0x233   :  { %v3096_v49 = vpop.eup %3095  ;;  %3097 = vrcp.f32 %v1040_v2  ;;  %v1062_v30 = vadd.f32 1.0, %v3094_v11  ;;  %vm1046_vm12 = vweird.f32 %v1040_v2  ;;  %v1052_v37 = vand.u32 2147483648, %v1040_v2 }
 0x234   :  { %v4054_v1 = vadd.f32 1.0, %v3096_v49  ;;  %v1050_v49 = vand.u32 2147483647, %v1040_v2 }
 0x235   :  { %3099 = vrcp.f32 %v1062_v30  ;;  %v1053_v36 = vor.u32 1.1754944e-38, %v1052_v37  ;;  %vm1068_vm4 = vweird.f32 %v1062_v30 }
 0x236   :  { %v1121_v18 = vpop.f32.mrf.mxu0  ;;  %v1134_v41 = vpop.f32.mrf.mxu1  ;;  %3101 = vrcp.f32 %v4054_v1  ;;  %vm1051_vm3 = vcmp.eq.f32.partialorder %v1050_v49, 8.507059e+37  ;;  %vm1092_vm8 = vweird.f32 %v4054_v1 }
 0x237   :  { %3103 = vtanh.f32 %v1078_v0  ;;  %v1168_v61 = vrot.slane %v1134_v41, 6  ;;  %v2906_v41 = vld [vmem:[%s4656_s0 + $0x58] sm:$0xff] }
 0x239   :  { %v3098_v63 = vpop.eup %3097  ;;  %v1171_v47 = vsel %vm315_vm0, %v1121_v18, %v1168_v61 }
 0x23a   :  { %v1042_v20 = vmul.f32 %v3098_v63, %v1040_v2  ;;  %vm1047_vm13 = vweird.f32 %v3098_v63 }
 0x23b   :  { %v3100_v4 = vpop.eup %3099  ;;  %vm1048_vm15 = vmor %vm1046_vm12, %vm1047_vm13 }
 0x23c   :  { %v4057_v26 = vpop.eup %3101  ;;  %v1043_v24 = vsub.f32 1.0, %v1042_v20  ;;  %v1064_v15 = vmul.f32 %v3100_v4, %v1062_v30  ;;  %v1072_v20 = vand.u32 2147483647, %v1062_v30  ;;  %vm1069_vm14 = vweird.f32 %v3100_v4 }
 0x23d   :  { %v1147_v22 = vpop.f32.mrf.mxu2  ;;  %v1160_v40 = vpop.f32.mrf.mxu3  ;;  %v1088_v13 = vmul.f32 %v4057_v26, %v4054_v1  ;;  %vm1070_vm5 = vmor %vm1068_vm4, %vm1069_vm14  ;;  %vm1093_vm7 = vweird.f32 %v4057_v26 }
 0x23e   :  { %v1169_v11 = vrot.slane %v1147_v22, 4  ;;  %v1170_v54 = vrot.slane %v1160_v40, 2  ;;  %v1123_v48 = vpop.f32.mrf.mxu0  ;;  %v1136_v39 = vpop.f32.mrf.mxu1  ;;  %v1065_v31 = vsub.f32 1.0, %v1064_v15  ;;  %v1044_v0 = vmul.f32 %v3098_v63, %v1043_v24  ;;  %vm1094_vm9 = vmor %vm1092_vm8, %vm1093_vm7 }
 0x23f   :  { %v1074_v22 = vand.u32 2147483648, %v1062_v30  ;;  %v1089_v42 = vsub.f32 1.0, %v1088_v13  ;;  %v3104_v10 = vpop.eup %3103  ;;  %vm1073_vm6 = vcmp.eq.f32.partialorder %v1072_v20, 8.507059e+37 }
 0x240   :  { %v1172_v53 = vsel %vm317_vm1, %v1169_v11, %v1170_v54  ;;  %v1045_v40 = vadd.f32 %v3098_v63, %v1044_v0  ;;  %v1066_v48 = vmul.f32 %v3100_v4, %v1065_v31 }
 0x241   :  { %v1173_v39 = vsel %vm319_vm2, %v1171_v47, %v1172_v53  ;;  %v1075_v53 = vor.u32 1.1754944e-38, %v1074_v22  ;;  %v1090_v2 = vmul.f32 %v4057_v26, %v1089_v42  ;;  %v1096_v42 = vand.u32 2147483647, %v4054_v1 }
 0x242   :  { %v4067_v15 = vadd.f32 %v2906_v41, %v1173_v39  ;;  %v1049_v24 = vsel %vm1048_vm15, %v3098_v63, %v1045_v40  ;;  %v1067_v55 = vadd.f32 %v3100_v4, %v1066_v48 }
 0x243   :  { %v1054_v54 = vsel %vm1051_vm3, %v1053_v36, %v1049_v24  ;;  %v1091_v22 = vadd.f32 %v4057_v26, %v1090_v2  ;;  %vm1097_vm10 = vcmp.eq.f32.partialorder %v1096_v42, 8.507059e+37 }
 0x244   :  { %v2907_v18 = vmul.f32 -1.442695, %v4067_v15  ;;  %v1196_v61 = vrot.slane %v4067_v15, 2  ;;  %v1220_v11 = vrot.slane %v4067_v15, 6  ;;  %v1071_v13 = vsel %vm1070_vm5, %v3100_v4, %v1067_v55 }
 0x245   :  { %v1149_v47 = vpop.f32.mrf.mxu2  ;;  %v1162_v31 = vpop.f32.mrf.mxu3  ;;  %v1076_v30 = vsel %vm1073_vm6, %v1075_v53, %v1071_v13  ;;  %v1103_v41 = vmul.f32 %v3104_v10, %v1054_v54  ;;  %v1098_v55 = vand.u32 2147483648, %v4054_v1  ;;  %v1095_v10 = vsel %vm1094_vm9, %v4057_v26, %v1091_v22 }
 0x246   :  { %3105 = vpow2.f32 %v2907_v18  ;;  %v2908_v37 = vmul.f32 -1.442695, %v1196_v61  ;;  %v2909_v63 = vmul.f32 -1.442695, %v1220_v11  ;;  %v1102_v49 = vmul.f32 %v1076_v30, %v3950_v19 }
 0x247   :  { %v1099_v40 = vor.u32 1.1754944e-38, %v1098_v55  ;;  %v1217_v47 = vrot.slane %v4067_v15, 4 }
 0x248   :  { %3107 = vpow2.f32 %v2908_v37  ;;  %v4076_v0 = vadd.f32 %v1103_v41, %v1102_v49 }
 0x249   :  { %3109 = vpow2.f32 %v2909_v63  ;;  %v1100_v18 = vsel %vm1097_vm10, %v1099_v40, %v1095_v10 }
 0x24a   :  { %3111 = vtanh.f32 %v4076_v0 }
 0x24c   :  { %v3106_v36 = vpop.eup %3105 }
 0x24d   :  { %v1179_v4 = vadd.f32 1.0, %v3106_v36 }
 0x24e   :  { %v3108_v19 = vpop.eup %3107 }
 0x24f   :  { %v3110_v20 = vpop.eup %3109  ;;  %3113 = vrcp.f32 %v1179_v4  ;;  %v1201_v39 = vadd.f32 1.0, %v3108_v19  ;;  %v1191_v2 = vand.u32 2147483648, %v1179_v4  ;;  %v1189_v30 = vand.u32 2147483647, %v1179_v4 }
 0x250   :  { %v4085_v48 = vadd.f32 1.0, %v3110_v20  ;;  %v3112_v24 = vpop.eup %3111  ;;  %vm1185_vm12 = vweird.f32 %v1179_v4 }
 0x251   :  { %3115 = vrcp.f32 %v1201_v39  ;;  %v1106_v61 = vmul.f32 %v3112_v24, %v1100_v18  ;;  %v1213_v49 = vand.u32 2147483648, %v1201_v39  ;;  %v1211_v55 = vand.u32 2147483647, %v1201_v39 }
 0x252   :  { %3117 = vrcp.f32 %v4085_v48  ;;  %v1192_v36 = vor.u32 1.1754944e-38, %v1191_v2  ;;  %vm1190_vm15 = vcmp.eq.f32.partialorder %v1189_v30, 8.507059e+37  ;;  %vm1207_vm3 = vweird.f32 %v1201_v39  ;;  %v4829_v30 = vld [vmem:[#allocation8_spill] sm:$0xff] }
 0x253   :  { %2905 = vst [vmem:[%s4659_s3 + $0x8] sm:$0x3] %v1106_v61  ;;  %v1250_v1 = vpack.c.bf16 %v1106_v61, %v1106_v61  ;;  %3119 = vtanh.f32 %v1217_v47  ;;  %v1214_v20 = vor.u32 1.1754944e-38, %v1213_v49  ;;  %vm1212_vm5 = vcmp.eq.f32.partialorder %v1211_v55, 8.507059e+37  ;;  %v4830_v49 = vld [vmem:[#allocation9_spill] sm:$0xff]  ;;  %v4833_v55 = vld [vmem:[#allocation12_spill] sm:$0xff] }
 0x254   :  { %vm1231_vm7 = vweird.f32 %v4085_v48 }
 0x255   :  { %v3114_v11 = vpop.eup %3113  ;;  %1259 = vmatmul.bf16.vlgmr.msra.gmra.mxu0 %v1250_v1  ;;  %1272 = vmatmul.bf16.vlgmr.msra.gmra.mxu1 %v1250_v1 }
 0x256   :  { %v1181_v26 = vmul.f32 %v3114_v11, %v1179_v4  ;;  %1285 = vmatmul.bf16.vlgmr.msra.gmra.mxu2 %v1250_v1  ;;  %1298 = vmatmul.bf16.vlgmr.msra.gmra.mxu3 %v1250_v1  ;;  %vm1186_vm11 = vweird.f32 %v3114_v11 }
 0x257   :  { %v3116_v53 = vpop.eup %3115  ;;  %1528 = vmatpush.bf16.msra.mxu0 %v3345_v3  ;;  %1541 = vmatpush.bf16.msra.mxu1 %v3356_v7  ;;  %vm1187_vm14 = vmor %vm1185_vm12, %vm1186_vm11 }
 0x258   :  { %v4092_v31 = vpop.eup %3117  ;;  %v1182_v54 = vsub.f32 1.0, %v1181_v26  ;;  %v1203_v13 = vmul.f32 %v3116_v53, %v1201_v39  ;;  %1554 = vmatpush.bf16.msra.mxu2 %v3358_v8  ;;  %1567 = vmatpush.bf16.msra.mxu3 %v3370_v12  ;;  %vm1208_vm13 = vweird.f32 %v3116_v53 }
 0x259   :  { %v1227_v37 = vmul.f32 %v4092_v31, %v4085_v48  ;;  %vm1209_vm4 = vmor %vm1207_vm3, %vm1208_vm13  ;;  %v3120_v24 = vpop.eup %3119  ;;  %vm1232_vm6 = vweird.f32 %v4092_v31 }
 0x25a   :  { %v1204_v63 = vsub.f32 1.0, %v1203_v13  ;;  %v1183_v15 = vmul.f32 %v3114_v11, %v1182_v54  ;;  %vm1233_vm8 = vmor %vm1231_vm7, %vm1232_vm6 }
 0x25b   :  { %1529 = vmatpush.bf16.msra.mxu0 %v3383_v16  ;;  %1542 = vmatpush.bf16.msra.mxu1 %v3385_v17  ;;  %v1228_v42 = vsub.f32 1.0, %v1227_v37  ;;  %v4826_v37 = vld [vmem:[#allocation5_spill] sm:$0xff] }
 0x25c   :  { %v1184_v41 = vadd.f32 %v3114_v11, %v1183_v15  ;;  %v1205_v22 = vmul.f32 %v3116_v53, %v1204_v63  ;;  %1555 = vmatpush.bf16.msra.mxu2 %v3397_v21  ;;  %1568 = vmatpush.bf16.msra.mxu3 %v3408_v25  ;;  %v4827_v63 = vld [vmem:[#allocation6_spill] sm:$0xff]  ;;  %v4828_v15 = vld [vmem:[#allocation7_spill] sm:$0xff] }
 0x25d   :  { %v1229_v61 = vmul.f32 %v4092_v31, %v1228_v42  ;;  %v4835_v42 = vld [vmem:[#allocation14_spill] sm:$0xff] }
 0x25e   :  { %v1188_v19 = vsel %vm1187_vm14, %v3114_v11, %v1184_v41  ;;  %v1206_v10 = vadd.f32 %v3116_v53, %v1205_v22  ;;  %v4831_v41 = vld [vmem:[#allocation10_spill] sm:$0xff]  ;;  %v4832_v22 = vld [vmem:[#allocation11_spill] sm:$0xff] }
 0x25f   :  { %v1193_v4 = vsel %vm1190_vm15, %v1192_v36, %v1188_v19  ;;  %1530 = vmatpush.bf16.msra.mxu0 %v3420_v29  ;;  %1543 = vmatpush.bf16.msra.mxu1 %v3433_v33  ;;  %v1230_v26 = vadd.f32 %v4092_v31, %v1229_v61  ;;  %v4834_v36 = vld [vmem:[#allocation13_spill] sm:$0xff]  ;;  %v4836_v19 = vld [vmem:[#allocation15_spill] sm:$0xff]  ;;  %v4843_v61 = vld [vmem:[#allocation22_spill] sm:$0xff] }
 0x260   :  { %v1210_v40 = vsel %vm1209_vm4, %v3116_v53, %v1206_v10  ;;  %1556 = vmatpush.bf16.msra.mxu2 %v3435_v34  ;;  %1569 = vmatpush.bf16.msra.mxu3 %v3447_v38  ;;  %v1242_v39 = vmul.f32 %v3120_v24, %v1193_v4  ;;  %v1237_v53 = vand.u32 2147483648, %v4085_v48  ;;  %v4837_v10 = vld [vmem:[#allocation16_spill] sm:$0xff]  ;;  %v4838_v4 = vld [vmem:[#allocation17_spill] sm:$0xff] }
 0x261   :  { %v1215_v18 = vsel %vm1212_vm5, %v1214_v20, %v1210_v40  ;;  %v1234_v47 = vsel %vm1233_vm8, %v4092_v31, %v1230_v26  ;;  %v4839_v20 = vld [vmem:[#allocation18_spill] sm:$0xff]  ;;  %v4840_v40 = vld [vmem:[#allocation19_spill] sm:$0xff]  ;;  %v4841_v24 = vld [vmem:[#allocation20_spill] sm:$0xff] }
 0x262   :  { %v1241_v1 = vmul.f32 %v1215_v18, %v3984_v32  ;;  %v1235_v32 = vand.u32 2147483647, %v4085_v48  ;;  %v1238_v54 = vor.u32 1.1754944e-38, %v1237_v53  ;;  %v4842_v18 = vld [vmem:[#allocation21_spill] sm:$0xff]  ;;  %v4847_v53 = vld [vmem:[#allocation26_spill] sm:$0xff] }
 0x263   :  { %1531 = vmatpush.bf16.msra.mxu0 %v3465_v44  ;;  %1544 = vmatpush.bf16.msra.mxu1 %v3469_v45  ;;  %v4846_v26 = vld [vmem:[#allocation25_spill] sm:$0xff] }
 0x264   :  { %v4110_v11 = vadd.f32 %v1242_v39, %v1241_v1  ;;  %1557 = vmatpush.bf16.msra.mxu2 %v3471_v46  ;;  %1570 = vmatpush.bf16.msra.mxu3 %v3483_v50  ;;  %vm1236_vm9 = vcmp.eq.f32.partialorder %v1235_v32, 8.507059e+37  ;;  %v4844_v1 = vld [vmem:[#allocation23_spill] sm:$0xff]  ;;  %v4845_v39 = vld [vmem:[#allocation24_spill] sm:$0xff] }
 0x265   :  { %v1239_v2 = vsel %vm1236_vm9, %v1238_v54, %v1234_v47  ;;  %v4848_v32 = vld [vmem:[#allocation27_spill] sm:$0xff]  ;;  %v4849_v47 = vld [vmem:[#allocation28_spill] sm:$0xff]  ;;  %v4850_v54 = vld [vmem:[#allocation29_spill] sm:$0xff] }
 0x266   :  { %3121 = vtanh.f32 %v4110_v11 }
 0x267   :  { %1532 = vmatpush.bf16.msra.mxu0 %v3501_v56  ;;  %1545 = vmatpush.bf16.msra.mxu1 %v3505_v57 }
 0x268   :  { %1558 = vmatpush.bf16.msra.mxu2 %v3507_v58  ;;  %1571 = vmatpush.bf16.msra.mxu3 %v3519_v62 }
 0x26b   :  { %1533 = vmatpush.bf16.msra.mxu0 %v3537_v5  ;;  %1546 = vmatpush.bf16.msra.mxu1 %v3541_v6 }
 0x26c   :  { %v3122_v13 = vpop.eup %3121  ;;  %1559 = vmatpush.bf16.msra.mxu2 %v3543_v9  ;;  %1572 = vmatpush.bf16.msra.mxu3 %v3555_v14 }
 0x26d   :  { %v1245_v48 = vmul.f32 %v3122_v13, %v1239_v2  ;;  %v4851_v13 = vld [vmem:[#allocation30_spill] sm:$0xff]  ;;  %v4852_v2 = vld [vmem:[#allocation31_spill] sm:$0xff] }
 0x26f   :  { %2910 = vst [vmem:[%s4659_s3 + $0x16] sm:$0x3] %v1245_v48  ;;  %v1389_v31 = vpack.c.bf16 %v1245_v48, %v1245_v48  ;;  %1534 = vmatpush.bf16.msra.mxu0 %v3573_v23  ;;  %1547 = vmatpush.bf16.msra.mxu1 %v3583_v27  ;;  %v4853_v48 = vld [vmem:[#allocation32_spill] sm:$0xff] }
 0x270   :  { %1560 = vmatpush.bf16.msra.mxu2 %v3585_v28  ;;  %1573 = vmatpush.bf16.msra.mxu3 %v3597_v35 }
 0x271   :  { %1398 = vmatmul.bf16.vlgmr.msrb.gmra.mxu0 %v1389_v31  ;;  %1411 = vmatmul.bf16.vlgmr.msrb.gmra.mxu1 %v1389_v31 }
 0x272   :  { %1424 = vmatmul.bf16.vlgmr.msrb.gmra.mxu2 %v1389_v31  ;;  %1437 = vmatmul.bf16.vlgmr.msrb.gmra.mxu3 %v1389_v31  ;;  %v4854_v31 = vld [vmem:[#allocation33_spill] sm:$0xff] }
 0x273   :  { %1535 = vmatpush.bf16.msra.mxu0 %v3609_v43  ;;  %1548 = vmatpush.bf16.msra.mxu1 %v3613_v51 }
 0x274   :  { %1561 = vmatpush.bf16.msra.mxu2 %v3615_v52  ;;  %1574 = vmatpush.bf16.msra.mxu3 %v4826_v37 }
 0x277   :  { %1665 = vmatpush.bf16.msrb.mxu0 %v3620_v59  ;;  %1678 = vmatpush.bf16.msrb.mxu1 %v3622_v60 }
 0x278   :  { %1691 = vmatpush.bf16.msrb.mxu2 %v4827_v63  ;;  %1704 = vmatpush.bf16.msrb.mxu3 %v4828_v15 }
 0x27b   :  { %1666 = vmatpush.bf16.msrb.mxu0 %v4829_v30  ;;  %1679 = vmatpush.bf16.msrb.mxu1 %v4830_v49 }
 0x27c   :  { %1692 = vmatpush.bf16.msrb.mxu2 %v4831_v41  ;;  %1705 = vmatpush.bf16.msrb.mxu3 %v4832_v22 }
 0x27f   :  { %1667 = vmatpush.bf16.msrb.mxu0 %v4833_v55  ;;  %1680 = vmatpush.bf16.msrb.mxu1 %v4834_v36 }
 0x280   :  { %1693 = vmatpush.bf16.msrb.mxu2 %v4835_v42  ;;  %1706 = vmatpush.bf16.msrb.mxu3 %v4836_v19 }
 0x283   :  { %1668 = vmatpush.bf16.msrb.mxu0 %v4837_v10  ;;  %1681 = vmatpush.bf16.msrb.mxu1 %v4838_v4 }
 0x284   :  { %1694 = vmatpush.bf16.msrb.mxu2 %v4839_v20  ;;  %1707 = vmatpush.bf16.msrb.mxu3 %v4840_v40 }
 0x287   :  { %1669 = vmatpush.bf16.msrb.mxu0 %v4841_v24  ;;  %1682 = vmatpush.bf16.msrb.mxu1 %v4842_v18 }
 0x288   :  { %1695 = vmatpush.bf16.msrb.mxu2 %v4843_v61  ;;  %1708 = vmatpush.bf16.msrb.mxu3 %v4844_v1  ;;  %v4855_v1 = vld [vmem:[#allocation34_spill] sm:$0xff] }
 0x28b   :  { %1670 = vmatpush.bf16.msrb.mxu0 %v4845_v39  ;;  %1683 = vmatpush.bf16.msrb.mxu1 %v4846_v26  ;;  %v4856_v39 = vld [vmem:[#allocation35_spill] sm:$0xff] }
 0x28c   :  { %1696 = vmatpush.bf16.msrb.mxu2 %v4847_v53  ;;  %1709 = vmatpush.bf16.msrb.mxu3 %v4848_v32 }
 0x28f   :  { %1671 = vmatpush.bf16.msrb.mxu0 %v4849_v47  ;;  %1684 = vmatpush.bf16.msrb.mxu1 %v4850_v54 }
 0x290   :  { %1697 = vmatpush.bf16.msrb.mxu2 %v4851_v13  ;;  %1710 = vmatpush.bf16.msrb.mxu3 %v4852_v2  ;;  %v2911_v2 = vld [vmem:[%s4656_s0 + $0x30] sm:$0xff] }
 0x293   :  { %1672 = vmatpush.bf16.msrb.mxu0 %v4853_v48  ;;  %1685 = vmatpush.bf16.msrb.mxu1 %v4854_v31 }
 0x294   :  { %1698 = vmatpush.bf16.msrb.mxu2 %v4855_v1  ;;  %1711 = vmatpush.bf16.msrb.mxu3 %v4856_v39 }
 0x2d2   :  { %v1260_v26 = vpop.f32.mrf.mxu0  ;;  %v1273_v53 = vpop.f32.mrf.mxu1 }
 0x2d3   :  { %v1307_v61 = vrot.slane %v1273_v53, 6 }
 0x2d5   :  { %v1310_v48 = vsel %vm315_vm0, %v1260_v26, %v1307_v61 }
 0x2d9   :  { %v1286_v32 = vpop.f32.mrf.mxu2  ;;  %v1299_v18 = vpop.f32.mrf.mxu3 }
 0x2da   :  { %v1308_v47 = vrot.slane %v1286_v32, 4  ;;  %v1309_v24 = vrot.slane %v1299_v18, 2  ;;  %v1262_v54 = vpop.f32.mrf.mxu0  ;;  %v1275_v40 = vpop.f32.mrf.mxu1 }
 0x2dc   :  { %v1311_v31 = vsel %vm317_vm1, %v1308_v47, %v1309_v24 }
 0x2dd   :  { %v1312_v1 = vsel %vm319_vm2, %v1310_v48, %v1311_v31 }
 0x2de   :  { %v1314_v39 = vadd.f32 %v2911_v2, %v1312_v1 }
 0x2e0   :  { %v2912_v13 = vmul.f32 -1.442695, %v1314_v39  ;;  %v1335_v20 = vrot.slane %v1314_v39, 2  ;;  %v1359_v53 = vrot.slane %v1314_v39, 6 }
 0x2e1   :  { %v1288_v4 = vpop.f32.mrf.mxu2  ;;  %v1301_v10 = vpop.f32.mrf.mxu3 }
 0x2e2   :  { %3123 = vpow2.f32 %v2912_v13  ;;  %v2913_v18 = vmul.f32 -1.442695, %v1335_v20  ;;  %v2914_v32 = vmul.f32 -1.442695, %v1359_v53  ;;  %v1356_v4 = vrot.slane %v1314_v39, 4 }
 0x2e4   :  { %3125 = vpow2.f32 %v2913_v18 }
 0x2e5   :  { %3127 = vpow2.f32 %v2914_v32 }
 0x2e8   :  { %v3124_v40 = vpop.eup %3123 }
 0x2e9   :  { %v1318_v54 = vadd.f32 1.0, %v3124_v40 }
 0x2ea   :  { %v3126_v19 = vpop.eup %3125 }
 0x2eb   :  { %v3128_v42 = vpop.eup %3127  ;;  %3129 = vrcp.f32 %v1318_v54  ;;  %v1340_v61 = vadd.f32 1.0, %v3126_v19  ;;  %vm1324_vm10 = vweird.f32 %v1318_v54  ;;  %v1330_v55 = vand.u32 2147483648, %v1318_v54 }
 0x2ec   :  { %v4180_v24 = vadd.f32 1.0, %v3128_v42  ;;  %v1328_v42 = vand.u32 2147483647, %v1318_v54 }
 0x2ed   :  { %3131 = vrcp.f32 %v1340_v61  ;;  %v1331_v63 = vor.u32 1.1754944e-38, %v1330_v55  ;;  %vm1346_vm15 = vweird.f32 %v1340_v61 }
 0x2ee   :  { %v1399_v1 = vpop.f32.mrf.mxu0  ;;  %v1412_v26 = vpop.f32.mrf.mxu1  ;;  %3133 = vrcp.f32 %v4180_v24  ;;  %vm1329_vm14 = vcmp.eq.f32.partialorder %v1328_v42, 8.507059e+37  ;;  %vm1370_vm6 = vweird.f32 %v4180_v24 }
 0x2ef   :  { %3135 = vtanh.f32 %v1356_v4  ;;  %v1446_v13 = vrot.slane %v1412_v26, 6  ;;  %v2916_v26 = vld [vmem:[%s4656_s0 + $0x48] sm:$0xff] }
 0x2f1   :  { %v3130_v10 = vpop.eup %3129  ;;  %v1449_v41 = vsel %vm315_vm0, %v1399_v1, %v1446_v13 }
 0x2f2   :  { %v1320_v47 = vmul.f32 %v3130_v10, %v1318_v54  ;;  %vm1325_vm11 = vweird.f32 %v3130_v10 }
 0x2f3   :  { %v3132_v20 = vpop.eup %3131  ;;  %vm1326_vm13 = vmor %vm1324_vm10, %vm1325_vm11 }
 0x2f4   :  { %v4183_v2 = vpop.eup %3133  ;;  %v1321_v48 = vsub.f32 1.0, %v1320_v47  ;;  %v1342_v31 = vmul.f32 %v3132_v20, %v1340_v61  ;;  %v1350_v47 = vand.u32 2147483647, %v1340_v61  ;;  %vm1347_vm12 = vweird.f32 %v3132_v20 }
 0x2f5   :  { %v1425_v53 = vpop.f32.mrf.mxu2  ;;  %v1438_v18 = vpop.f32.mrf.mxu3  ;;  %v1366_v39 = vmul.f32 %v4183_v2, %v4180_v24  ;;  %vm1348_vm3 = vmor %vm1346_vm15, %vm1347_vm12  ;;  %vm1371_vm5 = vweird.f32 %v4183_v2 }
 0x2f6   :  { %v1447_v19 = vrot.slane %v1425_v53, 4  ;;  %v1448_v32 = vrot.slane %v1438_v18, 2  ;;  %v1401_v40 = vpop.f32.mrf.mxu0  ;;  %v1414_v36 = vpop.f32.mrf.mxu1  ;;  %v1343_v22 = vsub.f32 1.0, %v1342_v31  ;;  %v1322_v4 = vmul.f32 %v3130_v10, %v1321_v48  ;;  %vm1372_vm7 = vmor %vm1370_vm6, %vm1371_vm5 }
 0x2f7   :  { %v1352_v53 = vand.u32 2147483648, %v1340_v61  ;;  %v1367_v30 = vsub.f32 1.0, %v1366_v39  ;;  %v3136_v15 = vpop.eup %3135  ;;  %vm1351_vm4 = vcmp.eq.f32.partialorder %v1350_v47, 8.507059e+37 }
 0x2f8   :  { %v1450_v49 = vsel %vm317_vm1, %v1447_v19, %v1448_v32  ;;  %v1323_v18 = vadd.f32 %v3130_v10, %v1322_v4  ;;  %v1344_v40 = vmul.f32 %v3132_v20, %v1343_v22 }
 0x2f9   :  { %v1451_v36 = vsel %vm319_vm2, %v1449_v41, %v1450_v49  ;;  %v1353_v49 = vor.u32 1.1754944e-38, %v1352_v53  ;;  %v1368_v54 = vmul.f32 %v4183_v2, %v1367_v30  ;;  %v1374_v30 = vand.u32 2147483647, %v4180_v24 }
 0x2fa   :  { %v4193_v31 = vadd.f32 %v2916_v26, %v1451_v36  ;;  %v1327_v48 = vsel %vm1326_vm13, %v3130_v10, %v1323_v18  ;;  %v1345_v37 = vadd.f32 %v3132_v20, %v1344_v40 }
 0x2fb   :  { %v1332_v32 = vsel %vm1329_vm14, %v1331_v63, %v1327_v48  ;;  %v1369_v53 = vadd.f32 %v4183_v2, %v1368_v54  ;;  %vm1375_vm8 = vcmp.eq.f32.partialorder %v1374_v30, 8.507059e+37 }
 0x2fc   :  { %v2917_v1 = vmul.f32 -1.442695, %v4193_v31  ;;  %v1474_v13 = vrot.slane %v4193_v31, 2  ;;  %v1498_v19 = vrot.slane %v4193_v31, 6  ;;  %v1349_v39 = vsel %vm1348_vm3, %v3132_v20, %v1345_v37 }
 0x2fd   :  { %v1427_v41 = vpop.f32.mrf.mxu2  ;;  %v1440_v22 = vpop.f32.mrf.mxu3  ;;  %v1354_v61 = vsel %vm1351_vm4, %v1353_v49, %v1349_v39  ;;  %v1381_v26 = vmul.f32 %v3136_v15, %v1332_v32  ;;  %v1376_v37 = vand.u32 2147483648, %v4180_v24  ;;  %v1373_v15 = vsel %vm1372_vm7, %v4183_v2, %v1369_v53 }
 0x2fe   :  { %3137 = vpow2.f32 %v2917_v1  ;;  %v2918_v55 = vmul.f32 -1.442695, %v1474_v13  ;;  %v2919_v10 = vmul.f32 -1.442695, %v1498_v19  ;;  %v1380_v42 = vmul.f32 %v1354_v61, %v4076_v0 }
 0x2ff   :  { %v1377_v18 = vor.u32 1.1754944e-38, %v1376_v37  ;;  %v1495_v41 = vrot.slane %v4193_v31, 4 }
 0x300   :  { %3139 = vpow2.f32 %v2918_v55  ;;  %v4202_v4 = vadd.f32 %v1381_v26, %v1380_v42 }
 0x301   :  { %3141 = vpow2.f32 %v2919_v10  ;;  %v1378_v1 = vsel %vm1375_vm8, %v1377_v18, %v1373_v15 }
 0x302   :  { %3143 = vtanh.f32 %v4202_v4 }
 0x304   :  { %v3138_v63 = vpop.eup %3137 }
 0x305   :  { %v1457_v20 = vadd.f32 1.0, %v3138_v63 }
 0x306   :  { %v3140_v0 = vpop.eup %3139 }
 0x307   :  { %v3142_v47 = vpop.eup %3141  ;;  %3145 = vrcp.f32 %v1457_v20  ;;  %v1479_v36 = vadd.f32 1.0, %v3140_v0  ;;  %v1469_v54 = vand.u32 2147483648, %v1457_v20  ;;  %v1467_v61 = vand.u32 2147483647, %v1457_v20 }
 0x308   :  { %v4211_v40 = vadd.f32 1.0, %v3142_v47  ;;  %v3144_v48 = vpop.eup %3143  ;;  %vm1463_vm10 = vweird.f32 %v1457_v20 }
 0x309   :  { %3147 = vrcp.f32 %v1479_v36  ;;  %v1384_v13 = vmul.f32 %v3144_v48, %v1378_v1  ;;  %v1491_v42 = vand.u32 2147483648, %v1479_v36  ;;  %v1489_v37 = vand.u32 2147483647, %v1479_v36 }
 0x30a   :  { %3149 = vrcp.f32 %v4211_v40  ;;  %v1470_v63 = vor.u32 1.1754944e-38, %v1469_v54  ;;  %vm1468_vm13 = vcmp.eq.f32.partialorder %v1467_v61, 8.507059e+37  ;;  %vm1485_vm14 = vweird.f32 %v1479_v36  ;;  %v4860_v61 = vld [vmem:[#allocation8_spill] sm:$0xff] }
 0x30b   :  { %2915 = vst [vmem:[%s4659_s3 + $0xc] sm:$0x3] %v1384_v13  ;;  %v1527_v24 = vpack.c.bf16 %v1384_v13, %v1384_v13  ;;  %3151 = vtanh.f32 %v1495_v41  ;;  %v1492_v47 = vor.u32 1.1754944e-38, %v1491_v42  ;;  %vm1490_vm3 = vcmp.eq.f32.partialorder %v1489_v37, 8.507059e+37  ;;  %v4861_v42 = vld [vmem:[#allocation9_spill] sm:$0xff]  ;;  %v4864_v37 = vld [vmem:[#allocation12_spill] sm:$0xff] }
 0x30c   :  { %vm1509_vm5 = vweird.f32 %v4211_v40 }
 0x30d   :  { %v3146_v19 = vpop.eup %3145  ;;  %1536 = vmatmul.bf16.vlgmr.msra.gmra.mxu0 %v1527_v24  ;;  %1549 = vmatmul.bf16.vlgmr.msra.gmra.mxu1 %v1527_v24 }
 0x30e   :  { %v1459_v2 = vmul.f32 %v3146_v19, %v1457_v20  ;;  %1562 = vmatmul.bf16.vlgmr.msra.gmra.mxu2 %v1527_v24  ;;  %1575 = vmatmul.bf16.vlgmr.msra.gmra.mxu3 %v1527_v24  ;;  %vm1464_vm9 = vweird.f32 %v3146_v19 }
 0x30f   :  { %v3148_v49 = vpop.eup %3147  ;;  %1802 = vmatpush.bf16.msra.mxu0 %v3345_v3  ;;  %1815 = vmatpush.bf16.msra.mxu1 %v3356_v7  ;;  %vm1465_vm12 = vmor %vm1463_vm10, %vm1464_vm9 }
 0x310   :  { %v4218_v22 = vpop.eup %3149  ;;  %v1460_v32 = vsub.f32 1.0, %v1459_v2  ;;  %v1481_v39 = vmul.f32 %v3148_v49, %v1479_v36  ;;  %1828 = vmatpush.bf16.msra.mxu2 %v3358_v8  ;;  %1841 = vmatpush.bf16.msra.mxu3 %v3370_v12  ;;  %vm1486_vm11 = vweird.f32 %v3148_v49 }
 0x311   :  { %v1505_v55 = vmul.f32 %v4218_v22, %v4211_v40  ;;  %vm1487_vm15 = vmor %vm1485_vm14, %vm1486_vm11  ;;  %v3152_v48 = vpop.eup %3151  ;;  %vm1510_vm4 = vweird.f32 %v4218_v22 }
 0x312   :  { %v1482_v10 = vsub.f32 1.0, %v1481_v39  ;;  %v1461_v31 = vmul.f32 %v3146_v19, %v1460_v32  ;;  %vm1511_vm6 = vmor %vm1509_vm5, %vm1510_vm4 }
 0x313   :  { %1803 = vmatpush.bf16.msra.mxu0 %v3383_v16  ;;  %1816 = vmatpush.bf16.msra.mxu1 %v3385_v17  ;;  %v1506_v30 = vsub.f32 1.0, %v1505_v55  ;;  %v4857_v55 = vld [vmem:[#allocation5_spill] sm:$0xff] }
 0x314   :  { %v1462_v26 = vadd.f32 %v3146_v19, %v1461_v31  ;;  %v1483_v53 = vmul.f32 %v3148_v49, %v1482_v10  ;;  %1829 = vmatpush.bf16.msra.mxu2 %v3397_v21  ;;  %1842 = vmatpush.bf16.msra.mxu3 %v3408_v25  ;;  %v4858_v10 = vld [vmem:[#allocation6_spill] sm:$0xff]  ;;  %v4859_v31 = vld [vmem:[#allocation7_spill] sm:$0xff] }
 0x315   :  { %v1507_v13 = vmul.f32 %v4218_v22, %v1506_v30  ;;  %v4866_v30 = vld [vmem:[#allocation14_spill] sm:$0xff] }
 0x316   :  { %v1466_v0 = vsel %vm1465_vm12, %v3146_v19, %v1462_v26  ;;  %v1484_v15 = vadd.f32 %v3148_v49, %v1483_v53  ;;  %v4862_v26 = vld [vmem:[#allocation10_spill] sm:$0xff]  ;;  %v4863_v53 = vld [vmem:[#allocation11_spill] sm:$0xff] }
 0x317   :  { %v1471_v20 = vsel %vm1468_vm13, %v1470_v63, %v1466_v0  ;;  %1804 = vmatpush.bf16.msra.mxu0 %v3420_v29  ;;  %1817 = vmatpush.bf16.msra.mxu1 %v3433_v33  ;;  %v1508_v2 = vadd.f32 %v4218_v22, %v1507_v13  ;;  %v4865_v63 = vld [vmem:[#allocation13_spill] sm:$0xff]  ;;  %v4867_v0 = vld [vmem:[#allocation15_spill] sm:$0xff]  ;;  %v4874_v13 = vld [vmem:[#allocation22_spill] sm:$0xff] }
 0x318   :  { %v1488_v18 = vsel %vm1487_vm15, %v3148_v49, %v1484_v15  ;;  %1830 = vmatpush.bf16.msra.mxu2 %v3435_v34  ;;  %1843 = vmatpush.bf16.msra.mxu3 %v3447_v38  ;;  %v1520_v36 = vmul.f32 %v3152_v48, %v1471_v20  ;;  %v1515_v49 = vand.u32 2147483648, %v4211_v40  ;;  %v4868_v15 = vld [vmem:[#allocation16_spill] sm:$0xff]  ;;  %v4869_v20 = vld [vmem:[#allocation17_spill] sm:$0xff] }
 0x319   :  { %v1493_v1 = vsel %vm1490_vm3, %v1492_v47, %v1488_v18  ;;  %v1512_v41 = vsel %vm1511_vm6, %v4218_v22, %v1508_v2  ;;  %v4870_v47 = vld [vmem:[#allocation18_spill] sm:$0xff]  ;;  %v4871_v18 = vld [vmem:[#allocation19_spill] sm:$0xff]  ;;  %v4872_v48 = vld [vmem:[#allocation20_spill] sm:$0xff] }
 0x31a   :  { %v1519_v24 = vmul.f32 %v1493_v1, %v4110_v11  ;;  %v1513_v11 = vand.u32 2147483647, %v4211_v40  ;;  %v1516_v32 = vor.u32 1.1754944e-38, %v1515_v49  ;;  %v4873_v1 = vld [vmem:[#allocation21_spill] sm:$0xff]  ;;  %v4878_v49 = vld [vmem:[#allocation26_spill] sm:$0xff] }
 0x31b   :  { %1805 = vmatpush.bf16.msra.mxu0 %v3465_v44  ;;  %1818 = vmatpush.bf16.msra.mxu1 %v3469_v45  ;;  %v4877_v2 = vld [vmem:[#allocation25_spill] sm:$0xff] }
 0x31c   :  { %v4236_v19 = vadd.f32 %v1520_v36, %v1519_v24  ;;  %1831 = vmatpush.bf16.msra.mxu2 %v3471_v46  ;;  %1844 = vmatpush.bf16.msra.mxu3 %v3483_v50  ;;  %vm1514_vm7 = vcmp.eq.f32.partialorder %v1513_v11, 8.507059e+37  ;;  %v4875_v24 = vld [vmem:[#allocation23_spill] sm:$0xff]  ;;  %v4876_v36 = vld [vmem:[#allocation24_spill] sm:$0xff] }
 0x31d   :  { %v1517_v54 = vsel %vm1514_vm7, %v1516_v32, %v1512_v41  ;;  %v4879_v11 = vld [vmem:[#allocation27_spill] sm:$0xff]  ;;  %v4880_v41 = vld [vmem:[#allocation28_spill] sm:$0xff]  ;;  %v4881_v32 = vld [vmem:[#allocation29_spill] sm:$0xff] }
 0x31e   :  { %3153 = vtanh.f32 %v4236_v19 }
 0x31f   :  { %1806 = vmatpush.bf16.msra.mxu0 %v3501_v56  ;;  %1819 = vmatpush.bf16.msra.mxu1 %v3505_v57 }
 0x320   :  { %1832 = vmatpush.bf16.msra.mxu2 %v3507_v58  ;;  %1845 = vmatpush.bf16.msra.mxu3 %v3519_v62 }
 0x323   :  { %1807 = vmatpush.bf16.msra.mxu0 %v3537_v5  ;;  %1820 = vmatpush.bf16.msra.mxu1 %v3541_v6 }
 0x324   :  { %v3154_v39 = vpop.eup %3153  ;;  %1833 = vmatpush.bf16.msra.mxu2 %v3543_v9  ;;  %1846 = vmatpush.bf16.msra.mxu3 %v3555_v14 }
 0x325   :  { %v1523_v40 = vmul.f32 %v3154_v39, %v1517_v54  ;;  %v4882_v39 = vld [vmem:[#allocation30_spill] sm:$0xff]  ;;  %v4883_v54 = vld [vmem:[#allocation31_spill] sm:$0xff] }
 0x327   :  { %2920 = vst [vmem:[%s4659_s3 + $0x12] sm:$0x3] %v1523_v40  ;;  %v1664_v22 = vpack.c.bf16 %v1523_v40, %v1523_v40  ;;  %1808 = vmatpush.bf16.msra.mxu0 %v3573_v23  ;;  %1821 = vmatpush.bf16.msra.mxu1 %v3583_v27  ;;  %v4884_v40 = vld [vmem:[#allocation32_spill] sm:$0xff] }
 0x328   :  { %1834 = vmatpush.bf16.msra.mxu2 %v3585_v28  ;;  %1847 = vmatpush.bf16.msra.mxu3 %v3597_v35 }
 0x329   :  { %1673 = vmatmul.bf16.vlgmr.msrb.gmra.mxu0 %v1664_v22  ;;  %1686 = vmatmul.bf16.vlgmr.msrb.gmra.mxu1 %v1664_v22 }
 0x32a   :  { %1699 = vmatmul.bf16.vlgmr.msrb.gmra.mxu2 %v1664_v22  ;;  %1712 = vmatmul.bf16.vlgmr.msrb.gmra.mxu3 %v1664_v22  ;;  %v4885_v22 = vld [vmem:[#allocation33_spill] sm:$0xff] }
 0x32b   :  { %1809 = vmatpush.bf16.msra.mxu0 %v3609_v43  ;;  %1822 = vmatpush.bf16.msra.mxu1 %v3613_v51 }
 0x32c   :  { %1835 = vmatpush.bf16.msra.mxu2 %v3615_v52  ;;  %1848 = vmatpush.bf16.msra.mxu3 %v4857_v55 }
 0x32f   :  { %1939 = vmatpush.bf16.msrb.mxu0 %v3620_v59  ;;  %1952 = vmatpush.bf16.msrb.mxu1 %v3622_v60 }
 0x330   :  { %1965 = vmatpush.bf16.msrb.mxu2 %v4858_v10  ;;  %1978 = vmatpush.bf16.msrb.mxu3 %v4859_v31 }
 0x333   :  { %1940 = vmatpush.bf16.msrb.mxu0 %v4860_v61  ;;  %1953 = vmatpush.bf16.msrb.mxu1 %v4861_v42 }
 0x334   :  { %1966 = vmatpush.bf16.msrb.mxu2 %v4862_v26  ;;  %1979 = vmatpush.bf16.msrb.mxu3 %v4863_v53 }
 0x337   :  { %1941 = vmatpush.bf16.msrb.mxu0 %v4864_v37  ;;  %1954 = vmatpush.bf16.msrb.mxu1 %v4865_v63 }
 0x338   :  { %1967 = vmatpush.bf16.msrb.mxu2 %v4866_v30  ;;  %1980 = vmatpush.bf16.msrb.mxu3 %v4867_v0 }
 0x33b   :  { %1942 = vmatpush.bf16.msrb.mxu0 %v4868_v15  ;;  %1955 = vmatpush.bf16.msrb.mxu1 %v4869_v20 }
 0x33c   :  { %1968 = vmatpush.bf16.msrb.mxu2 %v4870_v47  ;;  %1981 = vmatpush.bf16.msrb.mxu3 %v4871_v18 }
 0x33f   :  { %1943 = vmatpush.bf16.msrb.mxu0 %v4872_v48  ;;  %1956 = vmatpush.bf16.msrb.mxu1 %v4873_v1 }
 0x340   :  { %1969 = vmatpush.bf16.msrb.mxu2 %v4874_v13  ;;  %1982 = vmatpush.bf16.msrb.mxu3 %v4875_v24  ;;  %v4886_v24 = vld [vmem:[#allocation34_spill] sm:$0xff] }
 0x343   :  { %1944 = vmatpush.bf16.msrb.mxu0 %v4876_v36  ;;  %1957 = vmatpush.bf16.msrb.mxu1 %v4877_v2  ;;  %v4887_v36 = vld [vmem:[#allocation35_spill] sm:$0xff] }
 0x344   :  { %1970 = vmatpush.bf16.msrb.mxu2 %v4878_v49  ;;  %1983 = vmatpush.bf16.msrb.mxu3 %v4879_v11 }
 0x347   :  { %1945 = vmatpush.bf16.msrb.mxu0 %v4880_v41  ;;  %1958 = vmatpush.bf16.msrb.mxu1 %v4881_v32 }
 0x348   :  { %1971 = vmatpush.bf16.msrb.mxu2 %v4882_v39  ;;  %1984 = vmatpush.bf16.msrb.mxu3 %v4883_v54  ;;  %v2921_v54 = vld [vmem:[%s4656_s0 + $0x40] sm:$0xff] }
 0x34b   :  { %1946 = vmatpush.bf16.msrb.mxu0 %v4884_v40  ;;  %1959 = vmatpush.bf16.msrb.mxu1 %v4885_v22 }
 0x34c   :  { %1972 = vmatpush.bf16.msrb.mxu2 %v4886_v24  ;;  %1985 = vmatpush.bf16.msrb.mxu3 %v4887_v36 }
 0x38a   :  { %v1537_v2 = vpop.f32.mrf.mxu0  ;;  %v1550_v49 = vpop.f32.mrf.mxu1 }
 0x38b   :  { %v1584_v13 = vrot.slane %v1550_v49, 6 }
 0x38d   :  { %v1587_v40 = vsel %vm315_vm0, %v1537_v2, %v1584_v13 }
 0x391   :  { %v1563_v11 = vpop.f32.mrf.mxu2  ;;  %v1576_v1 = vpop.f32.mrf.mxu3 }
 0x392   :  { %v1585_v41 = vrot.slane %v1563_v11, 4  ;;  %v1586_v48 = vrot.slane %v1576_v1, 2  ;;  %v1539_v32 = vpop.f32.mrf.mxu0  ;;  %v1552_v18 = vpop.f32.mrf.mxu1 }
 0x394   :  { %v1588_v22 = vsel %vm317_vm1, %v1585_v41, %v1586_v48 }
 0x395   :  { %v1589_v24 = vsel %vm319_vm2, %v1587_v40, %v1588_v22 }
 0x396   :  { %v1591_v36 = vadd.f32 %v2921_v54, %v1589_v24 }
 0x398   :  { %v2922_v39 = vmul.f32 -1.442695, %v1591_v36  ;;  %v1612_v47 = vrot.slane %v1591_v36, 2  ;;  %v1636_v49 = vrot.slane %v1591_v36, 6 }
 0x399   :  { %v1565_v20 = vpop.f32.mrf.mxu2  ;;  %v1578_v15 = vpop.f32.mrf.mxu3 }
 0x39a   :  { %3155 = vpow2.f32 %v2922_v39  ;;  %v2923_v1 = vmul.f32 -1.442695, %v1612_v47  ;;  %v2924_v11 = vmul.f32 -1.442695, %v1636_v49  ;;  %v1633_v20 = vrot.slane %v1591_v36, 4 }
 0x39c   :  { %3157 = vpow2.f32 %v2923_v1 }
 0x39d   :  { %3159 = vpow2.f32 %v2924_v11 }
 0x3a0   :  { %v3156_v18 = vpop.eup %3155 }
 0x3a1   :  { %v1595_v32 = vadd.f32 1.0, %v3156_v18 }
 0x3a2   :  { %v3158_v0 = vpop.eup %3157 }
 0x3a3   :  { %v3160_v30 = vpop.eup %3159  ;;  %3161 = vrcp.f32 %v1595_v32  ;;  %v1617_v13 = vadd.f32 1.0, %v3158_v0  ;;  %vm1601_vm8 = vweird.f32 %v1595_v32  ;;  %v1607_v37 = vand.u32 2147483648, %v1595_v32 }
 0x3a4   :  { %v4306_v48 = vadd.f32 1.0, %v3160_v30  ;;  %v1605_v30 = vand.u32 2147483647, %v1595_v32 }
 0x3a5   :  { %3163 = vrcp.f32 %v1617_v13  ;;  %v1608_v10 = vor.u32 1.1754944e-38, %v1607_v37  ;;  %vm1623_vm13 = vweird.f32 %v1617_v13 }
 0x3a6   :  { %v1674_v24 = vpop.f32.mrf.mxu0  ;;  %v1687_v2 = vpop.f32.mrf.mxu1  ;;  %3165 = vrcp.f32 %v4306_v48  ;;  %vm1606_vm12 = vcmp.eq.f32.partialorder %v1605_v30, 8.507059e+37  ;;  %vm1647_vm4 = vweird.f32 %v4306_v48 }
 0x3a7   :  { %3167 = vtanh.f32 %v1633_v20  ;;  %v1721_v39 = vrot.slane %v1687_v2, 6  ;;  %v2926_v2 = vld [vmem:[%s4656_s0 + $0x38] sm:$0xff] }
 0x3a9   :  { %v3162_v15 = vpop.eup %3161  ;;  %v1724_v26 = vsel %vm315_vm0, %v1674_v24, %v1721_v39 }
 0x3aa   :  { %v1597_v41 = vmul.f32 %v3162_v15, %v1595_v32  ;;  %vm1602_vm9 = vweird.f32 %v3162_v15 }
 0x3ab   :  { %v3164_v47 = vpop.eup %3163  ;;  %vm1603_vm11 = vmor %vm1601_vm8, %vm1602_vm9 }
 0x3ac   :  { %v4309_v54 = vpop.eup %3165  ;;  %v1598_v40 = vsub.f32 1.0, %v1597_v41  ;;  %v1619_v22 = vmul.f32 %v3164_v47, %v1617_v13  ;;  %v1627_v41 = vand.u32 2147483647, %v1617_v13  ;;  %vm1624_vm10 = vweird.f32 %v3164_v47 }
 0x3ad   :  { %v1700_v49 = vpop.f32.mrf.mxu2  ;;  %v1713_v1 = vpop.f32.mrf.mxu3  ;;  %v1643_v36 = vmul.f32 %v4309_v54, %v4306_v48  ;;  %vm1625_vm14 = vmor %vm1623_vm13, %vm1624_vm10  ;;  %vm1648_vm3 = vweird.f32 %v4309_v54 }
 0x3ae   :  { %v1722_v0 = vrot.slane %v1700_v49, 4  ;;  %v1723_v11 = vrot.slane %v1713_v1, 2  ;;  %v1676_v18 = vpop.f32.mrf.mxu0  ;;  %v1689_v63 = vpop.f32.mrf.mxu1  ;;  %v1620_v53 = vsub.f32 1.0, %v1619_v22  ;;  %v1599_v20 = vmul.f32 %v3162_v15, %v1598_v40  ;;  %vm1649_vm5 = vmor %vm1647_vm4, %vm1648_vm3 }
 0x3af   :  { %v1629_v49 = vand.u32 2147483648, %v1617_v13  ;;  %v1644_v61 = vsub.f32 1.0, %v1643_v36  ;;  %v3168_v31 = vpop.eup %3167  ;;  %vm1628_vm15 = vcmp.eq.f32.partialorder %v1627_v41, 8.507059e+37 }
 0x3b0   :  { %v1725_v42 = vsel %vm317_vm1, %v1722_v0, %v1723_v11  ;;  %v1600_v1 = vadd.f32 %v3162_v15, %v1599_v20  ;;  %v1621_v18 = vmul.f32 %v3164_v47, %v1620_v53 }
 0x3b1   :  { %v1726_v63 = vsel %vm319_vm2, %v1724_v26, %v1725_v42  ;;  %v1630_v42 = vor.u32 1.1754944e-38, %v1629_v49  ;;  %v1645_v32 = vmul.f32 %v4309_v54, %v1644_v61  ;;  %v1651_v61 = vand.u32 2147483647, %v4306_v48 }
 0x3b2   :  { %v4319_v22 = vadd.f32 %v2926_v2, %v1726_v63  ;;  %v1604_v40 = vsel %vm1603_vm11, %v3162_v15, %v1600_v1  ;;  %v1622_v55 = vadd.f32 %v3164_v47, %v1621_v18 }
 0x3b3   :  { %v1609_v11 = vsel %vm1606_vm12, %v1608_v10, %v1604_v40  ;;  %v1646_v49 = vadd.f32 %v4309_v54, %v1645_v32  ;;  %vm1652_vm6 = vcmp.eq.f32.partialorder %v1651_v61, 8.507059e+37 }
 0x3b4   :  { %v2927_v24 = vmul.f32 -1.442695, %v4319_v22  ;;  %v1749_v39 = vrot.slane %v4319_v22, 2  ;;  %v1773_v0 = vrot.slane %v4319_v22, 6  ;;  %v1626_v36 = vsel %vm1625_vm14, %v3164_v47, %v1622_v55 }
 0x3b5   :  { %v1702_v26 = vpop.f32.mrf.mxu2  ;;  %v1715_v53 = vpop.f32.mrf.mxu3  ;;  %v1631_v13 = vsel %vm1628_vm15, %v1630_v42, %v1626_v36  ;;  %v1658_v2 = vmul.f32 %v3168_v31, %v1609_v11  ;;  %v1653_v55 = vand.u32 2147483648, %v4306_v48  ;;  %v1650_v31 = vsel %vm1649_vm5, %v4309_v54, %v1646_v49 }
 0x3b6   :  { %3169 = vpow2.f32 %v2927_v24  ;;  %v2928_v37 = vmul.f32 -1.442695, %v1749_v39  ;;  %v2929_v15 = vmul.f32 -1.442695, %v1773_v0  ;;  %v1657_v30 = vmul.f32 %v1631_v13, %v4202_v4 }
 0x3b7   :  { %v1654_v1 = vor.u32 1.1754944e-38, %v1653_v55  ;;  %v1770_v26 = vrot.slane %v4319_v22, 4 }
 0x3b8   :  { %3171 = vpow2.f32 %v2928_v37  ;;  %v4328_v20 = vadd.f32 %v1658_v2, %v1657_v30 }
 0x3b9   :  { %3173 = vpow2.f32 %v2929_v15  ;;  %v1655_v24 = vsel %vm1652_vm6, %v1654_v1, %v1650_v31 }
 0x3ba   :  { %3175 = vtanh.f32 %v4328_v20 }
 0x3bc   :  { %v3170_v10 = vpop.eup %3169 }
 0x3bd   :  { %v1732_v47 = vadd.f32 1.0, %v3170_v10 }
 0x3be   :  { %v3172_v4 = vpop.eup %3171 }
 0x3bf   :  { %v3174_v41 = vpop.eup %3173  ;;  %3177 = vrcp.f32 %v1732_v47  ;;  %v1754_v63 = vadd.f32 1.0, %v3172_v4  ;;  %v1744_v32 = vand.u32 2147483648, %v1732_v47  ;;  %v1742_v13 = vand.u32 2147483647, %v1732_v47 }
 0x3c0   :  { %v4337_v18 = vadd.f32 1.0, %v3174_v41  ;;  %v3176_v40 = vpop.eup %3175  ;;  %vm1738_vm8 = vweird.f32 %v1732_v47 }
 0x3c1   :  { %3179 = vrcp.f32 %v1754_v63  ;;  %v1661_v39 = vmul.f32 %v3176_v40, %v1655_v24  ;;  %v1766_v30 = vand.u32 2147483648, %v1754_v63  ;;  %v1764_v55 = vand.u32 2147483647, %v1754_v63 }
 0x3c2   :  { %3181 = vrcp.f32 %v4337_v18  ;;  %v1745_v10 = vor.u32 1.1754944e-38, %v1744_v32  ;;  %vm1743_vm11 = vcmp.eq.f32.partialorder %v1742_v13, 8.507059e+37  ;;  %vm1760_vm12 = vweird.f32 %v1754_v63  ;;  %v4891_v13 = vld [vmem:[#allocation8_spill] sm:$0xff] }
 0x3c3   :  { %2925 = vst [vmem:[%s4659_s3 + $0x10] sm:$0x3] %v1661_v39  ;;  %v1801_v48 = vpack.c.bf16 %v1661_v39, %v1661_v39  ;;  %3183 = vtanh.f32 %v1770_v26  ;;  %v1767_v41 = vor.u32 1.1754944e-38, %v1766_v30  ;;  %vm1765_vm14 = vcmp.eq.f32.partialorder %v1764_v55, 8.507059e+37  ;;  %v4892_v30 = vld [vmem:[#allocation9_spill] sm:$0xff]  ;;  %v4895_v55 = vld [vmem:[#allocation12_spill] sm:$0xff] }
 0x3c4   :  { %vm1784_vm3 = vweird.f32 %v4337_v18 }
 0x3c5   :  { %v3178_v0 = vpop.eup %3177  ;;  %1810 = vmatmul.bf16.vlgmr.msra.gmra.mxu0 %v1801_v48  ;;  %1823 = vmatmul.bf16.vlgmr.msra.gmra.mxu1 %v1801_v48 }
 0x3c6   :  { %v1734_v54 = vmul.f32 %v3178_v0, %v1732_v47  ;;  %1836 = vmatmul.bf16.vlgmr.msra.gmra.mxu2 %v1801_v48  ;;  %1849 = vmatmul.bf16.vlgmr.msra.gmra.mxu3 %v1801_v48  ;;  %vm1739_vm7 = vweird.f32 %v3178_v0 }
 0x3c7   :  { %v3180_v42 = vpop.eup %3179  ;;  %2076 = vmatpush.bf16.msra.mxu0 %v3345_v3  ;;  %2089 = vmatpush.bf16.msra.mxu1 %v3356_v7  ;;  %vm1740_vm10 = vmor %vm1738_vm8, %vm1739_vm7 }
 0x3c8   :  { %v4344_v53 = vpop.eup %3181  ;;  %v1735_v11 = vsub.f32 1.0, %v1734_v54  ;;  %v1756_v36 = vmul.f32 %v3180_v42, %v1754_v63  ;;  %2102 = vmatpush.bf16.msra.mxu2 %v3358_v8  ;;  %2115 = vmatpush.bf16.msra.mxu3 %v3370_v12  ;;  %vm1761_vm9 = vweird.f32 %v3180_v42 }
 0x3c9   :  { %v1780_v37 = vmul.f32 %v4344_v53, %v4337_v18  ;;  %vm1762_vm13 = vmor %vm1760_vm12, %vm1761_vm9  ;;  %v3184_v40 = vpop.eup %3183  ;;  %vm1785_vm15 = vweird.f32 %v4344_v53 }
 0x3ca   :  { %v1757_v15 = vsub.f32 1.0, %v1756_v36  ;;  %v1736_v22 = vmul.f32 %v3178_v0, %v1735_v11  ;;  %vm1786_vm4 = vmor %vm1784_vm3, %vm1785_vm15 }
 0x3cb   :  { %2077 = vmatpush.bf16.msra.mxu0 %v3383_v16  ;;  %2090 = vmatpush.bf16.msra.mxu1 %v3385_v17  ;;  %v1781_v61 = vsub.f32 1.0, %v1780_v37  ;;  %v4888_v37 = vld [vmem:[#allocation5_spill] sm:$0xff] }
 0x3cc   :  { %v1737_v2 = vadd.f32 %v3178_v0, %v1736_v22  ;;  %v1758_v49 = vmul.f32 %v3180_v42, %v1757_v15  ;;  %2103 = vmatpush.bf16.msra.mxu2 %v3397_v21  ;;  %2116 = vmatpush.bf16.msra.mxu3 %v3408_v25  ;;  %v4889_v15 = vld [vmem:[#allocation6_spill] sm:$0xff]  ;;  %v4890_v22 = vld [vmem:[#allocation7_spill] sm:$0xff] }
 0x3cd   :  { %v1782_v39 = vmul.f32 %v4344_v53, %v1781_v61  ;;  %v4897_v61 = vld [vmem:[#allocation14_spill] sm:$0xff] }
 0x3ce   :  { %v1741_v4 = vsel %vm1740_vm10, %v3178_v0, %v1737_v2  ;;  %v1759_v31 = vadd.f32 %v3180_v42, %v1758_v49  ;;  %v4893_v2 = vld [vmem:[#allocation10_spill] sm:$0xff]  ;;  %v4894_v49 = vld [vmem:[#allocation11_spill] sm:$0xff] }
 0x3cf   :  { %v1746_v47 = vsel %vm1743_vm11, %v1745_v10, %v1741_v4  ;;  %2078 = vmatpush.bf16.msra.mxu0 %v3420_v29  ;;  %2091 = vmatpush.bf16.msra.mxu1 %v3433_v33  ;;  %v1783_v54 = vadd.f32 %v4344_v53, %v1782_v39  ;;  %v4896_v10 = vld [vmem:[#allocation13_spill] sm:$0xff]  ;;  %v4898_v4 = vld [vmem:[#allocation15_spill] sm:$0xff]  ;;  %v4905_v39 = vld [vmem:[#allocation22_spill] sm:$0xff] }
 0x3d0   :  { %v1763_v1 = vsel %vm1762_vm13, %v3180_v42, %v1759_v31  ;;  %2104 = vmatpush.bf16.msra.mxu2 %v3435_v34  ;;  %2117 = vmatpush.bf16.msra.mxu3 %v3447_v38  ;;  %v1795_v63 = vmul.f32 %v3184_v40, %v1746_v47  ;;  %v1790_v42 = vand.u32 2147483648, %v4337_v18  ;;  %v4899_v31 = vld [vmem:[#allocation16_spill] sm:$0xff]  ;;  %v4900_v47 = vld [vmem:[#allocation17_spill] sm:$0xff] }
 0x3d1   :  { %v1768_v24 = vsel %vm1765_vm14, %v1767_v41, %v1763_v1  ;;  %v1787_v26 = vsel %vm1786_vm4, %v4344_v53, %v1783_v54  ;;  %v4901_v41 = vld [vmem:[#allocation18_spill] sm:$0xff]  ;;  %v4902_v1 = vld [vmem:[#allocation19_spill] sm:$0xff]  ;;  %v4903_v40 = vld [vmem:[#allocation20_spill] sm:$0xff] }
 0x3d2   :  { %v1794_v48 = vmul.f32 %v1768_v24, %v4236_v19  ;;  %v1788_v19 = vand.u32 2147483647, %v4337_v18  ;;  %v1791_v11 = vor.u32 1.1754944e-38, %v1790_v42  ;;  %v4904_v24 = vld [vmem:[#allocation21_spill] sm:$0xff]  ;;  %v4909_v42 = vld [vmem:[#allocation26_spill] sm:$0xff] }
 0x3d3   :  { %2079 = vmatpush.bf16.msra.mxu0 %v3465_v44  ;;  %2092 = vmatpush.bf16.msra.mxu1 %v3469_v45  ;;  %v4908_v54 = vld [vmem:[#allocation25_spill] sm:$0xff] }
 0x3d4   :  { %v4362_v0 = vadd.f32 %v1795_v63, %v1794_v48  ;;  %2105 = vmatpush.bf16.msra.mxu2 %v3471_v46  ;;  %2118 = vmatpush.bf16.msra.mxu3 %v3483_v50  ;;  %vm1789_vm5 = vcmp.eq.f32.partialorder %v1788_v19, 8.507059e+37  ;;  %v4906_v48 = vld [vmem:[#allocation23_spill] sm:$0xff]  ;;  %v4907_v63 = vld [vmem:[#allocation24_spill] sm:$0xff] }
 0x3d5   :  { %v1792_v32 = vsel %vm1789_vm5, %v1791_v11, %v1787_v26  ;;  %v4910_v19 = vld [vmem:[#allocation27_spill] sm:$0xff]  ;;  %v4911_v26 = vld [vmem:[#allocation28_spill] sm:$0xff]  ;;  %v4912_v11 = vld [vmem:[#allocation29_spill] sm:$0xff] }
 0x3d6   :  { %3185 = vtanh.f32 %v4362_v0 }
 0x3d7   :  { %2080 = vmatpush.bf16.msra.mxu0 %v3501_v56  ;;  %2093 = vmatpush.bf16.msra.mxu1 %v3505_v57 }
 0x3d8   :  { %2106 = vmatpush.bf16.msra.mxu2 %v3507_v58  ;;  %2119 = vmatpush.bf16.msra.mxu3 %v3519_v62 }
 0x3db   :  { %2081 = vmatpush.bf16.msra.mxu0 %v3537_v5  ;;  %2094 = vmatpush.bf16.msra.mxu1 %v3541_v6 }
 0x3dc   :  { %v3186_v36 = vpop.eup %3185  ;;  %2107 = vmatpush.bf16.msra.mxu2 %v3543_v9  ;;  %2120 = vmatpush.bf16.msra.mxu3 %v3555_v14 }
 0x3dd   :  { %v1798_v18 = vmul.f32 %v3186_v36, %v1792_v32  ;;  %v4913_v36 = vld [vmem:[#allocation30_spill] sm:$0xff]  ;;  %v4914_v32 = vld [vmem:[#allocation31_spill] sm:$0xff] }
 0x3df   :  { %2930 = vst [vmem:[%s4659_s3 + $0xe] sm:$0x3] %v1798_v18  ;;  %v1938_v53 = vpack.c.bf16 %v1798_v18, %v1798_v18  ;;  %2082 = vmatpush.bf16.msra.mxu0 %v3573_v23  ;;  %2095 = vmatpush.bf16.msra.mxu1 %v3583_v27  ;;  %v4915_v18 = vld [vmem:[#allocation32_spill] sm:$0xff] }
 0x3e0   :  { %2108 = vmatpush.bf16.msra.mxu2 %v3585_v28  ;;  %2121 = vmatpush.bf16.msra.mxu3 %v3597_v35 }
 0x3e1   :  { %1947 = vmatmul.bf16.vlgmr.msrb.gmra.mxu0 %v1938_v53  ;;  %1960 = vmatmul.bf16.vlgmr.msrb.gmra.mxu1 %v1938_v53 }
 0x3e2   :  { %1973 = vmatmul.bf16.vlgmr.msrb.gmra.mxu2 %v1938_v53  ;;  %1986 = vmatmul.bf16.vlgmr.msrb.gmra.mxu3 %v1938_v53  ;;  %v4916_v53 = vld [vmem:[#allocation33_spill] sm:$0xff] }
 0x3e3   :  { %2083 = vmatpush.bf16.msra.mxu0 %v3609_v43  ;;  %2096 = vmatpush.bf16.msra.mxu1 %v3613_v51 }
 0x3e4   :  { %2109 = vmatpush.bf16.msra.mxu2 %v3615_v52  ;;  %2122 = vmatpush.bf16.msra.mxu3 %v4888_v37 }
 0x3e7   :  { %2213 = vmatpush.bf16.msrb.mxu0 %v3620_v59  ;;  %2226 = vmatpush.bf16.msrb.mxu1 %v3622_v60 }
 0x3e8   :  { %2239 = vmatpush.bf16.msrb.mxu2 %v4889_v15  ;;  %2252 = vmatpush.bf16.msrb.mxu3 %v4890_v22 }
 0x3eb   :  { %2214 = vmatpush.bf16.msrb.mxu0 %v4891_v13  ;;  %2227 = vmatpush.bf16.msrb.mxu1 %v4892_v30 }
 0x3ec   :  { %2240 = vmatpush.bf16.msrb.mxu2 %v4893_v2  ;;  %2253 = vmatpush.bf16.msrb.mxu3 %v4894_v49  ;;  %v2936_v49 = vld [vmem:[%s4656_s0 + $0x28] sm:$0xff] }
 0x3ef   :  { %2215 = vmatpush.bf16.msrb.mxu0 %v4895_v55  ;;  %2228 = vmatpush.bf16.msrb.mxu1 %v4896_v10 }
 0x3f0   :  { %2241 = vmatpush.bf16.msrb.mxu2 %v4897_v61  ;;  %2254 = vmatpush.bf16.msrb.mxu3 %v4898_v4 }
 0x3f3   :  { %2216 = vmatpush.bf16.msrb.mxu0 %v4899_v31  ;;  %2229 = vmatpush.bf16.msrb.mxu1 %v4900_v47 }
 0x3f4   :  { %2242 = vmatpush.bf16.msrb.mxu2 %v4901_v41  ;;  %2255 = vmatpush.bf16.msrb.mxu3 %v4902_v1 }
 0x3f7   :  { %2217 = vmatpush.bf16.msrb.mxu0 %v4903_v40  ;;  %2230 = vmatpush.bf16.msrb.mxu1 %v4904_v24 }
 0x3f8   :  { %2243 = vmatpush.bf16.msrb.mxu2 %v4905_v39  ;;  %2256 = vmatpush.bf16.msrb.mxu3 %v4906_v48  ;;  %v4917_v48 = vld [vmem:[#allocation34_spill] sm:$0xff] }
 0x3fb   :  { %2218 = vmatpush.bf16.msrb.mxu0 %v4907_v63  ;;  %2231 = vmatpush.bf16.msrb.mxu1 %v4908_v54  ;;  %v4918_v63 = vld [vmem:[#allocation35_spill] sm:$0xff] }
 0x3fc   :  { %2244 = vmatpush.bf16.msrb.mxu2 %v4909_v42  ;;  %2257 = vmatpush.bf16.msrb.mxu3 %v4910_v19 }
 0x3ff   :  { %2219 = vmatpush.bf16.msrb.mxu0 %v4911_v26  ;;  %2232 = vmatpush.bf16.msrb.mxu1 %v4912_v11 }
 0x400   :  { %2245 = vmatpush.bf16.msrb.mxu2 %v4913_v36  ;;  %2258 = vmatpush.bf16.msrb.mxu3 %v4914_v32  ;;  %v2931_v32 = vld [vmem:[%s4656_s0 + $0x50] sm:$0xff] }
 0x403   :  { %2220 = vmatpush.bf16.msrb.mxu0 %v4915_v18  ;;  %2233 = vmatpush.bf16.msrb.mxu1 %v4916_v53 }
 0x404   :  { %2246 = vmatpush.bf16.msrb.mxu2 %v4917_v48  ;;  %2259 = vmatpush.bf16.msrb.mxu3 %v4918_v63 }
 0x442   :  { %v1811_v54 = vpop.f32.mrf.mxu0  ;;  %v1824_v42 = vpop.f32.mrf.mxu1 }
 0x443   :  { %v1858_v39 = vrot.slane %v1824_v42, 6 }
 0x445   :  { %v1861_v18 = vsel %vm315_vm0, %v1811_v54, %v1858_v39 }
 0x449   :  { %v1837_v19 = vpop.f32.mrf.mxu2  ;;  %v1850_v24 = vpop.f32.mrf.mxu3 }
 0x44a   :  { %v1859_v26 = vrot.slane %v1837_v19, 4  ;;  %v1860_v40 = vrot.slane %v1850_v24, 2  ;;  %v1813_v11 = vpop.f32.mrf.mxu0  ;;  %v1826_v1 = vpop.f32.mrf.mxu1 }
 0x44c   :  { %v1862_v53 = vsel %vm317_vm1, %v1859_v26, %v1860_v40 }
 0x44d   :  { %v1863_v48 = vsel %vm319_vm2, %v1861_v18, %v1862_v53 }
 0x44e   :  { %v1865_v63 = vadd.f32 %v2931_v32, %v1863_v48 }
 0x450   :  { %v2932_v36 = vmul.f32 -1.442695, %v1865_v63  ;;  %v1886_v41 = vrot.slane %v1865_v63, 2  ;;  %v1910_v42 = vrot.slane %v1865_v63, 6 }
 0x451   :  { %v1839_v47 = vpop.f32.mrf.mxu2  ;;  %v1852_v31 = vpop.f32.mrf.mxu3 }
 0x452   :  { %3187 = vpow2.f32 %v2932_v36  ;;  %v2933_v24 = vmul.f32 -1.442695, %v1886_v41  ;;  %v2934_v19 = vmul.f32 -1.442695, %v1910_v42 }
 0x454   :  { %3189 = vpow2.f32 %v2933_v24  ;;  %v1907_v24 = vrot.slane %v1865_v63, 4 }
 0x455   :  { %3191 = vpow2.f32 %v2934_v19 }
 0x458   :  { %v3188_v1 = vpop.eup %3187 }
 0x459   :  { %v1869_v11 = vadd.f32 1.0, %v3188_v1 }
 0x45a   :  { %v3190_v4 = vpop.eup %3189 }
 0x45b   :  { %v3192_v61 = vpop.eup %3191  ;;  %3193 = vrcp.f32 %v1869_v11  ;;  %v1891_v39 = vadd.f32 1.0, %v3190_v4  ;;  %v1881_v55 = vand.u32 2147483648, %v1869_v11  ;;  %vm1875_vm7 = vweird.f32 %v1869_v11 }
 0x45c   :  { %v4432_v40 = vadd.f32 1.0, %v3192_v61 }
 0x45d   :  { %3195 = vrcp.f32 %v1891_v39  ;;  %vm1897_vm11 = vweird.f32 %v1891_v39 }
 0x45e   :  { %v1948_v54 = vpop.f32.mrf.mxu0  ;;  %v1961_v48 = vpop.f32.mrf.mxu1  ;;  %3197 = vrcp.f32 %v4432_v40  ;;  %vm1921_vm15 = vweird.f32 %v4432_v40 }
 0x45f   :  { %v1995_v26 = vrot.slane %v1961_v48, 6  ;;  %3199 = vtanh.f32 %v1907_v24 }
 0x461   :  { %v3194_v47 = vpop.eup %3193 }
 0x462   :  { %v1871_v31 = vmul.f32 %v3194_v47, %v1869_v11  ;;  %vm1876_vm6 = vweird.f32 %v3194_v47 }
 0x463   :  { %v3196_v41 = vpop.eup %3195  ;;  %vm4445_vm8 = vmor %vm1875_vm7, %vm1876_vm6 }
 0x464   :  { %v1872_v36 = vsub.f32 1.0, %v1871_v31  ;;  %v4435_v53 = vpop.eup %3197  ;;  %v1893_v42 = vmul.f32 %v3196_v41, %v1891_v39  ;;  %v1998_v31 = vsel %vm315_vm0, %v1948_v54, %v1995_v26  ;;  %vm1898_vm9 = vweird.f32 %v3196_v41 }
 0x465   :  { %v1974_v32 = vpop.f32.mrf.mxu2  ;;  %v1987_v18 = vpop.f32.mrf.mxu3  ;;  %v1917_v30 = vmul.f32 %v4435_v53, %v4432_v40  ;;  %v1901_v26 = vand.u32 2147483647, %v1891_v39  ;;  %vm1899_vm12 = vmor %vm1897_vm11, %vm1898_vm9  ;;  %vm1922_vm14 = vweird.f32 %v4435_v53 }
 0x466   :  { %v1996_v19 = vrot.slane %v1974_v32, 4  ;;  %v1997_v4 = vrot.slane %v1987_v18, 2  ;;  %v1950_v61 = vpop.f32.mrf.mxu0  ;;  %v1963_v1 = vpop.f32.mrf.mxu1  ;;  %v1873_v10 = vmul.f32 %v3194_v47, %v1872_v36  ;;  %v1894_v48 = vsub.f32 1.0, %v1893_v42  ;;  %vm1923_vm3 = vmor %vm1921_vm15, %vm1922_vm14 }
 0x467   :  { %v1879_v32 = vand.u32 2147483647, %v1869_v11  ;;  %v1903_v42 = vand.u32 2147483648, %v1891_v39  ;;  %vm1902_vm13 = vcmp.eq.f32.partialorder %v1901_v26, 8.507059e+37  ;;  %v3200_v36 = vpop.eup %3199 }
 0x468   :  { %v1999_v2 = vsel %vm317_vm1, %v1996_v19, %v1997_v4  ;;  %v1874_v63 = vadd.f32 %v3194_v47, %v1873_v10  ;;  %v1895_v61 = vmul.f32 %v3196_v41, %v1894_v48  ;;  %v1882_v19 = vor.u32 1.1754944e-38, %v1881_v55 }
 0x469   :  { %v2000_v18 = vsel %vm319_vm2, %v1998_v31, %v1999_v2  ;;  %v1918_v2 = vsub.f32 1.0, %v1917_v30  ;;  %vm1880_vm10 = vcmp.eq.f32.partialorder %v1879_v32, 8.507059e+37 }
 0x46a   :  { %v4449_v1 = vadd.f32 %v2936_v49, %v2000_v18  ;;  %v1878_v54 = vsel %vm4445_vm8, %v3194_v47, %v1874_v63  ;;  %v1896_v24 = vadd.f32 %v3196_v41, %v1895_v61  ;;  %v1904_v47 = vor.u32 1.1754944e-38, %v1903_v42 }
 0x46b   :  { %v1883_v49 = vsel %vm1880_vm10, %v1882_v19, %v1878_v54  ;;  %v1919_v30 = vmul.f32 %v4435_v53, %v1918_v2  ;;  %v1925_v19 = vand.u32 2147483647, %v4432_v40 }
 0x46c   :  { %v2937_v10 = vmul.f32 -1.442695, %v4449_v1  ;;  %v2023_v11 = vrot.slane %v4449_v1, 2  ;;  %v2047_v4 = vrot.slane %v4449_v1, 6  ;;  %v1900_v55 = vsel %vm1899_vm12, %v3196_v41, %v1896_v24 }
 0x46d   :  { %v1976_v31 = vpop.f32.mrf.mxu2  ;;  %v1989_v48 = vpop.f32.mrf.mxu3  ;;  %v1905_v13 = vsel %vm1902_vm13, %v1904_v47, %v1900_v55  ;;  %v1932_v32 = vmul.f32 %v3200_v36, %v1883_v49  ;;  %v1920_v54 = vadd.f32 %v4435_v53, %v1919_v30  ;;  %v1927_v41 = vand.u32 2147483648, %v4432_v40 }
 0x46e   :  { %3201 = vpow2.f32 %v2937_v10  ;;  %v2938_v18 = vmul.f32 -1.442695, %v2023_v11  ;;  %v2939_v63 = vmul.f32 -1.442695, %v2047_v4  ;;  %v1931_v31 = vmul.f32 %v1905_v13, %v4328_v20 }
 0x46f   :  { %v1924_v11 = vsel %vm1923_vm3, %v4435_v53, %v1920_v54  ;;  %v1928_v2 = vor.u32 1.1754944e-38, %v1927_v41  ;;  %vm1926_vm4 = vcmp.eq.f32.partialorder %v1925_v19, 8.507059e+37  ;;  %v2044_v55 = vrot.slane %v4449_v1, 4 }
 0x470   :  { %3203 = vpow2.f32 %v2938_v18  ;;  %v4459_v61 = vadd.f32 %v1932_v32, %v1931_v31 }
 0x471   :  { %3205 = vpow2.f32 %v2939_v63  ;;  %v1929_v48 = vsel %vm1926_vm4, %v1928_v2, %v1924_v11 }
 0x472   :  { %3207 = vtanh.f32 %v4459_v61 }
 0x474   :  { %v3202_v39 = vpop.eup %3201 }
 0x475   :  { %v2006_v42 = vadd.f32 1.0, %v3202_v39 }
 0x476   :  { %v3204_v26 = vpop.eup %3203 }
 0x477   :  { %v3206_v10 = vpop.eup %3205  ;;  %3209 = vrcp.f32 %v2006_v42  ;;  %v2028_v20 = vadd.f32 1.0, %v3204_v26  ;;  %v2018_v32 = vand.u32 2147483648, %v2006_v42  ;;  %v2016_v39 = vand.u32 2147483647, %v2006_v42 }
 0x478   :  { %v4467_v13 = vadd.f32 1.0, %v3206_v10  ;;  %v3208_v4 = vpop.eup %3207  ;;  %vm2012_vm6 = vweird.f32 %v2006_v42 }
 0x479   :  { %3211 = vrcp.f32 %v2028_v20  ;;  %v1935_v24 = vmul.f32 %v3208_v4, %v1929_v48  ;;  %v2040_v41 = vand.u32 2147483648, %v2028_v20  ;;  %v2038_v19 = vand.u32 2147483647, %v2028_v20 }
 0x47a   :  { %3213 = vrcp.f32 %v4467_v13  ;;  %v2019_v11 = vor.u32 1.1754944e-38, %v2018_v32  ;;  %vm2017_vm9 = vcmp.eq.f32.partialorder %v2016_v39, 8.507059e+37  ;;  %vm2034_vm10 = vweird.f32 %v2028_v20 }
 0x47b   :  { %2935 = vst [vmem:[%s4659_s3 + $0x14] sm:$0x3] %v1935_v24  ;;  %v2075_v40 = vpack.c.bf16 %v1935_v24, %v1935_v24  ;;  %3215 = vtanh.f32 %v2044_v55  ;;  %vm2039_vm12 = vcmp.eq.f32.partialorder %v2038_v19, 8.507059e+37  ;;  %vm2058_vm14 = vweird.f32 %v4467_v13  ;;  %v4944_v24 = vld [vmem:[#allocation31_spill] sm:$0xff] }
 0x47d   :  { %v3210_v49 = vpop.eup %3209  ;;  %2084 = vmatmul.bf16.vlgmr.msra.gmra.mxu0 %v2075_v40  ;;  %2097 = vmatmul.bf16.vlgmr.msra.gmra.mxu1 %v2075_v40 }
 0x47e   :  { %v2008_v18 = vmul.f32 %v3210_v49, %v2006_v42  ;;  %2110 = vmatmul.bf16.vlgmr.msra.gmra.mxu2 %v2075_v40  ;;  %2123 = vmatmul.bf16.vlgmr.msra.gmra.mxu3 %v2075_v40  ;;  %vm2013_vm5 = vweird.f32 %v3210_v49  ;;  %v4947_v40 = vld [vmem:[#allocation34_spill] sm:$0xff] }
 0x47f   :  { %v3212_v47 = vpop.eup %3211  ;;  %2350 = vmatpush.bf16.msra.mxu0 %v3345_v3  ;;  %2363 = vmatpush.bf16.msra.mxu1 %v3356_v7  ;;  %vm2014_vm7 = vmor %vm2012_vm6, %vm2013_vm5 }
 0x480   :  { %v2009_v63 = vsub.f32 1.0, %v2008_v18  ;;  %v4475_v53 = vpop.eup %3213  ;;  %v2030_v36 = vmul.f32 %v3212_v47, %v2028_v20  ;;  %2376 = vmatpush.bf16.msra.mxu2 %v3358_v8  ;;  %2389 = vmatpush.bf16.msra.mxu3 %v3370_v12  ;;  %vm2035_vm8 = vweird.f32 %v3212_v47  ;;  %v2041_v8 = vor.u32 1.1754944e-38, %v2040_v41  ;;  %v4942_v20 = vld [vmem:[#allocation29_spill] sm:$0xff] }
 0x481   :  { %v2054_v31 = vmul.f32 %v4475_v53, %v4467_v13  ;;  %vm2036_vm11 = vmor %vm2034_vm10, %vm2035_vm8  ;;  %v3216_v42 = vpop.eup %3215  ;;  %vm2059_vm13 = vweird.f32 %v4475_v53  ;;  %v4946_v18 = vld [vmem:[#allocation33_spill] sm:$0xff] }
 0x482   :  { %v2010_v30 = vmul.f32 %v3210_v49, %v2009_v63  ;;  %v2031_v54 = vsub.f32 1.0, %v2030_v36  ;;  %vm2060_vm15 = vmor %vm2058_vm14, %vm2059_vm13 }
 0x483   :  { %v2055_v2 = vsub.f32 1.0, %v2054_v31  ;;  %2351 = vmatpush.bf16.msra.mxu0 %v3383_v16  ;;  %2364 = vmatpush.bf16.msra.mxu1 %v3385_v17 }
 0x484   :  { %v2011_v1 = vadd.f32 %v3210_v49, %v2010_v30  ;;  %v2032_v26 = vmul.f32 %v3212_v47, %v2031_v54  ;;  %2377 = vmatpush.bf16.msra.mxu2 %v3397_v21  ;;  %2390 = vmatpush.bf16.msra.mxu3 %v3408_v25 }
 0x485   :  { %v2056_v48 = vmul.f32 %v4475_v53, %v2055_v2 }
 0x486   :  { %v2015_v10 = vsel %vm2014_vm7, %v3210_v49, %v2011_v1  ;;  %v2033_v3 = vadd.f32 %v3212_v47, %v2032_v26  ;;  %v4945_v49 = vld [vmem:[#allocation32_spill] sm:$0xff]  ;;  %v2941_v1 = vld [vmem:[%s4656_s0 + $0x60] sm:$0xff] }
 0x487   :  { %v2020_v7 = vsel %vm2017_vm9, %v2019_v11, %v2015_v10  ;;  %2352 = vmatpush.bf16.msra.mxu0 %v3420_v29  ;;  %2365 = vmatpush.bf16.msra.mxu1 %v3433_v33  ;;  %v2057_v25 = vadd.f32 %v4475_v53, %v2056_v48  ;;  %v2064_v29 = vand.u32 2147483648, %v4467_v13  ;;  %v2062_v33 = vand.u32 2147483647, %v4467_v13  ;;  %v4943_v13 = vld [vmem:[#allocation30_spill] sm:$0xff] }
 0x488   :  { %v2037_v12 = vsel %vm2036_vm11, %v3212_v47, %v2033_v3  ;;  %v2069_v16 = vmul.f32 %v3216_v42, %v2020_v7  ;;  %2378 = vmatpush.bf16.msra.mxu2 %v3435_v34  ;;  %2391 = vmatpush.bf16.msra.mxu3 %v3447_v38  ;;  %v4948_v47 = vld [vmem:[#allocation35_spill] sm:$0xff] }
 0x489   :  { %v2042_v4 = vsel %vm2039_vm12, %v2041_v8, %v2037_v12  ;;  %v2061_v34 = vsel %vm2060_vm15, %v4475_v53, %v2057_v25  ;;  %v2065_v38 = vor.u32 1.1754944e-38, %v2064_v29  ;;  %vm2063_vm3 = vcmp.eq.f32.partialorder %v2062_v33, 8.507059e+37 }
 0x48a   :  { %v2068_v17 = vmul.f32 %v2042_v4, %v4362_v0  ;;  %v4938_v0 = vld [vmem:[#allocation25_spill] sm:$0xff] }
 0x48b   :  { %2353 = vmatpush.bf16.msra.mxu0 %v3465_v44  ;;  %2366 = vmatpush.bf16.msra.mxu1 %v3469_v45  ;;  %v2066_v45 = vsel %vm2063_vm3, %v2065_v38, %v2061_v34 }
 0x48c   :  { %v4493_v21 = vadd.f32 %v2069_v16, %v2068_v17  ;;  %2379 = vmatpush.bf16.msra.mxu2 %v3471_v46  ;;  %2392 = vmatpush.bf16.msra.mxu3 %v3483_v50 }
 0x48e   :  { %3217 = vtanh.f32 %v4493_v21 }
 0x48f   :  { %2354 = vmatpush.bf16.msra.mxu0 %v3501_v56  ;;  %2367 = vmatpush.bf16.msra.mxu1 %v3505_v57  ;;  %v4921_v56 = vld [vmem:[#allocation8_spill] sm:$0xff]  ;;  %v4922_v57 = vld [vmem:[#allocation9_spill] sm:$0xff] }
 0x490   :  { %2380 = vmatpush.bf16.msra.mxu2 %v3507_v58  ;;  %2393 = vmatpush.bf16.msra.mxu3 %v3519_v62  ;;  %v4923_v58 = vld [vmem:[#allocation10_spill] sm:$0xff]  ;;  %v4924_v62 = vld [vmem:[#allocation11_spill] sm:$0xff] }
 0x493   :  { %2355 = vmatpush.bf16.msra.mxu0 %v3537_v5  ;;  %2368 = vmatpush.bf16.msra.mxu1 %v3541_v6  ;;  %v4925_v5 = vld [vmem:[#allocation12_spill] sm:$0xff]  ;;  %v4926_v6 = vld [vmem:[#allocation13_spill] sm:$0xff] }
 0x494   :  { %v3218_v44 = vpop.eup %3217  ;;  %2381 = vmatpush.bf16.msra.mxu2 %v3543_v9  ;;  %2394 = vmatpush.bf16.msra.mxu3 %v3555_v14  ;;  %v4927_v9 = vld [vmem:[#allocation14_spill] sm:$0xff]  ;;  %v4928_v14 = vld [vmem:[#allocation15_spill] sm:$0xff] }
 0x495   :  { %v2072_v46 = vmul.f32 %v3218_v44, %v2066_v45 }
 0x497   :  { %2940 = vst [vmem:[%s4659_s3 + $0xa] sm:$0x3] %v2072_v46  ;;  %v2212_v50 = vpack.c.bf16 %v2072_v46, %v2072_v46  ;;  %2356 = vmatpush.bf16.msra.mxu0 %v3573_v23  ;;  %2369 = vmatpush.bf16.msra.mxu1 %v3583_v27  ;;  %v4929_v23 = vld [vmem:[#allocation16_spill] sm:$0xff]  ;;  %v4930_v27 = vld [vmem:[#allocation17_spill] sm:$0xff] }
 0x498   :  { %2382 = vmatpush.bf16.msra.mxu2 %v3585_v28  ;;  %2395 = vmatpush.bf16.msra.mxu3 %v3597_v35  ;;  %v4931_v28 = vld [vmem:[#allocation18_spill] sm:$0xff]  ;;  %v4932_v35 = vld [vmem:[#allocation19_spill] sm:$0xff] }
 0x499   :  { %2221 = vmatmul.bf16.vlgmr.msrb.gmra.mxu0 %v2212_v50  ;;  %2234 = vmatmul.bf16.vlgmr.msrb.gmra.mxu1 %v2212_v50 }
 0x49a   :  { %2247 = vmatmul.bf16.vlgmr.msrb.gmra.mxu2 %v2212_v50  ;;  %2260 = vmatmul.bf16.vlgmr.msrb.gmra.mxu3 %v2212_v50 }
 0x49b   :  { %2357 = vmatpush.bf16.msra.mxu0 %v3609_v43  ;;  %2370 = vmatpush.bf16.msra.mxu1 %v3613_v51  ;;  %v4933_v43 = vld [vmem:[#allocation20_spill] sm:$0xff]  ;;  %v4934_v51 = vld [vmem:[#allocation21_spill] sm:$0xff] }
 0x49c   :  { %2383 = vmatpush.bf16.msra.mxu2 %v3615_v52  ;;  %2396 = vmatpush.bf16.msra.mxu3 %v4888_v37  ;;  %v4935_v52 = vld [vmem:[#allocation22_spill] sm:$0xff] }
 0x49d   :  { %v4939_v37 = vld [vmem:[#allocation26_spill] sm:$0xff] }
 0x49f   :  { %2487 = vmatpush.bf16.msrb.mxu0 %v3620_v59  ;;  %2500 = vmatpush.bf16.msrb.mxu1 %v3622_v60  ;;  %v4936_v59 = vld [vmem:[#allocation23_spill] sm:$0xff]  ;;  %v4937_v60 = vld [vmem:[#allocation24_spill] sm:$0xff] }
 0x4a0   :  { %2513 = vmatpush.bf16.msrb.mxu2 %v4889_v15  ;;  %2526 = vmatpush.bf16.msrb.mxu3 %v4890_v22  ;;  %v4940_v15 = vld [vmem:[#allocation27_spill] sm:$0xff]  ;;  %v4941_v22 = vld [vmem:[#allocation28_spill] sm:$0xff] }
 0x4a3   :  { %2488 = vmatpush.bf16.msrb.mxu0 %v4921_v56  ;;  %2501 = vmatpush.bf16.msrb.mxu1 %v4922_v57 }
 0x4a4   :  { %2514 = vmatpush.bf16.msrb.mxu2 %v4923_v58  ;;  %2527 = vmatpush.bf16.msrb.mxu3 %v4924_v62 }
 0x4a7   :  { %2489 = vmatpush.bf16.msrb.mxu0 %v4925_v5  ;;  %2502 = vmatpush.bf16.msrb.mxu1 %v4926_v6 }
 0x4a8   :  { %2515 = vmatpush.bf16.msrb.mxu2 %v4927_v9  ;;  %2528 = vmatpush.bf16.msrb.mxu3 %v4928_v14 }
 0x4ab   :  { %2490 = vmatpush.bf16.msrb.mxu0 %v4929_v23  ;;  %2503 = vmatpush.bf16.msrb.mxu1 %v4930_v27 }
 0x4ac   :  { %2516 = vmatpush.bf16.msrb.mxu2 %v4931_v28  ;;  %2529 = vmatpush.bf16.msrb.mxu3 %v4932_v35  ;;  %v2946_v35 = vld [vmem:[%s4656_s0 + $0x18] sm:$0xff] }
 0x4af   :  { %2491 = vmatpush.bf16.msrb.mxu0 %v4933_v43  ;;  %2504 = vmatpush.bf16.msrb.mxu1 %v4934_v51 }
 0x4b0   :  { %2517 = vmatpush.bf16.msrb.mxu2 %v4935_v52  ;;  %2530 = vmatpush.bf16.msrb.mxu3 %v4936_v59 }
 0x4b3   :  { %2492 = vmatpush.bf16.msrb.mxu0 %v4937_v60  ;;  %2505 = vmatpush.bf16.msrb.mxu1 %v4938_v0 }
 0x4b4   :  { %2518 = vmatpush.bf16.msrb.mxu2 %v4939_v37  ;;  %2531 = vmatpush.bf16.msrb.mxu3 %v4940_v15 }
 0x4b7   :  { %2493 = vmatpush.bf16.msrb.mxu0 %v4941_v22  ;;  %2506 = vmatpush.bf16.msrb.mxu1 %v4942_v20 }
 0x4b8   :  { %2519 = vmatpush.bf16.msrb.mxu2 %v4943_v13  ;;  %2532 = vmatpush.bf16.msrb.mxu3 %v4944_v24 }
 0x4bb   :  { %2494 = vmatpush.bf16.msrb.mxu0 %v4945_v49  ;;  %2507 = vmatpush.bf16.msrb.mxu1 %v4946_v18 }
 0x4bc   :  { %2520 = vmatpush.bf16.msrb.mxu2 %v4947_v40  ;;  %2533 = vmatpush.bf16.msrb.mxu3 %v4948_v47 }
 0x4fa   :  { %v2085_v63 = vpop.f32.mrf.mxu0  ;;  %v2098_v55 = vpop.f32.mrf.mxu1 }
 0x4fb   :  { %v2132_v53 = vrot.slane %v2098_v55, 6 }
 0x4fd   :  { %v2135_v41 = vsel %vm315_vm0, %v2085_v63, %v2132_v53 }
 0x501   :  { %v2111_v36 = vpop.f32.mrf.mxu2  ;;  %v2124_v30 = vpop.f32.mrf.mxu3 }
 0x502   :  { %v2133_v32 = vrot.slane %v2111_v36, 4  ;;  %v2134_v31 = vrot.slane %v2124_v30, 2  ;;  %v2087_v39 = vpop.f32.mrf.mxu0  ;;  %v2100_v54 = vpop.f32.mrf.mxu1 }
 0x504   :  { %v2136_v26 = vsel %vm317_vm1, %v2133_v32, %v2134_v31 }
 0x505   :  { %v2137_v19 = vsel %vm319_vm2, %v2135_v41, %v2136_v26 }
 0x506   :  { %v2139_v10 = vadd.f32 %v2941_v1, %v2137_v19 }
 0x508   :  { %v2942_v11 = vmul.f32 -1.442695, %v2139_v10  ;;  %v2160_v2 = vrot.slane %v2139_v10, 2  ;;  %v2184_v3 = vrot.slane %v2139_v10, 6  ;;  %v2181_v46 = vrot.slane %v2139_v10, 4 }
 0x509   :  { %v2113_v7 = vpop.f32.mrf.mxu2  ;;  %v2126_v8 = vpop.f32.mrf.mxu3 }
 0x50a   :  { %3219 = vpow2.f32 %v2942_v11  ;;  %v2943_v12 = vmul.f32 -1.442695, %v2160_v2  ;;  %v2944_v42 = vmul.f32 -1.442695, %v2184_v3 }
 0x50c   :  { %3221 = vpow2.f32 %v2943_v12 }
 0x50d   :  { %3223 = vpow2.f32 %v2944_v42 }
 0x510   :  { %v3220_v4 = vpop.eup %3219 }
 0x511   :  { %v2143_v48 = vadd.f32 1.0, %v3220_v4 }
 0x512   :  { %v3222_v16 = vpop.eup %3221 }
 0x513   :  { %v3224_v17 = vpop.eup %3223  ;;  %3225 = vrcp.f32 %v2143_v48  ;;  %v2165_v25 = vadd.f32 1.0, %v3222_v16  ;;  %v2155_v23 = vand.u32 2147483648, %v2143_v48  ;;  %v2153_v59 = vand.u32 2147483647, %v2143_v48 }
 0x514   :  { %v4563_v29 = vadd.f32 1.0, %v3224_v17  ;;  %vm2149_vm5 = vweird.f32 %v2143_v48 }
 0x515   :  { %3227 = vrcp.f32 %v2165_v25  ;;  %v2177_v22 = vand.u32 2147483648, %v2165_v25  ;;  %v2156_v13 = vor.u32 1.1754944e-38, %v2155_v23  ;;  %v2175_v49 = vand.u32 2147483647, %v2165_v25 }
 0x516   :  { %v2222_v33 = vpop.f32.mrf.mxu0  ;;  %v2235_v34 = vpop.f32.mrf.mxu1  ;;  %3229 = vrcp.f32 %v4563_v29  ;;  %vm2154_vm8 = vcmp.eq.f32.partialorder %v2153_v59, 8.507059e+37  ;;  %vm2171_vm9 = vweird.f32 %v2165_v25  ;;  %v2201_v12 = vand.u32 2147483648, %v4563_v29 }
 0x517   :  { %v2269_v44 = vrot.slane %v2235_v34, 6  ;;  %3231 = vtanh.f32 %v2181_v46  ;;  %v2178_v39 = vor.u32 1.1754944e-38, %v2177_v22  ;;  %vm2176_vm11 = vcmp.eq.f32.partialorder %v2175_v49, 8.507059e+37 }
 0x518   :  { %vm2195_vm13 = vweird.f32 %v4563_v29  ;;  %v2199_v4 = vand.u32 2147483647, %v4563_v29 }
 0x519   :  { %v3226_v38 = vpop.eup %3225  ;;  %v2272_v28 = vsel %vm315_vm0, %v2222_v33, %v2269_v44 }
 0x51a   :  { %v2145_v45 = vmul.f32 %v3226_v38, %v2143_v48  ;;  %vm2150_vm4 = vweird.f32 %v3226_v38  ;;  %vm2200_vm15 = vcmp.eq.f32.partialorder %v2199_v4, 8.507059e+37 }
 0x51b   :  { %v3228_v57 = vpop.eup %3227  ;;  %vm4578_vm6 = vmor %vm2149_vm5, %vm2150_vm4 }
 0x51c   :  { %v2146_v58 = vsub.f32 1.0, %v2145_v45  ;;  %v4566_v14 = vpop.eup %3229  ;;  %v2167_v27 = vmul.f32 %v3228_v57, %v2165_v25  ;;  %vm2172_vm7 = vweird.f32 %v3228_v57  ;;  %v2202_v25 = vor.u32 1.1754944e-38, %v2201_v12 }
 0x51d   :  { %v2248_v50 = vpop.f32.mrf.mxu2  ;;  %v2261_v56 = vpop.f32.mrf.mxu3  ;;  %v2191_v52 = vmul.f32 %v4566_v14, %v4563_v29  ;;  %vm2173_vm10 = vmor %vm2171_vm9, %vm2172_vm7  ;;  %vm2196_vm12 = vweird.f32 %v4566_v14 }
 0x51e   :  { %v2270_v62 = vrot.slane %v2248_v50, 4  ;;  %v2271_v5 = vrot.slane %v2261_v56, 2  ;;  %v2224_v6 = vpop.f32.mrf.mxu0  ;;  %v2237_v9 = vpop.f32.mrf.mxu1  ;;  %v2147_v43 = vmul.f32 %v3226_v38, %v2146_v58  ;;  %v2168_v60 = vsub.f32 1.0, %v2167_v27  ;;  %vm2197_vm14 = vmor %vm2195_vm13, %vm2196_vm12 }
 0x51f   :  { %v2192_v63 = vsub.f32 1.0, %v2191_v52  ;;  %v3232_v54 = vpop.eup %3231 }
 0x520   :  { %v2273_v51 = vsel %vm317_vm1, %v2270_v62, %v2271_v5  ;;  %v2148_v37 = vadd.f32 %v3226_v38, %v2147_v43  ;;  %v2169_v24 = vmul.f32 %v3228_v57, %v2168_v60 }
 0x521   :  { %v2274_v0 = vsel %vm319_vm2, %v2272_v28, %v2273_v51  ;;  %v2193_v19 = vmul.f32 %v4566_v14, %v2192_v63 }
 0x522   :  { %v4576_v15 = vadd.f32 %v2946_v35, %v2274_v0  ;;  %v2152_v18 = vsel %vm4578_vm6, %v3226_v38, %v2148_v37  ;;  %v2170_v30 = vadd.f32 %v3228_v57, %v2169_v24 }
 0x523   :  { %v2157_v32 = vsel %vm2154_vm8, %v2156_v13, %v2152_v18  ;;  %v2194_v7 = vadd.f32 %v4566_v14, %v2193_v19 }
 0x524   :  { %v2947_v40 = vmul.f32 -1.442695, %v4576_v15  ;;  %v2297_v47 = vrot.slane %v4576_v15, 2  ;;  %v2321_v55 = vrot.slane %v4576_v15, 6  ;;  %v2174_v41 = vsel %vm2173_vm10, %v3228_v57, %v2170_v30 }
 0x525   :  { %v2250_v53 = vpop.f32.mrf.mxu2  ;;  %v2263_v36 = vpop.f32.mrf.mxu3  ;;  %v2179_v26 = vsel %vm2176_vm11, %v2178_v39, %v2174_v41  ;;  %v2206_v10 = vmul.f32 %v3232_v54, %v2157_v32  ;;  %v2198_v17 = vsel %vm2197_vm14, %v4566_v14, %v2194_v7  ;;  %v2318_v56 = vrot.slane %v4576_v15, 4 }
 0x526   :  { %3233 = vpow2.f32 %v2947_v40  ;;  %v2948_v31 = vmul.f32 -1.442695, %v2297_v47  ;;  %v2949_v1 = vmul.f32 -1.442695, %v2321_v55  ;;  %v2205_v11 = vmul.f32 %v2179_v26, %v4459_v61 }
 0x527   :  { %v2203_v34 = vsel %vm2200_vm15, %v2202_v25, %v2198_v17 }
 0x528   :  { %3235 = vpow2.f32 %v2948_v31  ;;  %v4590_v2 = vadd.f32 %v2206_v10, %v2205_v11  ;;  %v2951_v11 = vld [vmem:[%s4656_s0 + $0x70] sm:$0xff] }
 0x529   :  { %3237 = vpow2.f32 %v2949_v1 }
 0x52a   :  { %3239 = vtanh.f32 %v4590_v2 }
 0x52c   :  { %v3234_v3 = vpop.eup %3233 }
 0x52d   :  { %v2280_v8 = vadd.f32 1.0, %v3234_v3 }
 0x52e   :  { %v3236_v42 = vpop.eup %3235 }
 0x52f   :  { %v3238_v48 = vpop.eup %3237  ;;  %3241 = vrcp.f32 %v2280_v8  ;;  %v2302_v61 = vadd.f32 1.0, %v3236_v42  ;;  %v2292_v5 = vand.u32 2147483648, %v2280_v8  ;;  %v2290_v9 = vand.u32 2147483647, %v2280_v8 }
 0x530   :  { %v2326_v16 = vadd.f32 1.0, %v3238_v48  ;;  %v3240_v33 = vpop.eup %3239  ;;  %vm2286_vm4 = vweird.f32 %v2280_v8 }
 0x531   :  { %3243 = vrcp.f32 %v2302_v61  ;;  %v2209_v38 = vmul.f32 %v3240_v33, %v2203_v34  ;;  %v2314_v27 = vand.u32 2147483648, %v2302_v61  ;;  %v2312_v35 = vand.u32 2147483647, %v2302_v61 }
 0x532   :  { %3245 = vrcp.f32 %v2326_v16  ;;  %v2293_v51 = vor.u32 1.1754944e-38, %v2292_v5  ;;  %vm2291_vm7 = vcmp.eq.f32.partialorder %v2290_v9, 8.507059e+37  ;;  %vm2308_vm8 = vweird.f32 %v2302_v61 }
 0x533   :  { %2945 = vst [vmem:[%s4659_s3 + $0x18] sm:$0x3] %v2209_v38  ;;  %v2349_v29 = vpack.c.bf16 %v2209_v38, %v2209_v38  ;;  %3247 = vtanh.f32 %v2318_v56  ;;  %v2315_v0 = vor.u32 1.1754944e-38, %v2314_v27  ;;  %vm2313_vm10 = vcmp.eq.f32.partialorder %v2312_v35, 8.507059e+37 }
 0x534   :  { %v2338_v40 = vand.u32 2147483648, %v2326_v16  ;;  %vm2332_vm12 = vweird.f32 %v2326_v16  ;;  %v2336_v47 = vand.u32 2147483647, %v2326_v16 }
 0x535   :  { %v3242_v44 = vpop.eup %3241  ;;  %2358 = vmatmul.bf16.vlgmr.msra.gmra.mxu0 %v2349_v29  ;;  %2371 = vmatmul.bf16.vlgmr.msra.gmra.mxu1 %v2349_v29 }
 0x536   :  { %v2282_v45 = vmul.f32 %v3242_v44, %v2280_v8  ;;  %2384 = vmatmul.bf16.vlgmr.msra.gmra.mxu2 %v2349_v29  ;;  %2397 = vmatmul.bf16.vlgmr.msra.gmra.mxu3 %v2349_v29  ;;  %vm2287_vm3 = vweird.f32 %v3242_v44  ;;  %v2339_v55 = vor.u32 1.1754944e-38, %v2338_v40  ;;  %vm2337_vm14 = vcmp.eq.f32.partialorder %v2336_v47, 8.507059e+37 }
 0x537   :  { %v3244_v46 = vpop.eup %3243  ;;  %vm2288_vm5 = vmor %vm2286_vm4, %vm2287_vm3 }
 0x538   :  { %v2283_v50 = vsub.f32 1.0, %v2282_v45  ;;  %v3246_v57 = vpop.eup %3245  ;;  %v2304_v58 = vmul.f32 %v3244_v46, %v2302_v61  ;;  %vm2309_vm6 = vweird.f32 %v3244_v46 }
 0x539   :  { %v2328_v6 = vmul.f32 %v3246_v57, %v2326_v16  ;;  %vm2310_vm9 = vmor %vm2308_vm8, %vm2309_vm6  ;;  %v3248_v15 = vpop.eup %3247  ;;  %vm2333_vm11 = vweird.f32 %v3246_v57 }
 0x53a   :  { %v2284_v62 = vmul.f32 %v3242_v44, %v2283_v50  ;;  %v2305_v14 = vsub.f32 1.0, %v2304_v58  ;;  %vm2334_vm13 = vmor %vm2332_vm12, %vm2333_vm11 }
 0x53b   :  { %v2329_v52 = vsub.f32 1.0, %v2328_v6 }
 0x53c   :  { %v2285_v23 = vadd.f32 %v3242_v44, %v2284_v62  ;;  %v2306_v28 = vmul.f32 %v3244_v46, %v2305_v14 }
 0x53d   :  { %v2330_v20 = vmul.f32 %v3246_v57, %v2329_v52 }
 0x53e   :  { %v2289_v43 = vsel %vm2288_vm5, %v3242_v44, %v2285_v23  ;;  %v2307_v59 = vadd.f32 %v3244_v46, %v2306_v28 }
 0x53f   :  { %v2294_v60 = vsel %vm2291_vm7, %v2293_v51, %v2289_v43  ;;  %v2331_v18 = vadd.f32 %v3246_v57, %v2330_v20 }
 0x540   :  { %v2311_v37 = vsel %vm2310_vm9, %v3244_v46, %v2307_v59  ;;  %v2343_v13 = vmul.f32 %v3248_v15, %v2294_v60  ;;  %v2485_v60 = vld [vmem:[%s4656_s0 + $0x8] sm:$0xff] }
 0x541   :  { %v2316_v22 = vsel %vm2313_vm10, %v2315_v0, %v2311_v37  ;;  %v2335_v63 = vsel %vm2334_vm13, %v3246_v57, %v2331_v18 }
 0x542   :  { %v2342_v24 = vmul.f32 %v2316_v22, %v4493_v21  ;;  %v2340_v36 = vsel %vm2337_vm14, %v2339_v55, %v2335_v63 }
 0x544   :  { %v4604_v49 = vadd.f32 %v2343_v13, %v2342_v24 }
 0x546   :  { %3249 = vtanh.f32 %v4604_v49 }
 0x54c   :  { %v3250_v53 = vpop.eup %3249 }
 0x54d   :  { %v2346_v30 = vmul.f32 %v3250_v53, %v2340_v36 }
 0x54f   :  { %2950 = vst [vmem:[%s4659_s3 + $0x6] sm:$0x3] %v2346_v30  ;;  %v2486_v21 = vpack.c.bf16 %v2346_v30, %v2346_v30 }
 0x551   :  { %2495 = vmatmul.bf16.vlgmr.msrb.gmra.mxu0 %v2486_v21  ;;  %2508 = vmatmul.bf16.vlgmr.msrb.gmra.mxu1 %v2486_v21 }
 0x552   :  { %2521 = vmatmul.bf16.vlgmr.msrb.gmra.mxu2 %v2486_v21  ;;  %2534 = vmatmul.bf16.vlgmr.msrb.gmra.mxu3 %v2486_v21 }
 0x5b2   :  { %v2359_v32 = vpop.f32.mrf.mxu0  ;;  %v2372_v31 = vpop.f32.mrf.mxu1 }
 0x5b3   :  { %v2406_v39 = vrot.slane %v2372_v31, 6 }
 0x5b5   :  { %v2409_v3 = vsel %vm315_vm0, %v2359_v32, %v2406_v39 }
 0x5b9   :  { %v2385_v54 = vpop.f32.mrf.mxu2  ;;  %v2398_v1 = vpop.f32.mrf.mxu3 }
 0x5ba   :  { %v2407_v41 = vrot.slane %v2385_v54, 4  ;;  %v2408_v26 = vrot.slane %v2398_v1, 2  ;;  %v2361_v19 = vpop.f32.mrf.mxu0  ;;  %v2374_v10 = vpop.f32.mrf.mxu1 }
 0x5bc   :  { %v2410_v7 = vsel %vm317_vm1, %v2407_v41, %v2408_v26 }
 0x5bd   :  { %v2411_v8 = vsel %vm319_vm2, %v2409_v3, %v2410_v7 }
 0x5be   :  { %v2413_v12 = vadd.f32 %v2951_v11, %v2411_v8 }
 0x5c0   :  { %v2952_v42 = vmul.f32 -1.442695, %v2413_v12  ;;  %v2434_v4 = vrot.slane %v2413_v12, 2  ;;  %v2458_v48 = vrot.slane %v2413_v12, 6  ;;  %v2455_v62 = vrot.slane %v2413_v12, 4 }
 0x5c1   :  { %v2387_v61 = vpop.f32.mrf.mxu2  ;;  %v2400_v16 = vpop.f32.mrf.mxu3 }
 0x5c2   :  { %3251 = vpow2.f32 %v2952_v42  ;;  %v2953_v17 = vmul.f32 -1.442695, %v2434_v4  ;;  %v2954_v25 = vmul.f32 -1.442695, %v2458_v48 }
 0x5c4   :  { %3253 = vpow2.f32 %v2953_v17 }
 0x5c5   :  { %3255 = vpow2.f32 %v2954_v25 }
 0x5c8   :  { %v3252_v33 = vpop.eup %3251 }
 0x5c9   :  { %v2417_v34 = vadd.f32 1.0, %v3252_v33 }
 0x5ca   :  { %v3254_v38 = vpop.eup %3253 }
 0x5cb   :  { %v3256_v44 = vpop.eup %3255  ;;  %3257 = vrcp.f32 %v2417_v34  ;;  %v2439_v45 = vadd.f32 1.0, %v3254_v38  ;;  %v2429_v51 = vand.u32 2147483648, %v2417_v34  ;;  %v2427_v22 = vand.u32 2147483647, %v2417_v34 }
 0x5cc   :  { %v4616_v29 = vadd.f32 1.0, %v3256_v44  ;;  %vm2423_vm3 = vweird.f32 %v2417_v34 }
 0x5cd   :  { %3259 = vrcp.f32 %v2439_v45  ;;  %v2451_v18 = vand.u32 2147483648, %v2439_v45  ;;  %v2430_v63 = vor.u32 1.1754944e-38, %v2429_v51  ;;  %v2449_v53 = vand.u32 2147483647, %v2439_v45 }
 0x5ce   :  { %v2496_v46 = vpop.f32.mrf.mxu0  ;;  %v2509_v50 = vpop.f32.mrf.mxu1  ;;  %3261 = vrcp.f32 %v4616_v29  ;;  %v2475_v16 = vand.u32 2147483648, %v4616_v29  ;;  %vm2469_vm8 = vweird.f32 %v4616_v29  ;;  %v2473_v33 = vand.u32 2147483647, %v4616_v29 }
 0x5cf   :  { %v2543_v57 = vrot.slane %v2509_v50, 6  ;;  %3263 = vtanh.f32 %v2455_v62  ;;  %v2452_v26 = vor.u32 1.1754944e-38, %v2451_v18  ;;  %vm2450_vm6 = vcmp.eq.f32.partialorder %v2449_v53, 8.507059e+37 }
 0x5d0   :  { %vm2474_vm10 = vcmp.eq.f32.partialorder %v2473_v33, 8.507059e+37 }
 0x5d1   :  { %v3258_v56 = vpop.eup %3257  ;;  %v2546_v59 = vsel %vm315_vm0, %v2496_v46, %v2543_v57 }
 0x5d2   :  { %v2419_v58 = vmul.f32 %v3258_v56, %v2417_v34  ;;  %vm2424_vm15 = vweird.f32 %v3258_v56 }
 0x5d3   :  { %v3260_v9 = vpop.eup %3259  ;;  %vm4631_vm0 = vmor %vm2423_vm3, %vm2424_vm15 }
 0x5d4   :  { %v2420_v14 = vsub.f32 1.0, %v2419_v58  ;;  %v4619_v43 = vpop.eup %3261  ;;  %v2441_v52 = vmul.f32 %v3260_v9, %v2439_v45  ;;  %vm2446_vm4 = vweird.f32 %v3260_v9 }
 0x5d5   :  { %v2522_v5 = vpop.f32.mrf.mxu2  ;;  %v2535_v6 = vpop.f32.mrf.mxu3  ;;  %v2465_v37 = vmul.f32 %v4619_v43, %v4616_v29  ;;  %vm2470_vm7 = vweird.f32 %v4619_v43 }
 0x5d6   :  { %v2544_v23 = vrot.slane %v2522_v5, 4  ;;  %v2545_v27 = vrot.slane %v2535_v6, 2  ;;  %v2498_v28 = vpop.f32.mrf.mxu0  ;;  %v2511_v35 = vpop.f32.mrf.mxu1  ;;  %v2421_v0 = vmul.f32 %v3258_v56, %v2420_v14  ;;  %v2442_v20 = vsub.f32 1.0, %v2441_v52  ;;  %vm2471_vm9 = vmor %vm2469_vm8, %vm2470_vm7 }
 0x5d7   :  { %v2466_v30 = vsub.f32 1.0, %v2465_v37  ;;  %v3264_v10 = vpop.eup %3263 }
 0x5d8   :  { %v2547_v15 = vsel %vm317_vm1, %v2544_v23, %v2545_v27  ;;  %v2422_v24 = vadd.f32 %v3258_v56, %v2421_v0  ;;  %v2443_v55 = vmul.f32 %v3260_v9, %v2442_v20  ;;  %vm2428_vm1 = vcmp.eq.f32.partialorder %v2427_v22, 8.507059e+37 }
 0x5d9   :  { %v2548_v13 = vsel %vm319_vm2, %v2546_v59, %v2547_v15  ;;  %vm2445_vm2 = vweird.f32 %v2439_v45  ;;  %v2467_v8 = vmul.f32 %v4619_v43, %v2466_v30  ;;  %v2476_v45 = vor.u32 1.1754944e-38, %v2475_v16 }
 0x5da   :  { %v4629_v40 = vadd.f32 %v2548_v13, %v2485_v60  ;;  %v2426_v36 = vsel %vm4631_vm0, %v3258_v56, %v2422_v24  ;;  %v2444_v31 = vadd.f32 %v3260_v9, %v2443_v55  ;;  %vm2447_vm5 = vmor %vm2445_vm2, %vm2446_vm4 }
 0x5db   :  { %v2431_v41 = vsel %vm2428_vm1, %v2430_v63, %v2426_v36  ;;  %v2468_v61 = vadd.f32 %v4619_v43, %v2467_v8 }
 0x5dc   :  { %v2956_v21 = vmul.f32 -1.442695, %v4629_v40  ;;  %v2571_v32 = vrot.slane %v4629_v40, 2  ;;  %v2595_v39 = vrot.slane %v4629_v40, 6  ;;  %v2448_v11 = vsel %vm2447_vm5, %v3260_v9, %v2444_v31 }
 0x5dd   :  { %v2524_v54 = vpop.f32.mrf.mxu2  ;;  %v2537_v1 = vpop.f32.mrf.mxu3  ;;  %v2453_v7 = vsel %vm2450_vm6, %v2452_v26, %v2448_v11  ;;  %v2480_v42 = vmul.f32 %v3264_v10, %v2431_v41  ;;  %v2592_v5 = vrot.slane %v4629_v40, 4 }
 0x5de   :  { %3265 = vpow2.f32 %v2956_v21  ;;  %v2957_v19 = vmul.f32 -1.442695, %v2571_v32  ;;  %v2958_v3 = vmul.f32 -1.442695, %v2595_v39  ;;  %v2479_v12 = vmul.f32 %v2453_v7, %v4590_v2 }
 0x5df   :  { %v2472_v2 = vsel %vm2471_vm9, %v4619_v43, %v2468_v61 }
 0x5e0   :  { %3267 = vpow2.f32 %v2957_v19  ;;  %v2481_v4 = vadd.f32 %v2480_v42, %v2479_v12  ;;  %v2477_v50 = vsel %vm2474_vm10, %v2476_v45, %v2472_v2 }
 0x5e1   :  { %3269 = vpow2.f32 %v2958_v3 }
 0x5e2   :  { %3271 = vtanh.f32 %v2481_v4 }
 0x5e4   :  { %v3266_v48 = vpop.eup %3265 }
 0x5e5   :  { %v2554_v17 = vadd.f32 1.0, %v3266_v48 }
 0x5e6   :  { %v3268_v25 = vpop.eup %3267 }
 0x5e7   :  { %v3270_v34 = vpop.eup %3269  ;;  %3273 = vrcp.f32 %v2554_v17  ;;  %v2576_v38 = vadd.f32 1.0, %v3268_v25  ;;  %v2566_v23 = vand.u32 2147483648, %v2554_v17  ;;  %v2564_v28 = vand.u32 2147483647, %v2554_v17 }
 0x5e8   :  { %v2600_v44 = vadd.f32 1.0, %v3270_v34  ;;  %v3272_v46 = vpop.eup %3271  ;;  %vm2560_vm12 = vweird.f32 %v2554_v17 }
 0x5e9   :  { %3275 = vrcp.f32 %v2576_v38  ;;  %v2483_v56 = vmul.f32 %v3272_v46, %v2477_v50  ;;  %v2588_v51 = vand.u32 2147483648, %v2576_v38  ;;  %v2586_v59 = vand.u32 2147483647, %v2576_v38 }
 0x5ea   :  { %3277 = vrcp.f32 %v2600_v44  ;;  %v2567_v0 = vor.u32 1.1754944e-38, %v2566_v23  ;;  %vm2565_vm15 = vcmp.eq.f32.partialorder %v2564_v28, 8.507059e+37  ;;  %vm2582_vm3 = vweird.f32 %v2576_v38 }
 0x5eb   :  { %2955 = vst [vmem:[%s4659_s3 + $0x1c] sm:$0x3] %v2483_v56  ;;  %3279 = vtanh.f32 %v2592_v5  ;;  %v2589_v20 = vor.u32 1.1754944e-38, %v2588_v51  ;;  %vm2587_vm4 = vcmp.eq.f32.partialorder %v2586_v59, 8.507059e+37  ;;  %v2612_v36 = vand.u32 2147483648, %v2600_v44 }
 0x5ec   :  { %vm2606_vm2 = vweird.f32 %v2600_v44  ;;  %v2610_v30 = vand.u32 2147483647, %v2600_v44 }
 0x5ed   :  { %v3274_v57 = vpop.eup %3273  ;;  %v2613_v32 = vor.u32 1.1754944e-38, %v2612_v36 }
 0x5ee   :  { %v2556_v29 = vmul.f32 %v3274_v57, %v2554_v17  ;;  %vm2561_vm11 = vweird.f32 %v3274_v57  ;;  %vm2611_vm6 = vcmp.eq.f32.partialorder %v2610_v30, 8.507059e+37 }
 0x5ef   :  { %v3276_v58 = vpop.eup %3275  ;;  %vm2562_vm13 = vmor %vm2560_vm12, %vm2561_vm11 }
 0x5f0   :  { %v2557_v62 = vsub.f32 1.0, %v2556_v29  ;;  %v3278_v6 = vpop.eup %3277  ;;  %v2578_v9 = vmul.f32 %v3276_v58, %v2576_v38  ;;  %vm2583_vm14 = vweird.f32 %v3276_v58 }
 0x5f1   :  { %v2602_v27 = vmul.f32 %v3278_v6, %v2600_v44  ;;  %vm2584_vm0 = vmor %vm2582_vm3, %vm2583_vm14  ;;  %v3280_v24 = vpop.eup %3279  ;;  %vm2607_vm1 = vweird.f32 %v3278_v6 }
 0x5f2   :  { %v2558_v14 = vmul.f32 %v3274_v57, %v2557_v62  ;;  %v2579_v35 = vsub.f32 1.0, %v2578_v9  ;;  %vm2608_vm5 = vmor %vm2606_vm2, %vm2607_vm1 }
 0x5f3   :  { %v2603_v37 = vsub.f32 1.0, %v2602_v27 }
 0x5f4   :  { %v2559_v43 = vadd.f32 %v3274_v57, %v2558_v14  ;;  %v2580_v52 = vmul.f32 %v3276_v58, %v2579_v35 }
 0x5f5   :  { %v2604_v40 = vmul.f32 %v3278_v6, %v2603_v37 }
 0x5f6   :  { %v2563_v60 = vsel %vm2562_vm13, %v3274_v57, %v2559_v43  ;;  %v2581_v15 = vadd.f32 %v3276_v58, %v2580_v52 }
 0x5f7   :  { %v2568_v22 = vsel %vm2565_vm15, %v2567_v0, %v2563_v60  ;;  %v2605_v53 = vadd.f32 %v3278_v6, %v2604_v40 }
 0x5f8   :  { %v2585_v13 = vsel %vm2584_vm0, %v3276_v58, %v2581_v15  ;;  %v2617_v63 = vmul.f32 %v3280_v24, %v2568_v22 }
 0x5f9   :  { %v2590_v18 = vsel %vm2587_vm4, %v2589_v20, %v2585_v13  ;;  %v2609_v21 = vsel %vm2608_vm5, %v3278_v6, %v2605_v53 }
 0x5fa   :  { %v2616_v47 = vmul.f32 %v2590_v18, %v4604_v49  ;;  %v2614_v39 = vsel %vm2611_vm6, %v2613_v32, %v2609_v21 }
 0x5fc   :  { %v2618_v55 = vadd.f32 %v2617_v63, %v2616_v47 }
 0x5fe   :  { %3281 = vtanh.f32 %v2618_v55 }
 0x604   :  { %v3282_v31 = vpop.eup %3281 }
 0x605   :  { %v2620_v54 = vmul.f32 %v3282_v31, %v2614_v39 }
 0x607   :  { %2621 = vst [vmem:[%s4659_s3 + $0x2] sm:$0x3] %v2620_v54 }
 0x608   :  { %2626 = vsyncpa [#allocation3], 1 }

</bundles_post_ra>
